<compile_context>
chip_gen: v7x
topology: tpu7x:2x2x1
jax: 0.10.0
libtpu: 0.0.40
codegen_flags: <defaults>
</compile_context>

<pallas_src>
import numpy as np
import jax
import jax.numpy as jnp
from jax import lax
from jax.experimental import pallas as pl
from jax.experimental.pallas import tpu as pltpu


# --------------------------------------------------------------------------- #
# Kernel                                                                      #
# --------------------------------------------------------------------------- #
def _make_loss_kernel(row_tile, t_tile):
    n_row_chunks = row_tile // 8
    n_lane_chunks = t_tile // 128

    def kernel(mo_ref, mp_ref, mt_ref, go_ref, gt_ref, out_ref, acc_ref):
        r = pl.program_id(0)          # row-block axis ("parallel")
        t = pl.program_id(1)          # time-block axis ("arbitrary", reduction)
        nt = pl.num_programs(1)

        rows = lax.broadcasted_iota(jnp.int32, (8, 128), 0)
        cols = lax.broadcasted_iota(jnp.int32, (8, 128), 1)

        # --- init: zero the per-row-block accumulators (acc + resident out) ---
        @pl.when(t == 0)
        def _init():
            acc_ref[...] = jnp.zeros_like(acc_ref)
            out_ref[0] = jnp.zeros((8, 128), dtype=out_ref.dtype)

        # --- gate BCE once, at the very first grid step: hidden under the
        #     first (unavoidably exposed) mel DMA; keeps EUP exp/log out of the
        #     reduction-axis epilogue. -----------------------------------------
        @pl.when(jnp.logical_and(r == 0, t == 0))
        def _gate():
            x = go_ref[...].astype(jnp.float32)
            y = gt_ref[...].astype(jnp.float32)
            # BCEWithLogits (sum): max(x,0) - x*y + log1p(exp(-|x|)).
            # log1p via 3-term series for small z (stable, no log1p lowering).
            z = jnp.exp(-jnp.abs(x))                     # z in [0, 1]
            log1p_z = jnp.where(z < 1e-2,
                                z * (1.0 - z * (0.5 - z * (1.0 / 3.0))),
                                jnp.log(1.0 + z))
            bce = jnp.maximum(x, 0.0) - x * y + log1p_z
            gsum = jnp.sum(bce)
            out_ref[0] = jnp.where((rows == 1) & (cols == 0), gsum, 0.0)

        # --- hot streaming path: fused squared error folded straight down to a
        #     single (8,128) partial via vreg-aligned static slices (pure VPU). --
        def row_chunk(i):
            sl = slice(i * 8, (i + 1) * 8)
            tgt = mt_ref[sl, :].astype(jnp.float32)
            d1 = mo_ref[sl, :].astype(jnp.float32) - tgt
            d2 = mp_ref[sl, :].astype(jnp.float32) - tgt
            return d1 * d1 + d2 * d2                     # (8, t_tile)

        s = row_chunk(0)
        for i in range(1, n_row_chunks):
            s = s + row_chunk(i)
        p = s[:, 0:128]
        for j in range(1, n_lane_chunks):
            p = p + s[:, j * 128:(j + 1) * 128]
        acc_ref[...] += p                                # (8, 128)

        # --- finalize this row block: one tiny XLU reduce of the 4 KiB slab. ---
        @pl.when(t == nt - 1)
        def _fin():
            msum = jnp.sum(acc_ref[...])
            out_ref[0] = out_ref[0] + jnp.where((rows == 0) & (cols == 0),
                                                msum, 0.0)

    return kernel


# --------------------------------------------------------------------------- #
# Wrapper                                                                     #
# --------------------------------------------------------------------------- #
def _largest_unit_divisor(n, unit, cap):
    """Largest d with d % unit == 0, n % d == 0, d <= cap (assumes n % unit == 0)."""
    best = unit
    top = min(n, max(unit, cap))
    for d in range(unit, top + 1, unit):
        if n % d == 0:
            best = d
    return best


def _device_budgets():
    """(per-tensor input-tile byte cap, vmem_limit_bytes) per TPU generation."""
    cap, limit = 2 * 1024 * 1024, 32 * 1024 * 1024   # v5e / v7x / unknown: safe
    try:
        kind = jax.devices()[0].device_kind.lower()
    except Exception:
        return cap, limit
    if "v6" in kind or "trillium" in kind:
        cap, limit = 4 * 1024 * 1024, 64 * 1024 * 1024   # 128 MiB physical VMEM
    return cap, limit


def tacotron2_loss(model_output, targets, output_len, *, tile_cap_bytes=None):
    """model_output = (mel_out, mel_out_postnet, gate_out, _);
       targets = (mel_target, gate_target); output_len: [B] int lengths."""
    mel_out, mel_out_postnet, gate_out, _ = model_output
    mel_target, gate_target = targets

    B, n_mel, T = mel_target.shape
    R = B * n_mel
    mo = mel_out.reshape(R, T)
    mp = mel_out_postnet.reshape(R, T)
    mt = mel_target.reshape(R, T)

    # Pad to the (8, 128) vreg tile so every block shape is legal and the tile
    # picker never falls back to a whole-array block.  Zero padding is exact for
    # the MSE sum ((0 - 0)^2 == 0); we divide by the *unpadded* element count.
    R_p = -(-R // 8) * 8
    T_p = -(-T // 128) * 128
    if R_p != R or T_p != T:
        pad = ((0, R_p - R), (0, T_p - T))
        mo = jnp.pad(mo, pad)
        mp = jnp.pad(mp, pad)
        mt = jnp.pad(mt, pad)

    # Gate tensors are tiny (~1/n_mel of the mel bytes): flatten, pad so the lane
    # dim is 128-aligned (pad logits with a huge negative so BCE contribution is
    # exactly zero), keep them VMEM-resident for the whole grid.
    go_flat = gate_out.reshape(-1)
    gt_flat = gate_target.reshape(-1)
    G = go_flat.shape[0]
    G_p = -(-G // 128) * 128
    if G_p != G:
        go_flat = jnp.pad(go_flat, (0, G_p - G), constant_values=-1e9)
        gt_flat = jnp.pad(gt_flat, (0, G_p - G), constant_values=0.0)
    go2 = go_flat.reshape(1, G_p)
    gt2 = gt_flat.reshape(1, G_p)

    auto_cap, vmem_limit = _device_budgets()
    if tile_cap_bytes is None:
        tile_cap_bytes = auto_cap
    cap_elems = max(8 * 128, tile_cap_bytes // mo.dtype.itemsize)

    # Lane (time) tile first, as wide as the budget allows; rows fill the rest.
    t_tile = _largest_unit_divisor(T_p, 128, max(128, cap_elems // 8))
    row_tile = _largest_unit_divisor(R_p, 8, max(8, cap_elems // t_tile))
    n_r = R_p // row_tile
    n_t = T_p // t_tile

    mel_bytes = 3 * mo.size * mo.dtype.itemsize
    gate_bytes = go2.size * go2.dtype.itemsize + gt2.size * gt2.dtype.itemsize
    cost = pl.CostEstimate(
        flops=int(6 * mo.size + 6 * go2.size),
        transcendentals=int(2 * go2.size),
        bytes_accessed=int(mel_bytes + gate_bytes + n_r * 8 * 128 * 4),
    )

    grid_spec = pltpu.PrefetchScalarGridSpec(
        num_scalar_prefetch=0,
        grid=(n_r, n_t),
        in_specs=[
            pl.BlockSpec((row_tile, t_tile), lambda r, t: (r, t)),   # mel_out
            pl.BlockSpec((row_tile, t_tile), lambda r, t: (r, t)),   # mel_out_postnet
            pl.BlockSpec((row_tile, t_tile), lambda r, t: (r, t)),   # mel_target
            pl.BlockSpec(go2.shape, lambda r, t: (0, 0)),            # gate_out (resident)
            pl.BlockSpec(gt2.shape, lambda r, t: (0, 0)),            # gate_target (resident)
        ],
        out_specs=pl.BlockSpec((1, 8, 128), lambda r, t: (r, 0, 0)),
        scratch_shapes=[pltpu.VMEM((8, 128), jnp.float32)],
    )

    partials = pl.pallas_call(
        _make_loss_kernel(row_tile, t_tile),
        out_shape=jax.ShapeDtypeStruct((n_r, 8, 128), jnp.float32),
        grid_spec=grid_spec,
        compiler_params=pltpu.CompilerParams(
            dimension_semantics=("parallel", "arbitrary"),
            vmem_limit_bytes=vmem_limit,
        ),
        cost_estimate=cost,
    )(mo, mp, mt, go2, gt2)

    # Tiny final reduction + coefficient multiply: scalar glue in the wrapper.
    mel_sumsq = jnp.sum(partials[:, 0, 0])
    gate_sum = partials[0, 1, 0]

    lens = output_len.astype(jnp.float32)
    coef = mel_target.shape[0] * jnp.max(lens) / jnp.sum(lens)

    mel_loss = coef * (mel_sumsq / float(B * n_mel * T))   # mean(d1^2) + mean(d2^2)
    gate_loss = coef * (gate_sum / float(G))
    total_loss = mel_loss + gate_loss
    return mel_loss, gate_loss, total_loss


# --------------------------------------------------------------------------- #
# Pure-JAX reference                                                          #
# --------------------------------------------------------------------------- #
def _reference(model_output, targets, output_len):
    mel_out, mel_out_postnet, gate_out, _ = model_output
    mel_target, gate_target = targets
    mse = (jnp.mean((mel_out - mel_target) ** 2)
           + jnp.mean((mel_out_postnet - mel_target) ** 2))
    x = gate_out.reshape(-1).astype(jnp.float32)
    y = gate_target.reshape(-1).astype(jnp.float32)
    bce = jnp.mean(jnp.maximum(x, 0.0) - x * y + jnp.log1p(jnp.exp(-jnp.abs(x))))
    lens = output_len.astype(jnp.float32)
    coef = mel_target.shape[0] * jnp.max(lens) / jnp.sum(lens)
    mel_loss = coef * mse
    gate_loss = coef * bce
    return mel_loss, gate_loss, mel_loss + gate_loss


if __name__ == "__main__":
    key = jax.random.PRNGKey(0)
    # T = 2000 is deliberately not a multiple of 128 -> exercises the padding path.
    B, N_MEL, T = 2, 80, 2000

    k = jax.random.split(key, 5)
    mel_out = jax.random.normal(k[0], (B, N_MEL, T), jnp.float32)
    mel_out_postnet = jax.random.normal(k[1], (B, N_MEL, T), jnp.float32)
    mel_target = jax.random.normal(k[2], (B, N_MEL, T), jnp.float32)
    gate_out = jax.random.normal(k[3], (B, T), jnp.float32) * 4.0
    gate_target = (jax.random.uniform(k[4], (B, T)) > 0.5).astype(jnp.float32)
    output_len = jnp.array([1500, 2000], dtype=jnp.int32)

    model_output = (mel_out, mel_out_postnet, gate_out, None)
    targets = (mel_target, gate_target)

    ref = _reference(model_output, targets, output_len)

    # 1) Production tiling (auto per-generation VMEM budget).
    got = tacotron2_loss(model_output, targets, output_len)
    jax.block_until_ready(got)
    for a, b in zip(got, ref):
        np.testing.assert_allclose(np.asarray(a), np.asarray(b),
                                   rtol=1e-4, atol=1e-5)

    # 2) Tiny tile cap -> forces a multi-block (row, time) grid on these small
    #    shapes, exercising the streaming accumulation / finalize / gate paths.
    got_small = tacotron2_loss(model_output, targets, output_len,
                               tile_cap_bytes=32 * 1024)
    jax.block_until_ready(got_small)
    for a, b in zip(got_small, ref):
        np.testing.assert_allclose(np.asarray(a), np.asarray(b),
                                   rtol=1e-4, atol=1e-5)

    print("KERNEL_OK")
</pallas_src>

<mosaic_0001>
module attributes {stable_mosaic.version = 11 : i64} {
  func.func @kernel(%arg0: i32, %arg1: i32, %arg2: memref<160x2048xf32, #tpu.memory_space<vmem>>, %arg3: memref<160x2048xf32, #tpu.memory_space<vmem>>, %arg4: memref<160x2048xf32, #tpu.memory_space<vmem>>, %arg5: memref<1x4096xf32, #tpu.memory_space<vmem>>, %arg6: memref<1x4096xf32, #tpu.memory_space<vmem>>, %arg7: memref<1x8x128xf32, #tpu.memory_space<vmem>>, %arg8: memref<8x128xf32, #tpu.memory_space<vmem>>) attributes {dimension_semantics = [#tpu.dimension_semantics<parallel>, #tpu.dimension_semantics<arbitrary>], iteration_bounds = array<i64: 1, 1>, scalar_prefetch = 0 : i64, scratch_operands = 1 : i64, tpu.core_type = #tpu.core_type<tc>, window_params = [{transform_indices = @transform_0, window_bounds = array<i64: 160, 2048>}, {transform_indices = @transform_1, window_bounds = array<i64: 160, 2048>}, {transform_indices = @transform_2, window_bounds = array<i64: 160, 2048>}, {pipeline_mode = #tpu.pipeline_mode<synchronous>, transform_indices = @transform_3, window_bounds = array<i64: 1, 4096>}, {pipeline_mode = #tpu.pipeline_mode<synchronous>, transform_indices = @transform_4, window_bounds = array<i64: 1, 4096>}, {transform_indices = @transform_5, window_bounds = array<i64: 1, 8, 128>}]} {
    %0 = tpu.iota {dimensions = array<i32: 0>} : vector<8x128xi32>
    %1 = tpu.iota {dimensions = array<i32: 1>} : vector<8x128xi32>
    %c0_i32 = arith.constant 0 : i32
    %2 = arith.cmpi eq, %arg1, %c0_i32 : i32
    %3 = arith.extui %2 : i1 to i32
    %c0_i32_0 = arith.constant 0 : i32
    %4 = arith.cmpi ne, %3, %c0_i32_0 : i32
    scf.if %4 {
      %cst = arith.constant 0.000000e+00 : f32
      %226 = vector.broadcast %cst : f32 to vector<8x128xf32>
      %c0_110 = arith.constant 0 : index
      %c0_111 = arith.constant 0 : index
      %227 = vector.load %arg8[%c0_110, %c0_111] : memref<8x128xf32, #tpu.memory_space<vmem>>, vector<8x128xf32>
      tpu.vector_store %arg8[%c0_110, %c0_111], %226 {strides = array<i32>} : memref<8x128xf32, #tpu.memory_space<vmem>>, vector<8x128xf32>,
      %cst_112 = arith.constant 0.000000e+00 : f32
      %228 = vector.broadcast %cst_112 : f32 to vector<8x128xf32>
      %c0_113 = arith.constant 0 : index
      %c0_114 = arith.constant 0 : index
      %c0_115 = arith.constant 0 : index
      %229 = vector.load %arg7[%c0_113, %c0_114, %c0_115] : memref<1x8x128xf32, #tpu.memory_space<vmem>>, vector<1x8x128xf32>
      %230 = vector.shape_cast %229 : vector<1x8x128xf32> to vector<8x128xf32>
      %231 = vector.shape_cast %228 : vector<8x128xf32> to vector<1x8x128xf32>
      tpu.vector_store %arg7[%c0_113, %c0_114, %c0_115], %231 {strides = array<i32>} : memref<1x8x128xf32, #tpu.memory_space<vmem>>, vector<1x8x128xf32>,
    } else {
    }
    %c0_i32_1 = arith.constant 0 : i32
    %5 = arith.cmpi eq, %arg0, %c0_i32_1 : i32
    %c0_i32_2 = arith.constant 0 : i32
    %6 = arith.cmpi eq, %arg1, %c0_i32_2 : i32
    %7 = arith.andi %5, %6 : i1
    %8 = arith.extui %7 : i1 to i32
    %c0_i32_3 = arith.constant 0 : i32
    %9 = arith.cmpi ne, %8, %c0_i32_3 : i32
    scf.if %9 {
      %c0_110 = arith.constant 0 : index
      %c0_111 = arith.constant 0 : index
      %226 = vector.load %arg5[%c0_110, %c0_111] : memref<1x4096xf32, #tpu.memory_space<vmem>>, vector<1x4096xf32>
      %c0_112 = arith.constant 0 : index
      %c0_113 = arith.constant 0 : index
      %227 = vector.load %arg6[%c0_112, %c0_113] : memref<1x4096xf32, #tpu.memory_space<vmem>>, vector<1x4096xf32>
      %228 = math.absf %226 : vector<1x4096xf32>
      %cst = arith.constant 0.000000e+00 : f32
      %229 = vector.broadcast %cst : f32 to vector<1x4096xf32>
      %230 = arith.subf %229, %228 : vector<1x4096xf32>
      %231 = math.exp %230 : vector<1x4096xf32>
      %cst_114 = arith.constant 0.00999999977 : f32
      %232 = vector.broadcast %cst_114 : f32 to vector<1x4096xf32>
      %233 = arith.cmpf olt, %231, %232 : vector<1x4096xf32>
      %cst_115 = arith.constant 0.333333343 : f32
      %234 = vector.broadcast %cst_115 : f32 to vector<1x4096xf32>
      %235 = arith.mulf %231, %234 : vector<1x4096xf32>
      %cst_116 = arith.constant 5.000000e-01 : f32
      %236 = vector.broadcast %cst_116 : f32 to vector<1x4096xf32>
      %237 = arith.subf %236, %235 : vector<1x4096xf32>
      %238 = arith.mulf %231, %237 : vector<1x4096xf32>
      %cst_117 = arith.constant 1.000000e+00 : f32
      %239 = vector.broadcast %cst_117 : f32 to vector<1x4096xf32>
      %240 = arith.subf %239, %238 : vector<1x4096xf32>
      %241 = arith.mulf %231, %240 : vector<1x4096xf32>
      %cst_118 = arith.constant 1.000000e+00 : f32
      %242 = vector.broadcast %cst_118 : f32 to vector<1x4096xf32>
      %243 = arith.addf %242, %231 : vector<1x4096xf32>
      %244 = math.log %243 : vector<1x4096xf32>
      %245 = arith.select %233, %241, %244 : vector<1x4096xi1>, vector<1x4096xf32>
      %cst_119 = arith.constant 0.000000e+00 : f32
      %246 = vector.broadcast %cst_119 : f32 to vector<1x4096xf32>
      %247 = arith.maximumf %226, %246 : vector<1x4096xf32>
      %248 = arith.mulf %226, %227 : vector<1x4096xf32>
      %249 = arith.subf %247, %248 : vector<1x4096xf32>
      %250 = arith.addf %249, %245 : vector<1x4096xf32>
      %251 = vector.shape_cast %250 : vector<1x4096xf32> to vector<1x1x4096xf32>
      %cst_120 = arith.constant dense<0.000000e+00> : vector<1xf32>
      %252 = vector.multi_reduction <add>, %251, %cst_120 [1, 2] : vector<1x1x4096xf32> to vector<1xf32>
      %253 = vector.shape_cast %252 : vector<1xf32> to vector<1x1x1xf32>
      %254 = vector.extract %253[0, 0, 0] : f32 from vector<1x1x1xf32>
      %c1_i32 = arith.constant 1 : i32
      %255 = vector.broadcast %c1_i32 : i32 to vector<8x128xi32>
      %256 = arith.cmpi eq, %0, %255 : vector<8x128xi32>
      %c0_i32_121 = arith.constant 0 : i32
      %257 = vector.broadcast %c0_i32_121 : i32 to vector<8x128xi32>
      %258 = arith.cmpi eq, %1, %257 : vector<8x128xi32>
      %259 = arith.andi %256, %258 : vector<8x128xi1>
      %cst_122 = arith.constant 0.000000e+00 : f32
      %260 = vector.broadcast %254 : f32 to vector<8x128xf32>
      %261 = vector.broadcast %cst_122 : f32 to vector<8x128xf32>
      %262 = arith.select %259, %260, %261 : vector<8x128xi1>, vector<8x128xf32>
      %c0_123 = arith.constant 0 : index
      %c0_124 = arith.constant 0 : index
      %c0_125 = arith.constant 0 : index
      %263 = vector.load %arg7[%c0_123, %c0_124, %c0_125] : memref<1x8x128xf32, #tpu.memory_space<vmem>>, vector<1x8x128xf32>
      %264 = vector.shape_cast %263 : vector<1x8x128xf32> to vector<8x128xf32>
      %265 = vector.shape_cast %262 : vector<8x128xf32> to vector<1x8x128xf32>
      tpu.vector_store %arg7[%c0_123, %c0_124, %c0_125], %265 {strides = array<i32>} : memref<1x8x128xf32, #tpu.memory_space<vmem>>, vector<1x8x128xf32>,
    } else {
    }
    %c0 = arith.constant 0 : index
    %c0_4 = arith.constant 0 : index
    %10 = vector.load %arg4[%c0, %c0_4] : memref<160x2048xf32, #tpu.memory_space<vmem>>, vector<8x2048xf32>
    %c0_5 = arith.constant 0 : index
    %c0_6 = arith.constant 0 : index
    %11 = vector.load %arg2[%c0_5, %c0_6] : memref<160x2048xf32, #tpu.memory_space<vmem>>, vector<8x2048xf32>
    %12 = arith.subf %11, %10 : vector<8x2048xf32>
    %c0_7 = arith.constant 0 : index
    %c0_8 = arith.constant 0 : index
    %13 = vector.load %arg3[%c0_7, %c0_8] : memref<160x2048xf32, #tpu.memory_space<vmem>>, vector<8x2048xf32>
    %14 = arith.subf %13, %10 : vector<8x2048xf32>
    %15 = arith.mulf %12, %12 : vector<8x2048xf32>
    %16 = arith.mulf %14, %14 : vector<8x2048xf32>
    %17 = arith.addf %15, %16 : vector<8x2048xf32>
    %c8 = arith.constant 8 : index
    %c0_9 = arith.constant 0 : index
    %18 = vector.load %arg4[%c8, %c0_9] : memref<160x2048xf32, #tpu.memory_space<vmem>>, vector<8x2048xf32>
    %c8_10 = arith.constant 8 : index
    %c0_11 = arith.constant 0 : index
    %19 = vector.load %arg2[%c8_10, %c0_11] : memref<160x2048xf32, #tpu.memory_space<vmem>>, vector<8x2048xf32>
    %20 = arith.subf %19, %18 : vector<8x2048xf32>
    %c8_12 = arith.constant 8 : index
    %c0_13 = arith.constant 0 : index
    %21 = vector.load %arg3[%c8_12, %c0_13] : memref<160x2048xf32, #tpu.memory_space<vmem>>, vector<8x2048xf32>
    %22 = arith.subf %21, %18 : vector<8x2048xf32>
    %23 = arith.mulf %20, %20 : vector<8x2048xf32>
    %24 = arith.mulf %22, %22 : vector<8x2048xf32>
    %25 = arith.addf %23, %24 : vector<8x2048xf32>
    %26 = arith.addf %17, %25 : vector<8x2048xf32>
    %c16 = arith.constant 16 : index
    %c0_14 = arith.constant 0 : index
    %27 = vector.load %arg4[%c16, %c0_14] : memref<160x2048xf32, #tpu.memory_space<vmem>>, vector<8x2048xf32>
    %c16_15 = arith.constant 16 : index
    %c0_16 = arith.constant 0 : index
    %28 = vector.load %arg2[%c16_15, %c0_16] : memref<160x2048xf32, #tpu.memory_space<vmem>>, vector<8x2048xf32>
    %29 = arith.subf %28, %27 : vector<8x2048xf32>
    %c16_17 = arith.constant 16 : index
    %c0_18 = arith.constant 0 : index
    %30 = vector.load %arg3[%c16_17, %c0_18] : memref<160x2048xf32, #tpu.memory_space<vmem>>, vector<8x2048xf32>
    %31 = arith.subf %30, %27 : vector<8x2048xf32>
    %32 = arith.mulf %29, %29 : vector<8x2048xf32>
    %33 = arith.mulf %31, %31 : vector<8x2048xf32>
    %34 = arith.addf %32, %33 : vector<8x2048xf32>
    %35 = arith.addf %26, %34 : vector<8x2048xf32>
    %c24 = arith.constant 24 : index
    %c0_19 = arith.constant 0 : index
    %36 = vector.load %arg4[%c24, %c0_19] : memref<160x2048xf32, #tpu.memory_space<vmem>>, vector<8x2048xf32>
    %c24_20 = arith.constant 24 : index
    %c0_21 = arith.constant 0 : index
    %37 = vector.load %arg2[%c24_20, %c0_21] : memref<160x2048xf32, #tpu.memory_space<vmem>>, vector<8x2048xf32>
    %38 = arith.subf %37, %36 : vector<8x2048xf32>
    %c24_22 = arith.constant 24 : index
    %c0_23 = arith.constant 0 : index
    %39 = vector.load %arg3[%c24_22, %c0_23] : memref<160x2048xf32, #tpu.memory_space<vmem>>, vector<8x2048xf32>
    %40 = arith.subf %39, %36 : vector<8x2048xf32>
    %41 = arith.mulf %38, %38 : vector<8x2048xf32>
    %42 = arith.mulf %40, %40 : vector<8x2048xf32>
    %43 = arith.addf %41, %42 : vector<8x2048xf32>
    %44 = arith.addf %35, %43 : vector<8x2048xf32>
    %c32 = arith.constant 32 : index
    %c0_24 = arith.constant 0 : index
    %45 = vector.load %arg4[%c32, %c0_24] : memref<160x2048xf32, #tpu.memory_space<vmem>>, vector<8x2048xf32>
    %c32_25 = arith.constant 32 : index
    %c0_26 = arith.constant 0 : index
    %46 = vector.load %arg2[%c32_25, %c0_26] : memref<160x2048xf32, #tpu.memory_space<vmem>>, vector<8x2048xf32>
    %47 = arith.subf %46, %45 : vector<8x2048xf32>
    %c32_27 = arith.constant 32 : index
    %c0_28 = arith.constant 0 : index
    %48 = vector.load %arg3[%c32_27, %c0_28] : memref<160x2048xf32, #tpu.memory_space<vmem>>, vector<8x2048xf32>
    %49 = arith.subf %48, %45 : vector<8x2048xf32>
    %50 = arith.mulf %47, %47 : vector<8x2048xf32>
    %51 = arith.mulf %49, %49 : vector<8x2048xf32>
    %52 = arith.addf %50, %51 : vector<8x2048xf32>
    %53 = arith.addf %44, %52 : vector<8x2048xf32>
    %c40 = arith.constant 40 : index
    %c0_29 = arith.constant 0 : index
    %54 = vector.load %arg4[%c40, %c0_29] : memref<160x2048xf32, #tpu.memory_space<vmem>>, vector<8x2048xf32>
    %c40_30 = arith.constant 40 : index
    %c0_31 = arith.constant 0 : index
    %55 = vector.load %arg2[%c40_30, %c0_31] : memref<160x2048xf32, #tpu.memory_space<vmem>>, vector<8x2048xf32>
    %56 = arith.subf %55, %54 : vector<8x2048xf32>
    %c40_32 = arith.constant 40 : index
    %c0_33 = arith.constant 0 : index
    %57 = vector.load %arg3[%c40_32, %c0_33] : memref<160x2048xf32, #tpu.memory_space<vmem>>, vector<8x2048xf32>
    %58 = arith.subf %57, %54 : vector<8x2048xf32>
    %59 = arith.mulf %56, %56 : vector<8x2048xf32>
    %60 = arith.mulf %58, %58 : vector<8x2048xf32>
    %61 = arith.addf %59, %60 : vector<8x2048xf32>
    %62 = arith.addf %53, %61 : vector<8x2048xf32>
    %c48 = arith.constant 48 : index
    %c0_34 = arith.constant 0 : index
    %63 = vector.load %arg4[%c48, %c0_34] : memref<160x2048xf32, #tpu.memory_space<vmem>>, vector<8x2048xf32>
    %c48_35 = arith.constant 48 : index
    %c0_36 = arith.constant 0 : index
    %64 = vector.load %arg2[%c48_35, %c0_36] : memref<160x2048xf32, #tpu.memory_space<vmem>>, vector<8x2048xf32>
    %65 = arith.subf %64, %63 : vector<8x2048xf32>
    %c48_37 = arith.constant 48 : index
    %c0_38 = arith.constant 0 : index
    %66 = vector.load %arg3[%c48_37, %c0_38] : memref<160x2048xf32, #tpu.memory_space<vmem>>, vector<8x2048xf32>
    %67 = arith.subf %66, %63 : vector<8x2048xf32>
    %68 = arith.mulf %65, %65 : vector<8x2048xf32>
    %69 = arith.mulf %67, %67 : vector<8x2048xf32>
    %70 = arith.addf %68, %69 : vector<8x2048xf32>
    %71 = arith.addf %62, %70 : vector<8x2048xf32>
    %c56 = arith.constant 56 : index
    %c0_39 = arith.constant 0 : index
    %72 = vector.load %arg4[%c56, %c0_39] : memref<160x2048xf32, #tpu.memory_space<vmem>>, vector<8x2048xf32>
    %c56_40 = arith.constant 56 : index
    %c0_41 = arith.constant 0 : index
    %73 = vector.load %arg2[%c56_40, %c0_41] : memref<160x2048xf32, #tpu.memory_space<vmem>>, vector<8x2048xf32>
    %74 = arith.subf %73, %72 : vector<8x2048xf32>
    %c56_42 = arith.constant 56 : index
    %c0_43 = arith.constant 0 : index
    %75 = vector.load %arg3[%c56_42, %c0_43] : memref<160x2048xf32, #tpu.memory_space<vmem>>, vector<8x2048xf32>
    %76 = arith.subf %75, %72 : vector<8x2048xf32>
    %77 = arith.mulf %74, %74 : vector<8x2048xf32>
    %78 = arith.mulf %76, %76 : vector<8x2048xf32>
    %79 = arith.addf %77, %78 : vector<8x2048xf32>
    %80 = arith.addf %71, %79 : vector<8x2048xf32>
    %c64 = arith.constant 64 : index
    %c0_44 = arith.constant 0 : index
    %81 = vector.load %arg4[%c64, %c0_44] : memref<160x2048xf32, #tpu.memory_space<vmem>>, vector<8x2048xf32>
    %c64_45 = arith.constant 64 : index
    %c0_46 = arith.constant 0 : index
    %82 = vector.load %arg2[%c64_45, %c0_46] : memref<160x2048xf32, #tpu.memory_space<vmem>>, vector<8x2048xf32>
    %83 = arith.subf %82, %81 : vector<8x2048xf32>
    %c64_47 = arith.constant 64 : index
    %c0_48 = arith.constant 0 : index
    %84 = vector.load %arg3[%c64_47, %c0_48] : memref<160x2048xf32, #tpu.memory_space<vmem>>, vector<8x2048xf32>
    %85 = arith.subf %84, %81 : vector<8x2048xf32>
    %86 = arith.mulf %83, %83 : vector<8x2048xf32>
    %87 = arith.mulf %85, %85 : vector<8x2048xf32>
    %88 = arith.addf %86, %87 : vector<8x2048xf32>
    %89 = arith.addf %80, %88 : vector<8x2048xf32>
    %c72 = arith.constant 72 : index
    %c0_49 = arith.constant 0 : index
    %90 = vector.load %arg4[%c72, %c0_49] : memref<160x2048xf32, #tpu.memory_space<vmem>>, vector<8x2048xf32>
    %c72_50 = arith.constant 72 : index
    %c0_51 = arith.constant 0 : index
    %91 = vector.load %arg2[%c72_50, %c0_51] : memref<160x2048xf32, #tpu.memory_space<vmem>>, vector<8x2048xf32>
    %92 = arith.subf %91, %90 : vector<8x2048xf32>
    %c72_52 = arith.constant 72 : index
    %c0_53 = arith.constant 0 : index
    %93 = vector.load %arg3[%c72_52, %c0_53] : memref<160x2048xf32, #tpu.memory_space<vmem>>, vector<8x2048xf32>
    %94 = arith.subf %93, %90 : vector<8x2048xf32>
    %95 = arith.mulf %92, %92 : vector<8x2048xf32>
    %96 = arith.mulf %94, %94 : vector<8x2048xf32>
    %97 = arith.addf %95, %96 : vector<8x2048xf32>
    %98 = arith.addf %89, %97 : vector<8x2048xf32>
    %c80 = arith.constant 80 : index
    %c0_54 = arith.constant 0 : index
    %99 = vector.load %arg4[%c80, %c0_54] : memref<160x2048xf32, #tpu.memory_space<vmem>>, vector<8x2048xf32>
    %c80_55 = arith.constant 80 : index
    %c0_56 = arith.constant 0 : index
    %100 = vector.load %arg2[%c80_55, %c0_56] : memref<160x2048xf32, #tpu.memory_space<vmem>>, vector<8x2048xf32>
    %101 = arith.subf %100, %99 : vector<8x2048xf32>
    %c80_57 = arith.constant 80 : index
    %c0_58 = arith.constant 0 : index
    %102 = vector.load %arg3[%c80_57, %c0_58] : memref<160x2048xf32, #tpu.memory_space<vmem>>, vector<8x2048xf32>
    %103 = arith.subf %102, %99 : vector<8x2048xf32>
    %104 = arith.mulf %101, %101 : vector<8x2048xf32>
    %105 = arith.mulf %103, %103 : vector<8x2048xf32>
    %106 = arith.addf %104, %105 : vector<8x2048xf32>
    %107 = arith.addf %98, %106 : vector<8x2048xf32>
    %c88 = arith.constant 88 : index
    %c0_59 = arith.constant 0 : index
    %108 = vector.load %arg4[%c88, %c0_59] : memref<160x2048xf32, #tpu.memory_space<vmem>>, vector<8x2048xf32>
    %c88_60 = arith.constant 88 : index
    %c0_61 = arith.constant 0 : index
    %109 = vector.load %arg2[%c88_60, %c0_61] : memref<160x2048xf32, #tpu.memory_space<vmem>>, vector<8x2048xf32>
    %110 = arith.subf %109, %108 : vector<8x2048xf32>
    %c88_62 = arith.constant 88 : index
    %c0_63 = arith.constant 0 : index
    %111 = vector.load %arg3[%c88_62, %c0_63] : memref<160x2048xf32, #tpu.memory_space<vmem>>, vector<8x2048xf32>
    %112 = arith.subf %111, %108 : vector<8x2048xf32>
    %113 = arith.mulf %110, %110 : vector<8x2048xf32>
    %114 = arith.mulf %112, %112 : vector<8x2048xf32>
    %115 = arith.addf %113, %114 : vector<8x2048xf32>
    %116 = arith.addf %107, %115 : vector<8x2048xf32>
    %c96 = arith.constant 96 : index
    %c0_64 = arith.constant 0 : index
    %117 = vector.load %arg4[%c96, %c0_64] : memref<160x2048xf32, #tpu.memory_space<vmem>>, vector<8x2048xf32>
    %c96_65 = arith.constant 96 : index
    %c0_66 = arith.constant 0 : index
    %118 = vector.load %arg2[%c96_65, %c0_66] : memref<160x2048xf32, #tpu.memory_space<vmem>>, vector<8x2048xf32>
    %119 = arith.subf %118, %117 : vector<8x2048xf32>
    %c96_67 = arith.constant 96 : index
    %c0_68 = arith.constant 0 : index
    %120 = vector.load %arg3[%c96_67, %c0_68] : memref<160x2048xf32, #tpu.memory_space<vmem>>, vector<8x2048xf32>
    %121 = arith.subf %120, %117 : vector<8x2048xf32>
    %122 = arith.mulf %119, %119 : vector<8x2048xf32>
    %123 = arith.mulf %121, %121 : vector<8x2048xf32>
    %124 = arith.addf %122, %123 : vector<8x2048xf32>
    %125 = arith.addf %116, %124 : vector<8x2048xf32>
    %c104 = arith.constant 104 : index
    %c0_69 = arith.constant 0 : index
    %126 = vector.load %arg4[%c104, %c0_69] : memref<160x2048xf32, #tpu.memory_space<vmem>>, vector<8x2048xf32>
    %c104_70 = arith.constant 104 : index
    %c0_71 = arith.constant 0 : index
    %127 = vector.load %arg2[%c104_70, %c0_71] : memref<160x2048xf32, #tpu.memory_space<vmem>>, vector<8x2048xf32>
    %128 = arith.subf %127, %126 : vector<8x2048xf32>
    %c104_72 = arith.constant 104 : index
    %c0_73 = arith.constant 0 : index
    %129 = vector.load %arg3[%c104_72, %c0_73] : memref<160x2048xf32, #tpu.memory_space<vmem>>, vector<8x2048xf32>
    %130 = arith.subf %129, %126 : vector<8x2048xf32>
    %131 = arith.mulf %128, %128 : vector<8x2048xf32>
    %132 = arith.mulf %130, %130 : vector<8x2048xf32>
    %133 = arith.addf %131, %132 : vector<8x2048xf32>
    %134 = arith.addf %125, %133 : vector<8x2048xf32>
    %c112 = arith.constant 112 : index
    %c0_74 = arith.constant 0 : index
    %135 = vector.load %arg4[%c112, %c0_74] : memref<160x2048xf32, #tpu.memory_space<vmem>>, vector<8x2048xf32>
    %c112_75 = arith.constant 112 : index
    %c0_76 = arith.constant 0 : index
    %136 = vector.load %arg2[%c112_75, %c0_76] : memref<160x2048xf32, #tpu.memory_space<vmem>>, vector<8x2048xf32>
    %137 = arith.subf %136, %135 : vector<8x2048xf32>
    %c112_77 = arith.constant 112 : index
    %c0_78 = arith.constant 0 : index
    %138 = vector.load %arg3[%c112_77, %c0_78] : memref<160x2048xf32, #tpu.memory_space<vmem>>, vector<8x2048xf32>
    %139 = arith.subf %138, %135 : vector<8x2048xf32>
    %140 = arith.mulf %137, %137 : vector<8x2048xf32>
    %141 = arith.mulf %139, %139 : vector<8x2048xf32>
    %142 = arith.addf %140, %141 : vector<8x2048xf32>
    %143 = arith.addf %134, %142 : vector<8x2048xf32>
    %c120 = arith.constant 120 : index
    %c0_79 = arith.constant 0 : index
    %144 = vector.load %arg4[%c120, %c0_79] : memref<160x2048xf32, #tpu.memory_space<vmem>>, vector<8x2048xf32>
    %c120_80 = arith.constant 120 : index
    %c0_81 = arith.constant 0 : index
    %145 = vector.load %arg2[%c120_80, %c0_81] : memref<160x2048xf32, #tpu.memory_space<vmem>>, vector<8x2048xf32>
    %146 = arith.subf %145, %144 : vector<8x2048xf32>
    %c120_82 = arith.constant 120 : index
    %c0_83 = arith.constant 0 : index
    %147 = vector.load %arg3[%c120_82, %c0_83] : memref<160x2048xf32, #tpu.memory_space<vmem>>, vector<8x2048xf32>
    %148 = arith.subf %147, %144 : vector<8x2048xf32>
    %149 = arith.mulf %146, %146 : vector<8x2048xf32>
    %150 = arith.mulf %148, %148 : vector<8x2048xf32>
    %151 = arith.addf %149, %150 : vector<8x2048xf32>
    %152 = arith.addf %143, %151 : vector<8x2048xf32>
    %c128 = arith.constant 128 : index
    %c0_84 = arith.constant 0 : index
    %153 = vector.load %arg4[%c128, %c0_84] : memref<160x2048xf32, #tpu.memory_space<vmem>>, vector<8x2048xf32>
    %c128_85 = arith.constant 128 : index
    %c0_86 = arith.constant 0 : index
    %154 = vector.load %arg2[%c128_85, %c0_86] : memref<160x2048xf32, #tpu.memory_space<vmem>>, vector<8x2048xf32>
    %155 = arith.subf %154, %153 : vector<8x2048xf32>
    %c128_87 = arith.constant 128 : index
    %c0_88 = arith.constant 0 : index
    %156 = vector.load %arg3[%c128_87, %c0_88] : memref<160x2048xf32, #tpu.memory_space<vmem>>, vector<8x2048xf32>
    %157 = arith.subf %156, %153 : vector<8x2048xf32>
    %158 = arith.mulf %155, %155 : vector<8x2048xf32>
    %159 = arith.mulf %157, %157 : vector<8x2048xf32>
    %160 = arith.addf %158, %159 : vector<8x2048xf32>
    %161 = arith.addf %152, %160 : vector<8x2048xf32>
    %c136 = arith.constant 136 : index
    %c0_89 = arith.constant 0 : index
    %162 = vector.load %arg4[%c136, %c0_89] : memref<160x2048xf32, #tpu.memory_space<vmem>>, vector<8x2048xf32>
    %c136_90 = arith.constant 136 : index
    %c0_91 = arith.constant 0 : index
    %163 = vector.load %arg2[%c136_90, %c0_91] : memref<160x2048xf32, #tpu.memory_space<vmem>>, vector<8x2048xf32>
    %164 = arith.subf %163, %162 : vector<8x2048xf32>
    %c136_92 = arith.constant 136 : index
    %c0_93 = arith.constant 0 : index
    %165 = vector.load %arg3[%c136_92, %c0_93] : memref<160x2048xf32, #tpu.memory_space<vmem>>, vector<8x2048xf32>
    %166 = arith.subf %165, %162 : vector<8x2048xf32>
    %167 = arith.mulf %164, %164 : vector<8x2048xf32>
    %168 = arith.mulf %166, %166 : vector<8x2048xf32>
    %169 = arith.addf %167, %168 : vector<8x2048xf32>
    %170 = arith.addf %161, %169 : vector<8x2048xf32>
    %c144 = arith.constant 144 : index
    %c0_94 = arith.constant 0 : index
    %171 = vector.load %arg4[%c144, %c0_94] : memref<160x2048xf32, #tpu.memory_space<vmem>>, vector<8x2048xf32>
    %c144_95 = arith.constant 144 : index
    %c0_96 = arith.constant 0 : index
    %172 = vector.load %arg2[%c144_95, %c0_96] : memref<160x2048xf32, #tpu.memory_space<vmem>>, vector<8x2048xf32>
    %173 = arith.subf %172, %171 : vector<8x2048xf32>
    %c144_97 = arith.constant 144 : index
    %c0_98 = arith.constant 0 : index
    %174 = vector.load %arg3[%c144_97, %c0_98] : memref<160x2048xf32, #tpu.memory_space<vmem>>, vector<8x2048xf32>
    %175 = arith.subf %174, %171 : vector<8x2048xf32>
    %176 = arith.mulf %173, %173 : vector<8x2048xf32>
    %177 = arith.mulf %175, %175 : vector<8x2048xf32>
    %178 = arith.addf %176, %177 : vector<8x2048xf32>
    %179 = arith.addf %170, %178 : vector<8x2048xf32>
    %c152 = arith.constant 152 : index
    %c0_99 = arith.constant 0 : index
    %180 = vector.load %arg4[%c152, %c0_99] : memref<160x2048xf32, #tpu.memory_space<vmem>>, vector<8x2048xf32>
    %c152_100 = arith.constant 152 : index
    %c0_101 = arith.constant 0 : index
    %181 = vector.load %arg2[%c152_100, %c0_101] : memref<160x2048xf32, #tpu.memory_space<vmem>>, vector<8x2048xf32>
    %182 = arith.subf %181, %180 : vector<8x2048xf32>
    %c152_102 = arith.constant 152 : index
    %c0_103 = arith.constant 0 : index
    %183 = vector.load %arg3[%c152_102, %c0_103] : memref<160x2048xf32, #tpu.memory_space<vmem>>, vector<8x2048xf32>
    %184 = arith.subf %183, %180 : vector<8x2048xf32>
    %185 = arith.mulf %182, %182 : vector<8x2048xf32>
    %186 = arith.mulf %184, %184 : vector<8x2048xf32>
    %187 = arith.addf %185, %186 : vector<8x2048xf32>
    %188 = arith.addf %179, %187 : vector<8x2048xf32>
    %189 = vector.extract_strided_slice %188 {offsets = [0, 0], sizes = [8, 128], strides = [1, 1]} : vector<8x2048xf32> to vector<8x128xf32>
    %190 = vector.extract_strided_slice %188 {offsets = [0, 128], sizes = [8, 128], strides = [1, 1]} : vector<8x2048xf32> to vector<8x128xf32>
    %191 = arith.addf %189, %190 : vector<8x128xf32>
    %192 = vector.extract_strided_slice %188 {offsets = [0, 256], sizes = [8, 128], strides = [1, 1]} : vector<8x2048xf32> to vector<8x128xf32>
    %193 = arith.addf %191, %192 : vector<8x128xf32>
    %194 = vector.extract_strided_slice %188 {offsets = [0, 384], sizes = [8, 128], strides = [1, 1]} : vector<8x2048xf32> to vector<8x128xf32>
    %195 = arith.addf %193, %194 : vector<8x128xf32>
    %196 = vector.extract_strided_slice %188 {offsets = [0, 512], sizes = [8, 128], strides = [1, 1]} : vector<8x2048xf32> to vector<8x128xf32>
    %197 = arith.addf %195, %196 : vector<8x128xf32>
    %198 = vector.extract_strided_slice %188 {offsets = [0, 640], sizes = [8, 128], strides = [1, 1]} : vector<8x2048xf32> to vector<8x128xf32>
    %199 = arith.addf %197, %198 : vector<8x128xf32>
    %200 = vector.extract_strided_slice %188 {offsets = [0, 768], sizes = [8, 128], strides = [1, 1]} : vector<8x2048xf32> to vector<8x128xf32>
    %201 = arith.addf %199, %200 : vector<8x128xf32>
    %202 = vector.extract_strided_slice %188 {offsets = [0, 896], sizes = [8, 128], strides = [1, 1]} : vector<8x2048xf32> to vector<8x128xf32>
    %203 = arith.addf %201, %202 : vector<8x128xf32>
    %204 = vector.extract_strided_slice %188 {offsets = [0, 1024], sizes = [8, 128], strides = [1, 1]} : vector<8x2048xf32> to vector<8x128xf32>
    %205 = arith.addf %203, %204 : vector<8x128xf32>
    %206 = vector.extract_strided_slice %188 {offsets = [0, 1152], sizes = [8, 128], strides = [1, 1]} : vector<8x2048xf32> to vector<8x128xf32>
    %207 = arith.addf %205, %206 : vector<8x128xf32>
    %208 = vector.extract_strided_slice %188 {offsets = [0, 1280], sizes = [8, 128], strides = [1, 1]} : vector<8x2048xf32> to vector<8x128xf32>
    %209 = arith.addf %207, %208 : vector<8x128xf32>
    %210 = vector.extract_strided_slice %188 {offsets = [0, 1408], sizes = [8, 128], strides = [1, 1]} : vector<8x2048xf32> to vector<8x128xf32>
    %211 = arith.addf %209, %210 : vector<8x128xf32>
    %212 = vector.extract_strided_slice %188 {offsets = [0, 1536], sizes = [8, 128], strides = [1, 1]} : vector<8x2048xf32> to vector<8x128xf32>
    %213 = arith.addf %211, %212 : vector<8x128xf32>
    %214 = vector.extract_strided_slice %188 {offsets = [0, 1664], sizes = [8, 128], strides = [1, 1]} : vector<8x2048xf32> to vector<8x128xf32>
    %215 = arith.addf %213, %214 : vector<8x128xf32>
    %216 = vector.extract_strided_slice %188 {offsets = [0, 1792], sizes = [8, 128], strides = [1, 1]} : vector<8x2048xf32> to vector<8x128xf32>
    %217 = arith.addf %215, %216 : vector<8x128xf32>
    %218 = vector.extract_strided_slice %188 {offsets = [0, 1920], sizes = [8, 128], strides = [1, 1]} : vector<8x2048xf32> to vector<8x128xf32>
    %219 = arith.addf %217, %218 : vector<8x128xf32>
    %c0_104 = arith.constant 0 : index
    %c0_105 = arith.constant 0 : index
    %220 = vector.load %arg8[%c0_104, %c0_105] : memref<8x128xf32, #tpu.memory_space<vmem>>, vector<8x128xf32>
    %221 = arith.addf %220, %219 : vector<8x128xf32>
    %c0_106 = arith.constant 0 : index
    %c0_107 = arith.constant 0 : index
    %222 = vector.load %arg8[%c0_106, %c0_107] : memref<8x128xf32, #tpu.memory_space<vmem>>, vector<8x128xf32>
    tpu.vector_store %arg8[%c0_106, %c0_107], %221 {strides = array<i32>} : memref<8x128xf32, #tpu.memory_space<vmem>>, vector<8x128xf32>,
    %c0_i32_108 = arith.constant 0 : i32
    %223 = arith.cmpi eq, %arg1, %c0_i32_108 : i32
    %224 = arith.extui %223 : i1 to i32
    %c0_i32_109 = arith.constant 0 : i32
    %225 = arith.cmpi ne, %224, %c0_i32_109 : i32
    scf.if %225 {
      %c0_110 = arith.constant 0 : index
      %c0_111 = arith.constant 0 : index
      %226 = vector.load %arg8[%c0_110, %c0_111] : memref<8x128xf32, #tpu.memory_space<vmem>>, vector<8x128xf32>
      %227 = vector.shape_cast %226 : vector<8x128xf32> to vector<1x8x128xf32>
      %cst = arith.constant dense<0.000000e+00> : vector<1xf32>
      %228 = vector.multi_reduction <add>, %227, %cst [1, 2] : vector<1x8x128xf32> to vector<1xf32>
      %229 = vector.shape_cast %228 : vector<1xf32> to vector<1x1x1xf32>
      %230 = vector.extract %229[0, 0, 0] : f32 from vector<1x1x1xf32>
      %c0_112 = arith.constant 0 : index
      %c0_113 = arith.constant 0 : index
      %c0_114 = arith.constant 0 : index
      %231 = vector.load %arg7[%c0_112, %c0_113, %c0_114] : memref<1x8x128xf32, #tpu.memory_space<vmem>>, vector<1x8x128xf32>
      %232 = vector.shape_cast %231 : vector<1x8x128xf32> to vector<8x128xf32>
      %c0_i32_115 = arith.constant 0 : i32
      %233 = vector.broadcast %c0_i32_115 : i32 to vector<8x128xi32>
      %234 = arith.cmpi eq, %0, %233 : vector<8x128xi32>
      %c0_i32_116 = arith.constant 0 : i32
      %235 = vector.broadcast %c0_i32_116 : i32 to vector<8x128xi32>
      %236 = arith.cmpi eq, %1, %235 : vector<8x128xi32>
      %237 = arith.andi %234, %236 : vector<8x128xi1>
      %cst_117 = arith.constant 0.000000e+00 : f32
      %238 = vector.broadcast %230 : f32 to vector<8x128xf32>
      %239 = vector.broadcast %cst_117 : f32 to vector<8x128xf32>
      %240 = arith.select %237, %238, %239 : vector<8x128xi1>, vector<8x128xf32>
      %241 = arith.addf %232, %240 : vector<8x128xf32>
      %c0_118 = arith.constant 0 : index
      %c0_119 = arith.constant 0 : index
      %c0_120 = arith.constant 0 : index
      %242 = vector.load %arg7[%c0_118, %c0_119, %c0_120] : memref<1x8x128xf32, #tpu.memory_space<vmem>>, vector<1x8x128xf32>
      %243 = vector.shape_cast %242 : vector<1x8x128xf32> to vector<8x128xf32>
      %244 = vector.shape_cast %241 : vector<8x128xf32> to vector<1x8x128xf32>
      tpu.vector_store %arg7[%c0_118, %c0_119, %c0_120], %244 {strides = array<i32>} : memref<1x8x128xf32, #tpu.memory_space<vmem>>, vector<1x8x128xf32>,
    } else {
    }
    return
  }
  func.func @transform_0(%arg0: i32, %arg1: i32) -> (i32, i32) {
    %c0_i32 = arith.constant 0 : i32
    return %arg0, %arg1 : i32, i32
  }
  func.func @transform_1(%arg0: i32, %arg1: i32) -> (i32, i32) {
    %c0_i32 = arith.constant 0 : i32
    return %arg0, %arg1 : i32, i32
  }
  func.func @transform_2(%arg0: i32, %arg1: i32) -> (i32, i32) {
    %c0_i32 = arith.constant 0 : i32
    return %arg0, %arg1 : i32, i32
  }
  func.func @transform_3(%arg0: i32, %arg1: i32) -> (i32, i32) {
    %c0_i32 = arith.constant 0 : i32
    %c0_i32_0 = arith.constant 0 : i32
    %c0_i32_1 = arith.constant 0 : i32
    return %c0_i32, %c0_i32_0 : i32, i32
  }
  func.func @transform_4(%arg0: i32, %arg1: i32) -> (i32, i32) {
    %c0_i32 = arith.constant 0 : i32
    %c0_i32_0 = arith.constant 0 : i32
    %c0_i32_1 = arith.constant 0 : i32
    return %c0_i32, %c0_i32_0 : i32, i32
  }
  func.func @transform_5(%arg0: i32, %arg1: i32) -> (i32, i32, i32) {
    %c0_i32 = arith.constant 0 : i32
    %c0_i32_0 = arith.constant 0 : i32
    %c0_i32_1 = arith.constant 0 : i32
    return %arg0, %c0_i32, %c0_i32_0 : i32, i32, i32
  }
}

</mosaic_0001>

<bundles_post_ra>
// kernel: tpu_custom_call.1
= control target key start
LH: loop header
LB: loop body
LE: loop exit
PB: predicated region body
PF: predicated region fallthrough
CT: control target
= control target key end

     0   :  { %10 = vsyncpa [#allocation4], 0  ;;  %s5943_s0 = inlined_call_operand.hbm [shape: f32[160,2048], index: 0, kind: input, shape index: {}]   ;;  %s5944_s1 = inlined_call_operand.hbm [shape: f32[160,2048], index: 1, kind: input, shape index: {}]   ;;  %s5945_s2 = inlined_call_operand.hbm [shape: f32[160,2048], index: 2, kind: input, shape index: {}]   ;;  %s5946_s3 = inlined_call_operand.hbm [shape: f32[1,4096], index: 3, kind: input, shape index: {}]   ;;  %s5947_s4 = inlined_call_operand.hbm [shape: f32[1,4096], index: 4, kind: input, shape index: {}]   ;;  %s5948_s5 = inlined_call_operand.hbm [shape: f32[1,8,128], index: 5, kind: output, shape index: {}]  }
   0x1   :  { %11 = vsyncpa [#allocation7], 0 }
   0x2   :  { %12 = vsyncpa [#allocation10], 0 }
   0x3   :  { %13 = vsyncpa [#allocation5], 0  ;;  %s3512_s18 = smov [#allocation6]   ;;  %s3513_s20 = smov [#allocation9]  }
   0x4   :  { %s31_s19 = sshll.u32 %s3512_s18, 4  ;;  %s56_s21 = sshll.u32 %s3513_s20, 4  ;;  %s32_s19 = int_to_ptr.vmem [resolvable:$true] %s31_s19  ;;  %s57_s21 = int_to_ptr.vmem [resolvable:$true] %s56_s21 }
   0x5   :  { %s3372_s24 = scalar_lea.hbm %s5944_s1, 40960 }
   0x6   :  { %p3373_p0 = scmp.ne.s32.totalorder %s5944_s1, %s3372_s24  ;;  %p3376_p1 = scmp.lt.u32.totalorder %s3372_s24, %s5944_s1 }
   0x8   :  { %p3378_p2 = pnand %p3376_p1, %p3373_p0 }
   0xa   :  { %3381 = shalt.err (!%p3378_p2)
}
   0xb   :  { %s3382_s29 = scalar_lea.vmem %s32_s19, 40960  ;;  %p3387_p4 = scmp.lt.s32.totalorder %s32_s19, %s32_s19 }
   0xc   :  { %p3383_p3 = scmp.ne.s32.totalorder %s32_s19, %s3382_s29  ;;  %p3388_p5 = scmp.lt.s32.totalorder %s3382_s29, %s3382_s29 }
   0xe   :  { %p3389_p6 = por %p3388_p5, %p3387_p4 }
  0x10   :  { %p3390_p7 = pnand %p3389_p6, %p3383_p3 }
  0x12   :  { %3393 = shalt.err (!%p3390_p7)
}
  0x13   :  { %s3514_s30 = smov 2048   ;;  %s3515_s6 = smov 128  }
  0x14   :  { %37 = dma.hbm_to_vmem [thread:$0]  %s5944_s1, 40960, %s32_s19, [#allocation7], %s3514_s30, %s3514_s30, %s3515_s6  }
  0x15   :  { %s3394_s11 = scalar_lea.hbm %s5946_s3, 512 }
  0x16   :  { %p3395_p8 = scmp.ne.s32.totalorder %s5946_s3, %s3394_s11  ;;  %p3398_p9 = scmp.lt.u32.totalorder %s3394_s11, %s5946_s3 }
  0x18   :  { %p3400_p10 = pnand %p3398_p9, %p3395_p8 }
  0x1a   :  { %3403 = shalt.err (!%p3400_p10)
}
  0x1b   :  { %s3404_s16 = scalar_lea.vmem %s57_s21, 512  ;;  %p3409_p12 = scmp.lt.s32.totalorder %s57_s21, %s57_s21 }
  0x1c   :  { %p3405_p11 = scmp.ne.s32.totalorder %s57_s21, %s3404_s16  ;;  %p3410_p13 = scmp.lt.s32.totalorder %s3404_s16, %s3404_s16 }
  0x1e   :  { %p3411_p0 = por %p3410_p13, %p3409_p12 }
  0x20   :  { %p3412_p1 = pnand %p3411_p0, %p3405_p11 }
  0x22   :  { %3415 = shalt.err (!%p3412_p1)
}
  0x23   :  { %59 = dma.hbm_to_vmem [thread:$0]  %s5946_s3, 512, %s57_s21, [#allocation10]  }
  0x24   :  { %s3516_s18 = smov [#allocation3]   ;;  %s3517_s20 = smov [#allocation8]  }
  0x25   :  { %s19_s19 = sshll.u32 %s3516_s18, 4  ;;  %s43_s22 = sshll.u32 %s3517_s20, 4  ;;  %s20_s19 = int_to_ptr.vmem [resolvable:$true] %s19_s19  ;;  %s3577_s22 = int_to_ptr.vmem [resolvable:$true] %s43_s22 }
  0x26   :  { %s3416_s25 = scalar_lea.hbm %s5943_s0, 40960 }
  0x27   :  { %p3417_p2 = scmp.ne.s32.totalorder %s5943_s0, %s3416_s25  ;;  %p3420_p3 = scmp.lt.u32.totalorder %s3416_s25, %s5943_s0 }
  0x29   :  { %p3422_p4 = pnand %p3420_p3, %p3417_p2 }
  0x2b   :  { %3425 = shalt.err (!%p3422_p4)
}
  0x2c   :  { %s3426_s3 = scalar_lea.vmem %s20_s19, 40960  ;;  %p3431_p6 = scmp.lt.s32.totalorder %s20_s19, %s20_s19 }
  0x2d   :  { %p3427_p5 = scmp.ne.s32.totalorder %s20_s19, %s3426_s3  ;;  %p3432_p7 = scmp.lt.s32.totalorder %s3426_s3, %s3426_s3 }
  0x2f   :  { %p3433_p8 = por %p3432_p7, %p3431_p6 }
  0x31   :  { %p3434_p9 = pnand %p3433_p8, %p3427_p5 }
  0x33   :  { %3437 = shalt.err (!%p3434_p9)
}
  0x34   :  { %25 = dma.hbm_to_vmem [thread:$0]  %s5943_s0, 40960, %s20_s19, [#allocation4], %s3514_s30, %s3514_s30, %s3515_s6  }
  0x35   :  { %s3438_s10 = scalar_lea.hbm %s5945_s2, 40960 }
  0x36   :  { %p3439_p10 = scmp.ne.s32.totalorder %s5945_s2, %s3438_s10  ;;  %p3442_p11 = scmp.lt.u32.totalorder %s3438_s10, %s5945_s2 }
  0x38   :  { %p3444_p12 = pnand %p3442_p11, %p3439_p10 }
  0x3a   :  { %3447 = shalt.err (!%p3444_p12)
}
  0x3b   :  { %s3448_s15 = scalar_lea.vmem %s3577_s22, 40960  ;;  %p3453_p0 = scmp.lt.s32.totalorder %s3577_s22, %s3577_s22 }
  0x3c   :  { %p3449_p13 = scmp.ne.s32.totalorder %s3577_s22, %s3448_s15  ;;  %p3454_p1 = scmp.lt.s32.totalorder %s3448_s15, %s3448_s15 }
  0x3e   :  { %p3455_p2 = por %p3454_p1, %p3453_p0 }
  0x40   :  { %p3456_p3 = pnand %p3455_p2, %p3449_p13 }
  0x42   :  { %3459 = shalt.err (!%p3456_p3)
}
  0x43   :  { %49 = dma.hbm_to_vmem [thread:$0]  %s5945_s2, 40960, %s3577_s22, [#allocation7], %s3514_s30, %s3514_s30, %s3515_s6  }
  0x44   :  { %s3518_s1 = smov [#allocation11]   ;;  %s3460_s20 = scalar_lea.hbm %s5947_s4, 512 }
  0x45   :  { %s66_s17 = sshll.u32 %s3518_s1, 4  ;;  %p3461_p4 = scmp.ne.s32.totalorder %s5947_s4, %s3460_s20  ;;  %s67_s17 = int_to_ptr.vmem [resolvable:$true] %s66_s17 }
  0x46   :  { %p3464_p5 = scmp.lt.u32.totalorder %s3460_s20, %s5947_s4 }
  0x48   :  { %p3466_p6 = pnand %p3464_p5, %p3461_p4 }
  0x4a   :  { %3469 = shalt.err (!%p3466_p6)
}
  0x4b   :  { %s3470_s27 = scalar_lea.vmem %s67_s17, 512  ;;  %p3475_p8 = scmp.lt.s32.totalorder %s67_s17, %s67_s17 }
  0x4c   :  { %p3471_p7 = scmp.ne.s32.totalorder %s67_s17, %s3470_s27  ;;  %p3476_p9 = scmp.lt.s32.totalorder %s3470_s27, %s3470_s27 }
  0x4e   :  { %p3477_p10 = por %p3476_p9, %p3475_p8 }
  0x50   :  { %p3478_p11 = pnand %p3477_p10, %p3471_p7 }
  0x52   :  { %3481 = shalt.err (!%p3478_p11)
}
  0x53   :  { %69 = dma.hbm_to_vmem [thread:$0]  %s5947_s4, 512, %s67_s17, [#allocation10]  }
  0x54   :  { %3504 = dma.done.wait [#allocation4], 40960  }
  0x55   :  { %3505 = vsyncadd [#allocation4], 4294926336 }
  0x56   :  { %3506 = dma.done.wait [#allocation7], 81920  }
  0x57   :  { %3507 = vsyncadd [#allocation7], 4294885376 }
  0x58   :  { %3508 = dma.done.wait [#allocation10], 1024  }
  0x59   :  { %3509 = vsyncadd [#allocation10], 4294966272  ;;  %v3626_v0 = vld [vmem:[#allocation9] sm:$0xff]  ;;  %v3628_v1 = vld [vmem:[#allocation9 + $0x8] sm:$0xff]  ;;  %v5949_v14 = vlaneseq  ;;  %vm344_vm1 = vcmask 1040384   ;;  %s3519_s22 = smov [#allocation12]  }
  0x5a   :  { %v108_v2 = vand.u32 2147483647, %v3626_v0  ;;  %v109_v3 = vand.u32 2147483647, %v3628_v1  ;;  %v3632_v5 = vld [vmem:[#allocation9 + $0x10] sm:$0xff]  ;;  %v3634_v7 = vld [vmem:[#allocation9 + $0x18] sm:$0xff] }
  0x5b   :  { %v110_v9 = vand.u32 2147483647, %v3632_v5  ;;  %v111_v10 = vand.u32 2147483647, %v3634_v7  ;;  %v3643_v20 = vshrl.u32 %v5949_v14, 7  ;;  %v104_v22 = vld [vmem:[#allocation11] sm:$0xff] }
  0x5c   :  { %v112_v4 = vsub.f32 0.0, %v108_v2  ;;  %v113_v8 = vsub.f32 0.0, %v109_v3  ;;  %v105_v23 = vld [vmem:[#allocation11 + $0x8] sm:$0xff]  ;;  %v106_v24 = vld [vmem:[#allocation11 + $0x10] sm:$0xff]  ;;  %v107_v25 = vld [vmem:[#allocation11 + $0x18] sm:$0xff]  ;;  %v164_v31 = vmax.f32 %v3626_v0, 0.0  ;;  %v168_v33 = vmul.f32 %v104_v22, %v3626_v0 }
  0x5d   :  { %v114_v12 = vsub.f32 0.0, %v110_v9  ;;  %v115_v13 = vsub.f32 0.0, %v111_v10  ;;  %5952 = vst [vmem:[#allocation17_spill] sm:$0xff] %v3643_v20  ;;  %v3647_v27 = vsub.s32 0, %v3643_v20  ;;  %v3650_v28 = vsub.s32 1, %v3643_v20  ;;  %v3661_v35 = vld [vmem:[#allocation8] sm:$0xff] }
  0x5e   :  { %v116_v6 = vmul.f32 1.442695, %v112_v4  ;;  %v118_v11 = vmul.f32 1.442695, %v113_v8  ;;  %v3653_v29 = vsub.s32 2, %v3643_v20  ;;  %v165_v32 = vmax.f32 %v3628_v1, 0.0 }
  0x5f   :  { %v120_v15 = vmul.f32 1.442695, %v114_v12  ;;  %v122_v17 = vmul.f32 1.442695, %v115_v13  ;;  %v169_v34 = vmul.f32 %v105_v23, %v3628_v1  ;;  %v3663_v36 = vld [vmem:[#allocation8 + $0x8] sm:$0xff]  ;;  %v166_v37 = vmax.f32 %v3632_v5, 0.0 }
  0x60   :  { %3356 = vpow2.f32 %v116_v6  ;;  %v167_v38 = vmax.f32 %v3634_v7, 0.0  ;;  %v170_v39 = vmul.f32 %v106_v24, %v3632_v5  ;;  %v171_v40 = vmul.f32 %v107_v25, %v3634_v7  ;;  %v3669_v41 = vld [vmem:[#allocation8 + $0x10] sm:$0xff]  ;;  %v3671_v42 = vld [vmem:[#allocation8 + $0x18] sm:$0xff]  ;;  %v3673_v43 = vld [vmem:[#allocation8 + $0x20] sm:$0xff]  ;;  %s3332_s28 = sshll.u32 %s3519_s22, 4  ;;  %s3333_s28 = int_to_ptr.vmem [resolvable:$true] %s3332_s28 }
  0x61   :  { %3358 = vpow2.f32 %v118_v11  ;;  %v3676_v44 = vsub.s32 3, %v3643_v20  ;;  %v3679_v45 = vsub.s32 4, %v3643_v20  ;;  %v3682_v46 = vsub.s32 5, %v3643_v20  ;;  %v3684_v47 = vld [vmem:[#allocation8 + $0x28] sm:$0xff]  ;;  %v3686_v48 = vld [vmem:[#allocation8 + $0x30] sm:$0xff]  ;;  %v439_v49 = vld [vmem:[#allocation3] sm:$0xff]  ;;  %p3487_p13 = scmp.lt.s32.totalorder %s3333_s28, %s3333_s28 }
  0x62   :  { %3360 = vpow2.f32 %v120_v15  ;;  %v440_v50 = vld [vmem:[#allocation3 + $0x8] sm:$0xff]  ;;  %v3690_v53 = vsub.s32 6, %v3643_v20  ;;  %v3692_v54 = vld [vmem:[#allocation8 + $0x38] sm:$0xff]  ;;  %v441_v55 = vld [vmem:[#allocation3 + $0x10] sm:$0xff]  ;;  %v3695_v59 = vsub.f32 %v164_v31, %v168_v33  ;;  %v3697_v60 = vsub.f32 %v165_v32, %v169_v34  ;;  %s3482_s29 = scalar_lea.vmem %s3333_s28, 128 }
  0x63   :  { %3362 = vpow2.f32 %v122_v17  ;;  %v442_v56 = vld [vmem:[#allocation3 + $0x18] sm:$0xff]  ;;  %v443_v57 = vld [vmem:[#allocation3 + $0x20] sm:$0xff]  ;;  %v3700_v61 = vsub.s32 7, %v3643_v20  ;;  %v3704_v63 = vld [vmem:[#allocation8 + $0x48] sm:$0xff]  ;;  %v3708_v3 = vsub.f32 %v166_v37, %v170_v39  ;;  %v3710_v4 = vsub.f32 %v167_v38, %v171_v40  ;;  %p3483_p12 = scmp.ne.s32.totalorder %s3333_s28, %s3482_s29  ;;  %p3488_p0 = scmp.lt.s32.totalorder %s3482_s29, %s3482_s29 }
  0x64   :  { %v3702_v62 = vld [vmem:[#allocation8 + $0x40] sm:$0xff]  ;;  %v444_v0 = vld [vmem:[#allocation3 + $0x28] sm:$0xff]  ;;  %v445_v1 = vld [vmem:[#allocation3 + $0x30] sm:$0xff]  ;;  %v455_v8 = vsub.f32 %v439_v49, %v3661_v35  ;;  %v456_v9 = vsub.f32 %v440_v50, %v3663_v36  ;;  %v457_v17 = vsub.f32 %v441_v55, %v3669_v41 }
  0x65   :  { %5953 = vst [vmem:[#allocation18_spill] sm:$0xff] %v3710_v4  ;;  %v3712_v5 = vld [vmem:[#allocation8 + $0x50] sm:$0xff]  ;;  %v3714_v6 = vld [vmem:[#allocation8 + $0x58] sm:$0xff]  ;;  %v3719_v11 = vld [vmem:[#allocation8 + $0x60] sm:$0xff]  ;;  %v3731_v31 = vsub.f32 %v445_v1, %v3686_v48  ;;  %p3489_p1 = por %p3488_p0, %p3487_p13 }
  0x66   :  { %v446_v7 = vld [vmem:[#allocation3 + $0x38] sm:$0xff]  ;;  %v3721_v12 = vld [vmem:[#allocation8 + $0x68] sm:$0xff]  ;;  %v447_v13 = vld [vmem:[#allocation3 + $0x40] sm:$0xff]  ;;  %v3748_v55 = vmul.f32 %v455_v8, %v455_v8 }
  0x67   :  { %v448_v15 = vld [vmem:[#allocation3 + $0x48] sm:$0xff]  ;;  %v449_v23 = vld [vmem:[#allocation3 + $0x50] sm:$0xff]  ;;  %v450_v24 = vld [vmem:[#allocation3 + $0x58] sm:$0xff]  ;;  %v3736_v38 = vsub.f32 %v446_v7, %v3692_v54  ;;  %p3490_p2 = pnand %p3489_p1, %p3483_p12 }
  0x68   :  { %v451_v25 = vld [vmem:[#allocation3 + $0x60] sm:$0xff]  ;;  %v452_v37 = vld [vmem:[#allocation3 + $0x68] sm:$0xff]  ;;  %v3738_v40 = vld [vmem:[#allocation8 + $0x70] sm:$0xff]  ;;  %5954 = vst [vmem:[#allocation19_spill] sm:$0xff] %v3748_v55 }
  0x69   :  { %v3740_v49 = vld [vmem:[#allocation8 + $0x78] sm:$0xff]  ;;  %v453_v50 = vld [vmem:[#allocation3 + $0x70] sm:$0xff]  ;;  %v471_v1 = vld [vmem:[#allocation6] sm:$0xff]  ;;  %v3762_v8 = vsub.f32 %v451_v25, %v3719_v11 }
  0x6a   :  { %v3638_v16 = vpop.eup %3356  ;;  %v472_v7 = vld [vmem:[#allocation6 + $0x8] sm:$0xff]  ;;  %v3769_v20 = vsub.f32 %v453_v50, %v3738_v40  ;;  %v475_v4 = vld [vmem:[#allocation6 + $0x20] sm:$0xff]  ;;  %v477_v25 = vld [vmem:[#allocation6 + $0x30] sm:$0xff] }
  0x6b   :  { %v128_v18 = vmul.f32 0.33333334, %v3638_v16  ;;  %v148_v19 = vadd.f32 1.0, %v3638_v16  ;;  %v3655_v30 = vpop.eup %3358  ;;  %vm124_vm0 = vcmp.lt.f32.partialorder %v3638_v16, 0.01 }
  0x6c   :  { %v149_v52 = vadd.f32 1.0, %v3655_v30  ;;  %v129_v58 = vmul.f32 0.33333334, %v3655_v30  ;;  %v3706_v2 = vpop.eup %3360  ;;  %vm125_vm2 = vcmp.lt.f32.partialorder %v3655_v30, 0.01 }
  0x6d   :  { %v132_v21 = vsub.f32 0.5, %v128_v18  ;;  %3364 = vlog2.f32 %v148_v19  ;;  %v130_v10 = vmul.f32 0.33333334, %v3706_v2  ;;  %v458_v18 = vsub.f32 %v442_v56, %v3671_v42 }
  0x6e   :  { %v459_v19 = vsub.f32 %v443_v57, %v3673_v43  ;;  %3366 = vlog2.f32 %v149_v52  ;;  %v133_v34 = vsub.f32 0.5, %v129_v58  ;;  %v3746_v52 = vsub.f32 %v448_v15, %v3704_v63  ;;  %v454_v57 = vld [vmem:[#allocation3 + $0x78] sm:$0xff] }
  0x6f   :  { %v136_v26 = vmul.f32 %v3638_v16, %v132_v21  ;;  %v3726_v21 = vpop.eup %3362  ;;  %v134_v56 = vsub.f32 0.5, %v130_v10  ;;  %v3751_v58 = vsub.f32 %v449_v23, %v3712_v5  ;;  %v3765_v10 = vsub.f32 %v452_v37, %v3721_v12  ;;  %v473_v23 = vld [vmem:[#allocation6 + $0x10] sm:$0xff] }
  0x70   :  { %v131_v33 = vmul.f32 0.33333334, %v3726_v21  ;;  %v3780_v37 = vsub.f32 %v472_v7, %v3663_v36  ;;  %v151_v50 = vadd.f32 1.0, %v3726_v21  ;;  %v3790_v55 = vsub.f32 %v473_v23, %v3669_v41  ;;  %v484_v23 = vld [vmem:[#allocation6 + $0x68] sm:$0xff] }
  0x71   :  { %v140_v51 = vsub.f32 1.0, %v136_v26  ;;  %v460_v26 = vsub.f32 %v444_v0, %v3684_v47  ;;  %v3754_v0 = vsub.f32 %v450_v24, %v3714_v6  ;;  %v137_v24 = vmul.f32 %v3655_v30, %v133_v34 }
  0x72   :  { %v135_v14 = vsub.f32 0.5, %v131_v33  ;;  %v3782_v33 = vmul.f32 %v458_v18, %v458_v18  ;;  %v138_v34 = vmul.f32 %v3706_v2, %v134_v56  ;;  %v3796_v36 = vsub.f32 %v475_v4, %v3673_v43 }
  0x73   :  { %v144_v22 = vmul.f32 %v3638_v16, %v140_v51  ;;  %v3743_v51 = vsub.f32 %v447_v13, %v3702_v62  ;;  %v150_v13 = vadd.f32 1.0, %v3706_v2  ;;  %v3774_v16 = vsub.f32 %v454_v57, %v3740_v49  ;;  %v479_v57 = vld [vmem:[#allocation6 + $0x40] sm:$0xff] }
  0x74   :  { %5957 = vst [vmem:[#allocation22_spill] sm:$0xff] %v3782_v33  ;;  %v3798_v18 = vmul.f32 %v459_v19, %v459_v19  ;;  %v139_v56 = vmul.f32 %v3726_v21, %v135_v14  ;;  %v141_v7 = vsub.f32 1.0, %v137_v24  ;;  %v3805_v41 = vsub.f32 %v477_v25, %v3686_v48  ;;  %v485_v48 = vld [vmem:[#allocation6 + $0x70] sm:$0xff]  ;;  %v486_v24 = vld [vmem:[#allocation6 + $0x78] sm:$0xff] }
  0x75   :  { %3368 = vlog2.f32 %v150_v13  ;;  %v3812_v4 = vsub.f32 %v479_v57, %v3702_v62  ;;  %v3814_v14 = vmul.f32 %v460_v26, %v460_v26  ;;  %v142_v19 = vsub.f32 1.0, %v138_v34 }
  0x76   :  { %3370 = vlog2.f32 %v151_v50  ;;  %v145_v25 = vmul.f32 %v3655_v30, %v141_v7  ;;  %vm126_vm3 = vcmp.lt.f32.partialorder %v3706_v2, 0.01  ;;  %v500_v57 = vsub.f32 %v484_v23, %v3721_v12 }
  0x77   :  { %v3365_v32 = vpop.eup %3364  ;;  %5958 = vst [vmem:[#allocation23_spill] sm:$0xff] %v3814_v14  ;;  %v502_v14 = vsub.f32 %v486_v24, %v3740_v49  ;;  %v3849_v49 = vmul.f32 %v3743_v51, %v3743_v51  ;;  %vm127_vm4 = vcmp.lt.f32.partialorder %v3726_v21, 0.01  ;;  %v3864_v51 = vmul.f32 %v3751_v58, %v3751_v58 }
  0x78   :  { %v153_v39 = vmul.f32 0.6931472, %v3365_v32  ;;  %v3756_v32 = vmul.f32 %v456_v9, %v456_v9  ;;  %v474_v9 = vld [vmem:[#allocation6 + $0x18] sm:$0xff]  ;;  %v3367_v13 = vpop.eup %3366  ;;  %v3872_v23 = vmul.f32 %v3762_v8, %v3762_v8  ;;  %v3890_v8 = vmul.f32 %v3774_v16, %v3774_v16 }
  0x79   :  { %v155_v34 = vmul.f32 0.6931472, %v3367_v13 }
  0x7a   :  { %5955 = vst [vmem:[#allocation20_spill] sm:$0xff] %v3756_v32  ;;  %v160_v15 = vsel %vm124_vm0, %v144_v22, %v153_v39  ;;  %v3771_v32 = vmul.f32 %v457_v17, %v457_v17  ;;  %v476_v22 = vld [vmem:[#allocation6 + $0x28] sm:$0xff]  ;;  %v3777_v39 = vsub.f32 %v471_v1, %v3661_v35  ;;  %v3793_v1 = vsub.f32 %v474_v9, %v3671_v42  ;;  %v483_v42 = vld [vmem:[#allocation6 + $0x60] sm:$0xff] }
  0x7b   :  { %v3787_v17 = vadd.f32 %v3695_v59, %v160_v15  ;;  %v480_v35 = vld [vmem:[#allocation6 + $0x48] sm:$0xff]  ;;  %v481_v59 = vld [vmem:[#allocation6 + $0x50] sm:$0xff]  ;;  %v482_v15 = vld [vmem:[#allocation6 + $0x58] sm:$0xff]  ;;  %v3802_v33 = vsub.f32 %v476_v22, %v3684_v47  ;;  %v499_v50 = vsub.f32 %v483_v42, %v3719_v11  ;;  %v3841_v11 = vmul.f32 %v3736_v38, %v3736_v38 }
  0x7c   :  { %5956 = vst [vmem:[#allocation21_spill] sm:$0xff] %v3771_v32  ;;  %v478_v32 = vld [vmem:[#allocation6 + $0x38] sm:$0xff]  ;;  %v496_v9 = vsub.f32 %v480_v35, %v3704_v63  ;;  %v497_v62 = vsub.f32 %v481_v59, %v3712_v5  ;;  %v498_v26 = vsub.f32 %v482_v15, %v3714_v6  ;;  %v501_v35 = vsub.f32 %v485_v48, %v3738_v40 }
  0x7d   :  { %v3809_v43 = vsub.f32 %v478_v32, %v3692_v54  ;;  %v187_v47 = vrot.slane %v3787_v17, %v3647_v27  ;;  %v191_v22 = vrot.slane %v3787_v17, %v3650_v28  ;;  %v195_v54 = vrot.slane %v3787_v17, %v3653_v29 }
  0x7e   :  { %v143_v32 = vsub.f32 1.0, %v139_v56  ;;  %v199_v63 = vrot.slane %v3787_v17, %v3676_v44  ;;  %v146_v5 = vmul.f32 %v3706_v2, %v142_v19  ;;  %v3837_v56 = vmul.f32 %v3731_v31, %v3731_v31 }
  0x7f   :  { %v345_v6 = vsel %vm344_vm1, %v187_v47, 0.0  ;;  %v203_v7 = vrot.slane %v3787_v17, %v3679_v45  ;;  %v346_v12 = vsel %vm344_vm1, %v191_v22, 0.0  ;;  %v348_v40 = vsel %vm344_vm1, %v195_v54, 0.0  ;;  %v3369_v13 = vpop.eup %3368 }
  0x80   :  { %v147_v31 = vmul.f32 %v3726_v21, %v143_v32  ;;  %v161_v59 = vsel %vm125_vm2, %v145_v25, %v155_v34  ;;  %v347_v38 = vadd.f32 %v346_v12, %v345_v6  ;;  %v3857_v15 = vmul.f32 %v3746_v52, %v3746_v52  ;;  %v3371_v22 = vpop.eup %3370 }
  0x81   :  { %v207_v42 = vrot.slane %v3787_v17, %v3682_v46  ;;  %v350_v19 = vsel %vm344_vm1, %v199_v63, 0.0  ;;  %v3868_v47 = vmul.f32 %v3754_v0, %v3754_v0  ;;  %v3876_v52 = vmul.f32 %v3765_v10, %v3765_v10 }
  0x82   :  { %v349_v30 = vadd.f32 %v348_v40, %v347_v38  ;;  %v3880_v48 = vmul.f32 %v3769_v20, %v3769_v20  ;;  %v3883_v58 = vadd.f32 %v3697_v60, %v161_v59  ;;  %v211_v0 = vrot.slane %v3787_v17, %v3690_v53 }
  0x83   :  { %v352_v24 = vsel %vm344_vm1, %v203_v7, 0.0  ;;  %v157_v54 = vmul.f32 0.6931472, %v3369_v13  ;;  %v519_v32 = vmul.f32 %v3777_v39, %v3777_v39  ;;  %v520_v20 = vmul.f32 %v3780_v37, %v3780_v37 }
  0x84   :  { %v351_v10 = vadd.f32 %v350_v19, %v349_v30  ;;  %v215_v60 = vrot.slane %v3787_v17, %v3700_v61  ;;  %v354_v25 = vsel %vm344_vm1, %v207_v42, 0.0  ;;  %v521_v34 = vmul.f32 %v3790_v55, %v3790_v55 }
  0x85   :  { %v522_v16 = vmul.f32 %v3793_v1, %v3793_v1  ;;  %v3905_v6 = vmul.f32 %v3796_v36, %v3796_v36  ;;  %v3909_v39 = vmul.f32 %v3802_v33, %v3802_v33  ;;  %v3913_v37 = vmul.f32 %v3805_v41, %v3805_v41 }
  0x86   :  { %v353_v63 = vadd.f32 %v352_v24, %v351_v10  ;;  %v159_v17 = vmul.f32 0.6931472, %v3371_v22  ;;  %v219_v55 = vrot.slane %v3883_v58, %v3647_v27  ;;  %v356_v7 = vsel %vm344_vm1, %v211_v0, 0.0  ;;  %v5959_v0 = vld [vmem:[#allocation19_spill] sm:$0xff]  ;;  %v5965_v22 = vld [vmem:[#allocation22_spill] sm:$0xff] }
  0x87   :  { %v3920_v1 = vmul.f32 %v3809_v43, %v3809_v43  ;;  %v162_v36 = vsel %vm126_vm3, %v146_v5, %v157_v54  ;;  %v3926_v33 = vmul.f32 %v3812_v4, %v3812_v4  ;;  %v3928_v41 = vmul.f32 %v496_v9, %v496_v9  ;;  %v5967_v10 = vld [vmem:[#allocation18_spill] sm:$0xff] }
  0x88   :  { %v355_v12 = vadd.f32 %v354_v25, %v353_v63  ;;  %v223_v40 = vrot.slane %v3883_v58, %v3650_v28  ;;  %v358_v59 = vsel %vm344_vm1, %v215_v60, 0.0  ;;  %v3933_v38 = vmul.f32 %v497_v62, %v497_v62 }
  0x89   :  { %v3935_v13 = vmul.f32 %v498_v26, %v498_v26  ;;  %v3937_v42 = vmul.f32 %v499_v50, %v499_v50  ;;  %v3939_v2 = vmul.f32 %v500_v57, %v500_v57  ;;  %v3941_v5 = vmul.f32 %v501_v35, %v501_v35  ;;  %v5961_v57 = vld [vmem:[#allocation20_spill] sm:$0xff] }
  0x8a   :  { %v357_v43 = vadd.f32 %v356_v7, %v355_v12  ;;  %v163_v4 = vsel %vm127_vm4, %v147_v31, %v159_v17  ;;  %v178_v9 = vadd.f32 %v3708_v3, %v162_v36  ;;  %v227_v19 = vrot.slane %v3883_v58, %v3653_v29  ;;  %v5963_v3 = vld [vmem:[#allocation21_spill] sm:$0xff] }
  0x8b   :  { %v360_v62 = vsel %vm344_vm1, %v219_v55, 0.0  ;;  %v3949_v26 = vmul.f32 %v502_v14, %v502_v14  ;;  %v3952_v50 = vadd.f32 %v519_v32, %v5959_v0  ;;  %v3955_v24 = vadd.f32 %v520_v20, %v5961_v57 }
  0x8c   :  { %v359_v30 = vadd.f32 %v358_v59, %v357_v43  ;;  %v231_v21 = vrot.slane %v3883_v58, %v3676_v44  ;;  %v362_v35 = vsel %vm344_vm1, %v223_v40, 0.0  ;;  %v3961_v31 = vadd.f32 %v521_v34, %v5963_v3 }
  0x8d   :  { %5960 = vst [vmem:[#allocation19_spill] sm:$0xff] %v3952_v50  ;;  %5962 = vst [vmem:[#allocation20_spill] sm:$0xff] %v3955_v24  ;;  %v3964_v54 = vadd.f32 %v522_v16, %v5965_v22  ;;  %v179_v14 = vadd.f32 %v5967_v10, %v163_v4  ;;  %v235_v32 = vrot.slane %v3883_v58, %v3679_v45  ;;  %v364_v16 = vsel %vm344_vm1, %v227_v19, 0.0 }
  0x8e   :  { %5964 = vst [vmem:[#allocation21_spill] sm:$0xff] %v3961_v31  ;;  %v239_v20 = vrot.slane %v3883_v58, %v3682_v46  ;;  %v361_v60 = vadd.f32 %v360_v62, %v359_v30  ;;  %v243_v25 = vrot.slane %v3883_v58, %v3690_v53  ;;  %v247_v63 = vrot.slane %v3883_v58, %v3700_v61  ;;  %v610_v31 = vld [vmem:[#allocation6 + $0xd8] sm:$0xff] }
  0x8f   :  { %5966 = vst [vmem:[#allocation22_spill] sm:$0xff] %v3964_v54  ;;  %v251_v34 = vrot.slane %v178_v9, %v3647_v27  ;;  %v255_v17 = vrot.slane %v178_v9, %v3650_v28  ;;  %v259_v55 = vrot.slane %v178_v9, %v3653_v29  ;;  %v263_v7 = vrot.slane %v178_v9, %v3676_v44  ;;  %v607_v54 = vld [vmem:[#allocation6 + $0xc0] sm:$0xff] }
  0x90   :  { %v363_v36 = vadd.f32 %v362_v35, %v361_v60  ;;  %v267_v12 = vrot.slane %v178_v9, %v3679_v45  ;;  %v271_v40 = vrot.slane %v178_v9, %v3682_v46  ;;  %v275_v59 = vrot.slane %v178_v9, %v3690_v53 }
  0x91   :  { %v366_v43 = vsel %vm344_vm1, %v231_v21, 0.0  ;;  %v279_v58 = vrot.slane %v178_v9, %v3700_v61  ;;  %v283_v4 = vrot.slane %v179_v14, %v3647_v27  ;;  %v287_v19 = vrot.slane %v179_v14, %v3650_v28 }
  0x92   :  { %v365_v62 = vadd.f32 %v364_v16, %v363_v36  ;;  %v291_v30 = vrot.slane %v179_v14, %v3653_v29  ;;  %v295_v0 = vrot.slane %v179_v14, %v3676_v44  ;;  %v299_v57 = vrot.slane %v179_v14, %v3679_v45  ;;  %v4030_v16 = vld [vmem:[#allocation8 + $0x80] sm:$0xff] }
  0x93   :  { %v368_v35 = vsel %vm344_vm1, %v235_v32, 0.0  ;;  %v303_v3 = vrot.slane %v179_v14, %v3682_v46  ;;  %v307_v22 = vrot.slane %v179_v14, %v3690_v53  ;;  %v311_v21 = vrot.slane %v179_v14, %v3700_v61 }
  0x94   :  { %v367_v9 = vadd.f32 %v366_v43, %v365_v62  ;;  %v370_v27 = vsel %vm344_vm1, %v239_v20, 0.0  ;;  %v372_v28 = vsel %vm344_vm1, %v243_v25, 0.0  ;;  %v374_v10 = vsel %vm344_vm1, %v247_v63, 0.0  ;;  %v567_v43 = vld [vmem:[#allocation3 + $0x80] sm:$0xff] }
  0x95   :  { %v3998_v29 = vsel %vm344_vm1, %v251_v34, 0.0  ;;  %v4001_v45 = vsel %vm344_vm1, %v255_v17, 0.0  ;;  %v4004_v46 = vsel %vm344_vm1, %v259_v55, 0.0  ;;  %v4007_v53 = vsel %vm344_vm1, %v263_v7, 0.0 }
  0x96   :  { %v369_v44 = vadd.f32 %v368_v35, %v367_v9  ;;  %v4010_v61 = vsel %vm344_vm1, %v267_v12, 0.0  ;;  %v4013_v14 = vsel %vm344_vm1, %v271_v40, 0.0  ;;  %v4016_v32 = vsel %vm344_vm1, %v275_v59, 0.0  ;;  %v4044_v12 = vld [vmem:[#allocation8 + $0x88] sm:$0xff]  ;;  %v4046_v40 = vld [vmem:[#allocation8 + $0x90] sm:$0xff]  ;;  %v4048_v59 = vld [vmem:[#allocation8 + $0x98] sm:$0xff] }
  0x97   :  { %v4019_v20 = vsel %vm344_vm1, %v279_v58, 0.0  ;;  %v4022_v25 = vsel %vm344_vm1, %v283_v4, 0.0  ;;  %v4025_v63 = vsel %vm344_vm1, %v287_v19, 0.0  ;;  %v4028_v34 = vsel %vm344_vm1, %v291_v30, 0.0  ;;  %v568_v58 = vld [vmem:[#allocation3 + $0x88] sm:$0xff]  ;;  %v5976_v30 = vld [vmem:[#allocation23_spill] sm:$0xff] }
  0x98   :  { %v371_v60 = vadd.f32 %v370_v27, %v369_v44  ;;  %5968 = vst [vmem:[#allocation18_spill] sm:$0xff] %v4025_v63  ;;  %5969 = vst [vmem:[#allocation24_spill] sm:$0xff] %v4028_v34  ;;  %v4033_v17 = vsel %vm344_vm1, %v295_v0, 0.0  ;;  %v4036_v55 = vsel %vm344_vm1, %v299_v57, 0.0  ;;  %v4039_v7 = vsel %vm344_vm1, %v303_v3, 0.0  ;;  %v4061_v57 = vld [vmem:[#allocation8 + $0xa0] sm:$0xff] }
  0x99   :  { %5970 = vst [vmem:[#allocation25_spill] sm:$0xff] %v4033_v17  ;;  %5971 = vst [vmem:[#allocation26_spill] sm:$0xff] %v4036_v55  ;;  %v4042_v36 = vsel %vm344_vm1, %v307_v22, 0.0  ;;  %v4051_v19 = vsel %vm344_vm1, %v311_v21, 0.0  ;;  %v4055_v62 = vadd.f32 %v3905_v6, %v3798_v18  ;;  %v4059_v0 = vadd.f32 %v3909_v39, %v5976_v30  ;;  %v4063_v35 = vld [vmem:[#allocation8 + $0xa8] sm:$0xff]  ;;  %v4065_v3 = vld [vmem:[#allocation8 + $0xb0] sm:$0xff] }
  0x9a   :  { %5972 = vst [vmem:[#allocation27_spill] sm:$0xff] %v4039_v7  ;;  %5973 = vst [vmem:[#allocation28_spill] sm:$0xff] %v4042_v36  ;;  %v373_v4 = vadd.f32 %v372_v28, %v371_v60  ;;  %v4067_v22 = vld [vmem:[#allocation8 + $0xb8] sm:$0xff]  ;;  %v569_v9 = vld [vmem:[#allocation3 + $0x90] sm:$0xff]  ;;  %v4071_v28 = vadd.f32 %v3913_v37, %v3837_v56  ;;  %v4075_v18 = vadd.f32 %v3920_v1, %v3841_v11 }
  0x9b   :  { %5974 = vst [vmem:[#allocation29_spill] sm:$0xff] %v4051_v19  ;;  %5975 = vst [vmem:[#allocation30_spill] sm:$0xff] %v4055_v62  ;;  %v570_v27 = vld [vmem:[#allocation3 + $0x98] sm:$0xff]  ;;  %v571_v21 = vld [vmem:[#allocation3 + $0xa0] sm:$0xff]  ;;  %v4079_v6 = vadd.f32 %v3926_v33, %v3849_v49  ;;  %v4083_v39 = vadd.f32 %v3928_v41, %v3857_v15  ;;  %v4093_v11 = vadd.f32 %v3933_v38, %v3864_v51 }
  0x9c   :  { %5977 = vst [vmem:[#allocation23_spill] sm:$0xff] %v4059_v0  ;;  %5978 = vst [vmem:[#allocation31_spill] sm:$0xff] %v4071_v28  ;;  %v4085_v44 = vld [vmem:[#allocation8 + $0xc0] sm:$0xff]  ;;  %v4087_v60 = vld [vmem:[#allocation8 + $0xc8] sm:$0xff]  ;;  %v375_v36 = vadd.f32 %v374_v10, %v373_v4  ;;  %v4097_v49 = vadd.f32 %v3935_v13, %v3868_v47  ;;  %v4101_v15 = vadd.f32 %v3937_v42, %v3872_v23 }
  0x9d   :  { %5979 = vst [vmem:[#allocation32_spill] sm:$0xff] %v4075_v18  ;;  %5980 = vst [vmem:[#allocation33_spill] sm:$0xff] %v4079_v6  ;;  %v4089_v30 = vld [vmem:[#allocation8 + $0xd0] sm:$0xff]  ;;  %v572_v56 = vld [vmem:[#allocation3 + $0xa8] sm:$0xff]  ;;  %v4113_v38 = vadd.f32 %v3939_v2, %v3876_v52  ;;  %v4117_v47 = vadd.f32 %v3941_v5, %v3880_v48  ;;  %v4121_v23 = vadd.f32 %v3949_v26, %v3890_v8 }
  0x9e   :  { %5981 = vst [vmem:[#allocation34_spill] sm:$0xff] %v4083_v39  ;;  %v573_v37 = vld [vmem:[#allocation3 + $0xb0] sm:$0xff]  ;;  %v574_v19 = vld [vmem:[#allocation3 + $0xb8] sm:$0xff]  ;;  %5982 = vst [vmem:[#allocation35_spill] sm:$0xff] %v4093_v11  ;;  %v583_v11 = vsub.f32 %v567_v43, %v4030_v16  ;;  %v377_v39 = vadd.f32 %v3998_v29, %v375_v36  ;;  %v584_v52 = vsub.f32 %v568_v58, %v4044_v12 }
  0x9f   :  { %5983 = vst [vmem:[#allocation36_spill] sm:$0xff] %v4097_v49  ;;  %5984 = vst [vmem:[#allocation37_spill] sm:$0xff] %v4101_v15  ;;  %v4103_v1 = vld [vmem:[#allocation8 + $0xd8] sm:$0xff]  ;;  %v4105_v33 = vld [vmem:[#allocation8 + $0xe0] sm:$0xff]  ;;  %v585_v2 = vsub.f32 %v569_v9, %v4046_v40  ;;  %v586_v48 = vsub.f32 %v570_v27, %v4048_v59  ;;  %v587_v8 = vsub.f32 %v571_v21, %v4061_v57 }
  0xa0   :  { %v4107_v41 = vld [vmem:[#allocation8 + $0xe8] sm:$0xff]  ;;  %v4109_v7 = vld [vmem:[#allocation8 + $0xf0] sm:$0xff]  ;;  %v575_v10 = vld [vmem:[#allocation3 + $0xc0] sm:$0xff]  ;;  %5985 = vst [vmem:[#allocation38_spill] sm:$0xff] %v4113_v38  ;;  %v588_v26 = vsub.f32 %v572_v56, %v4063_v35  ;;  %v379_v36 = vadd.f32 %v4001_v45, %v377_v39 }
  0xa1   :  { %v576_v4 = vld [vmem:[#allocation3 + $0xc8] sm:$0xff]  ;;  %v577_v51 = vld [vmem:[#allocation3 + $0xd0] sm:$0xff]  ;;  %5986 = vst [vmem:[#allocation39_spill] sm:$0xff] %v4117_v47  ;;  %5987 = vst [vmem:[#allocation40_spill] sm:$0xff] %v4121_v23  ;;  %v589_v23 = vsub.f32 %v573_v37, %v4065_v3  ;;  %v590_v47 = vsub.f32 %v574_v19, %v4067_v22  ;;  %v591_v58 = vsub.f32 %v575_v10, %v4085_v44 }
  0xa2   :  { %v566_v13 = vld [vmem:[#allocation8 + $0xf8] sm:$0xff]  ;;  %v579_v15 = vld [vmem:[#allocation3 + $0xe0] sm:$0xff]  ;;  %v580_v49 = vld [vmem:[#allocation3 + $0xe8] sm:$0xff]  ;;  %v592_v9 = vsub.f32 %v576_v4, %v4087_v60  ;;  %v593_v27 = vsub.f32 %v577_v51, %v4089_v30  ;;  %v381_v39 = vadd.f32 %v4004_v46, %v379_v36 }
  0xa3   :  { %v578_v42 = vld [vmem:[#allocation3 + $0xd8] sm:$0xff]  ;;  %v581_v6 = vld [vmem:[#allocation3 + $0xf0] sm:$0xff]  ;;  %v599_v5 = vld [vmem:[#allocation6 + $0x80] sm:$0xff]  ;;  %v595_v37 = vsub.f32 %v579_v15, %v4105_v33  ;;  %v596_v19 = vsub.f32 %v580_v49, %v4107_v41 }
  0xa4   :  { %v582_v18 = vld [vmem:[#allocation3 + $0xf8] sm:$0xff]  ;;  %v600_v43 = vld [vmem:[#allocation6 + $0x88] sm:$0xff]  ;;  %v601_v38 = vld [vmem:[#allocation6 + $0x90] sm:$0xff]  ;;  %v594_v56 = vsub.f32 %v578_v42, %v4103_v1  ;;  %v597_v55 = vsub.f32 %v581_v6, %v4109_v7  ;;  %v615_v24 = vsub.f32 %v599_v5, %v4030_v16  ;;  %v383_v46 = vadd.f32 %v4007_v53, %v381_v39 }
  0xa5   :  { %v602_v29 = vld [vmem:[#allocation6 + $0x98] sm:$0xff]  ;;  %v603_v28 = vld [vmem:[#allocation6 + $0xa0] sm:$0xff]  ;;  %v604_v0 = vld [vmem:[#allocation6 + $0xa8] sm:$0xff]  ;;  %v598_v10 = vsub.f32 %v582_v18, %v566_v13  ;;  %v616_v50 = vsub.f32 %v600_v43, %v4044_v12  ;;  %v617_v49 = vsub.f32 %v601_v38, %v4046_v40  ;;  %v623_v16 = vsub.f32 %v607_v54, %v4085_v44 }
  0xa6   :  { %v605_v21 = vld [vmem:[#allocation6 + $0xb0] sm:$0xff]  ;;  %v606_v62 = vld [vmem:[#allocation6 + $0xb8] sm:$0xff]  ;;  %v608_v45 = vld [vmem:[#allocation6 + $0xc8] sm:$0xff]  ;;  %v618_v6 = vsub.f32 %v602_v29, %v4048_v59  ;;  %v619_v34 = vsub.f32 %v603_v28, %v4061_v57  ;;  %v620_v63 = vsub.f32 %v604_v0, %v4063_v35  ;;  %v626_v40 = vsub.f32 %v610_v31, %v4103_v1 }
  0xa7   :  { %v609_v4 = vld [vmem:[#allocation6 + $0xd0] sm:$0xff]  ;;  %v611_v51 = vld [vmem:[#allocation6 + $0xe0] sm:$0xff]  ;;  %v612_v42 = vld [vmem:[#allocation6 + $0xe8] sm:$0xff]  ;;  %v621_v18 = vsub.f32 %v605_v21, %v4065_v3  ;;  %v622_v36 = vsub.f32 %v606_v62, %v4067_v22  ;;  %v624_v12 = vsub.f32 %v608_v45, %v4087_v60  ;;  %v385_v57 = vadd.f32 %v4010_v61, %v383_v46 }
  0xa8   :  { %v613_v17 = vld [vmem:[#allocation6 + $0xf0] sm:$0xff]  ;;  %v614_v15 = vld [vmem:[#allocation6 + $0xf8] sm:$0xff]  ;;  %v625_v5 = vsub.f32 %v609_v4, %v4089_v30  ;;  %v627_v59 = vsub.f32 %v611_v51, %v4105_v33  ;;  %v628_v0 = vsub.f32 %v612_v42, %v4107_v41  ;;  %v631_v3 = vmul.f32 %v583_v11, %v583_v11  ;;  %v5989_v4 = vld [vmem:[#allocation24_spill] sm:$0xff] }
  0xa9   :  { %v629_v53 = vsub.f32 %v613_v17, %v4109_v7  ;;  %v630_v35 = vsub.f32 %v614_v15, %v566_v13  ;;  %v632_v28 = vmul.f32 %v584_v52, %v584_v52  ;;  %v633_v62 = vmul.f32 %v585_v2, %v585_v2 }
  0xaa   :  { %v634_v22 = vmul.f32 %v586_v48, %v586_v48  ;;  %v387_v54 = vadd.f32 %v4013_v14, %v385_v57  ;;  %v635_v44 = vmul.f32 %v587_v8, %v587_v8  ;;  %v636_v60 = vmul.f32 %v588_v26, %v588_v26  ;;  %v4168_v57 = vld [vmem:[#allocation8 + $0x100] sm:$0xff] }
  0xab   :  { %v637_v30 = vmul.f32 %v589_v23, %v589_v23  ;;  %v638_v38 = vmul.f32 %v590_v47, %v590_v47  ;;  %v639_v31 = vmul.f32 %v591_v58, %v591_v58  ;;  %v640_v1 = vmul.f32 %v592_v9, %v592_v9 }
  0xac   :  { %v641_v33 = vmul.f32 %v593_v27, %v593_v27  ;;  %v389_v61 = vadd.f32 %v4016_v32, %v387_v54  ;;  %v642_v43 = vmul.f32 %v594_v56, %v594_v56  ;;  %v643_v41 = vmul.f32 %v595_v37, %v595_v37 }
  0xad   :  { %v644_v29 = vmul.f32 %v596_v19, %v596_v19  ;;  %v645_v17 = vmul.f32 %v597_v55, %v597_v55  ;;  %v646_v7 = vmul.f32 %v598_v10, %v598_v10  ;;  %v647_v11 = vmul.f32 %v615_v24, %v615_v24  ;;  %v5988_v24 = vld [vmem:[#allocation18_spill] sm:$0xff] }
  0xae   :  { %v648_v13 = vmul.f32 %v616_v50, %v616_v50  ;;  %v391_v52 = vadd.f32 %v4019_v20, %v389_v61  ;;  %v649_v2 = vmul.f32 %v617_v49, %v617_v49  ;;  %v650_v14 = vmul.f32 %v618_v6, %v618_v6  ;;  %v713_v61 = vld [vmem:[#allocation3 + $0x110] sm:$0xff] }
  0xaf   :  { %v651_v48 = vmul.f32 %v619_v34, %v619_v34  ;;  %v652_v8 = vmul.f32 %v620_v63, %v620_v63  ;;  %v653_v23 = vmul.f32 %v621_v18, %v621_v18  ;;  %v654_v47 = vmul.f32 %v622_v36, %v622_v36  ;;  %v5990_v36 = vld [vmem:[#allocation25_spill] sm:$0xff] }
  0xb0   :  { %v655_v26 = vmul.f32 %v623_v16, %v623_v16  ;;  %v393_v58 = vadd.f32 %v4022_v25, %v391_v52  ;;  %v656_v9 = vmul.f32 %v624_v12, %v624_v12  ;;  %v657_v32 = vmul.f32 %v625_v5, %v625_v5 }
  0xb1   :  { %v658_v27 = vmul.f32 %v626_v40, %v626_v40  ;;  %v659_v21 = vmul.f32 %v627_v59, %v627_v59  ;;  %v660_v56 = vmul.f32 %v628_v0, %v628_v0  ;;  %v661_v55 = vmul.f32 %v629_v53, %v629_v53  ;;  %v5991_v40 = vld [vmem:[#allocation19_spill] sm:$0xff]  ;;  %v4170_v0 = vld [vmem:[#allocation8 + $0x108] sm:$0xff]  ;;  %v4172_v53 = vld [vmem:[#allocation8 + $0x110] sm:$0xff] }
  0xb2   :  { %v662_v37 = vmul.f32 %v630_v35, %v630_v35  ;;  %v395_v50 = vadd.f32 %v5988_v24, %v393_v58  ;;  %v663_v19 = vadd.f32 %v647_v11, %v631_v3  ;;  %v664_v20 = vadd.f32 %v648_v13, %v632_v28  ;;  %v711_v35 = vld [vmem:[#allocation3 + $0x100] sm:$0xff]  ;;  %v712_v3 = vld [vmem:[#allocation3 + $0x108] sm:$0xff]  ;;  %v5998_v13 = vld [vmem:[#allocation31_spill] sm:$0xff] }
  0xb3   :  { %v665_v45 = vadd.f32 %v649_v2, %v633_v62  ;;  %v666_v39 = vadd.f32 %v650_v14, %v634_v22  ;;  %v667_v34 = vadd.f32 %v651_v48, %v635_v44  ;;  %v668_v63 = vadd.f32 %v652_v8, %v636_v60  ;;  %v5992_v28 = vld [vmem:[#allocation20_spill] sm:$0xff]  ;;  %v5993_v22 = vld [vmem:[#allocation21_spill] sm:$0xff]  ;;  %v5994_v44 = vld [vmem:[#allocation22_spill] sm:$0xff] }
  0xb4   :  { %v669_v10 = vadd.f32 %v653_v23, %v637_v30  ;;  %v397_v51 = vadd.f32 %v5989_v4, %v395_v50  ;;  %v670_v42 = vadd.f32 %v654_v47, %v638_v38  ;;  %v671_v25 = vadd.f32 %v655_v26, %v639_v31  ;;  %v5995_v30 = vld [vmem:[#allocation30_spill] sm:$0xff]  ;;  %v4186_v31 = vld [vmem:[#allocation8 + $0x118] sm:$0xff]  ;;  %v5999_v2 = vld [vmem:[#allocation32_spill] sm:$0xff] }
  0xb5   :  { %v672_v15 = vadd.f32 %v656_v9, %v640_v1  ;;  %v673_v49 = vadd.f32 %v657_v32, %v641_v33  ;;  %v674_v6 = vadd.f32 %v658_v27, %v642_v43  ;;  %v675_v46 = vadd.f32 %v659_v21, %v643_v41  ;;  %v4188_v1 = vld [vmem:[#allocation8 + $0x120] sm:$0xff]  ;;  %v4190_v33 = vld [vmem:[#allocation8 + $0x128] sm:$0xff]  ;;  %v714_v43 = vld [vmem:[#allocation3 + $0x118] sm:$0xff] }
  0xb6   :  { %v676_v18 = vadd.f32 %v660_v56, %v644_v29  ;;  %v399_v16 = vadd.f32 %v5990_v36, %v397_v51  ;;  %v677_v12 = vadd.f32 %v661_v55, %v645_v17  ;;  %v678_v5 = vadd.f32 %v662_v37, %v646_v7  ;;  %v715_v41 = vld [vmem:[#allocation3 + $0x120] sm:$0xff]  ;;  %v5996_v29 = vld [vmem:[#allocation26_spill] sm:$0xff]  ;;  %v5997_v7 = vld [vmem:[#allocation23_spill] sm:$0xff] }
  0xb7   :  { %v4166_v59 = vadd.f32 %v663_v19, %v5991_v40  ;;  %v4175_v62 = vadd.f32 %v664_v20, %v5992_v28  ;;  %v4178_v54 = vadd.f32 %v665_v45, %v5993_v22  ;;  %v4181_v60 = vadd.f32 %v666_v39, %v5994_v44  ;;  %v4202_v48 = vld [vmem:[#allocation8 + $0x130] sm:$0xff]  ;;  %v4204_v8 = vld [vmem:[#allocation8 + $0x138] sm:$0xff]  ;;  %v4206_v23 = vld [vmem:[#allocation8 + $0x140] sm:$0xff] }
  0xb8   :  { %v4184_v38 = vadd.f32 %v667_v34, %v5995_v30  ;;  %v401_v17 = vadd.f32 %v5996_v29, %v399_v16  ;;  %v4194_v11 = vadd.f32 %v668_v63, %v5997_v7  ;;  %v4197_v52 = vadd.f32 %v669_v10, %v5998_v13  ;;  %v4208_v47 = vld [vmem:[#allocation8 + $0x148] sm:$0xff]  ;;  %v717_v58 = vld [vmem:[#allocation3 + $0x130] sm:$0xff]  ;;  %v718_v9 = vld [vmem:[#allocation3 + $0x138] sm:$0xff] }
  0xb9   :  { %v4200_v14 = vadd.f32 %v670_v42, %v5999_v2  ;;  %v716_v26 = vld [vmem:[#allocation3 + $0x128] sm:$0xff]  ;;  %v6003_v21 = vld [vmem:[#allocation34_spill] sm:$0xff]  ;;  %v6005_v55 = vld [vmem:[#allocation35_spill] sm:$0xff]  ;;  %v728_v13 = vsub.f32 %v712_v3, %v4170_v0 }
  0xba   :  { %v6001_v32 = vld [vmem:[#allocation33_spill] sm:$0xff]  ;;  %v4214_v56 = vadd.f32 %v672_v15, %v6003_v21  ;;  %v4217_v37 = vadd.f32 %v673_v49, %v6005_v55  ;;  %v6007_v24 = vld [vmem:[#allocation36_spill] sm:$0xff]  ;;  %v4222_v19 = vld [vmem:[#allocation8 + $0x150] sm:$0xff]  ;;  %v730_v21 = vsub.f32 %v714_v43, %v4186_v31  ;;  %v731_v55 = vsub.f32 %v715_v41, %v4188_v1 }
  0xbb   :  { %6000 = vst [vmem:[#allocation18_spill] sm:$0xff] %v4200_v14  ;;  %v4211_v27 = vadd.f32 %v671_v25, %v6001_v32  ;;  %v4220_v50 = vadd.f32 %v674_v6, %v6007_v24  ;;  %v4224_v20 = vld [vmem:[#allocation8 + $0x158] sm:$0xff]  ;;  %v4226_v45 = vld [vmem:[#allocation8 + $0x160] sm:$0xff]  ;;  %v720_v34 = vld [vmem:[#allocation3 + $0x148] sm:$0xff]  ;;  %v732_v24 = vsub.f32 %v716_v26, %v4190_v33 }
  0xbc   :  { %6004 = vst [vmem:[#allocation25_spill] sm:$0xff] %v4214_v56  ;;  %6006 = vst [vmem:[#allocation19_spill] sm:$0xff] %v4217_v37  ;;  %v719_v39 = vld [vmem:[#allocation3 + $0x140] sm:$0xff]  ;;  %v721_v63 = vld [vmem:[#allocation3 + $0x150] sm:$0xff] }
  0xbd   :  { %6002 = vst [vmem:[#allocation24_spill] sm:$0xff] %v4211_v27  ;;  %6008 = vst [vmem:[#allocation20_spill] sm:$0xff] %v4220_v50  ;;  %v6009_v10 = vld [vmem:[#allocation27_spill] sm:$0xff]  ;;  %v6010_v51 = vld [vmem:[#allocation37_spill] sm:$0xff]  ;;  %v735_v3 = vsub.f32 %v719_v39, %v4206_v23  ;;  %v737_v41 = vsub.f32 %v721_v63, %v4222_v19 }
  0xbe   :  { %v403_v4 = vadd.f32 %v6009_v10, %v401_v17  ;;  %v4230_v42 = vadd.f32 %v675_v46, %v6010_v51  ;;  %v6012_v25 = vld [vmem:[#allocation38_spill] sm:$0xff]  ;;  %v6014_v49 = vld [vmem:[#allocation39_spill] sm:$0xff]  ;;  %v708_v36 = vld [vmem:[#allocation8 + $0x168] sm:$0xff]  ;;  %v727_v46 = vsub.f32 %v711_v35, %v4168_v57  ;;  %v734_v35 = vsub.f32 %v718_v9, %v4204_v8 }
  0xbf   :  { %v4233_v15 = vadd.f32 %v676_v18, %v6012_v25  ;;  %v4236_v6 = vadd.f32 %v677_v12, %v6014_v49  ;;  %v709_v16 = vld [vmem:[#allocation8 + $0x170] sm:$0xff]  ;;  %v710_v40 = vld [vmem:[#allocation8 + $0x178] sm:$0xff]  ;;  %v723_v22 = vld [vmem:[#allocation3 + $0x160] sm:$0xff]  ;;  %v729_v18 = vsub.f32 %v713_v61, %v4172_v53  ;;  %v733_v25 = vsub.f32 %v717_v58, %v4202_v48 }
  0xc0   :  { %6011 = vst [vmem:[#allocation21_spill] sm:$0xff] %v4230_v42  ;;  %v722_v28 = vld [vmem:[#allocation3 + $0x158] sm:$0xff]  ;;  %v724_v44 = vld [vmem:[#allocation3 + $0x168] sm:$0xff]  ;;  %v6016_v30 = vld [vmem:[#allocation40_spill] sm:$0xff]  ;;  %v736_v61 = vsub.f32 %v720_v34, %v4208_v47 }
  0xc1   :  { %6013 = vst [vmem:[#allocation22_spill] sm:$0xff] %v4233_v15  ;;  %6015 = vst [vmem:[#allocation30_spill] sm:$0xff] %v4236_v6  ;;  %v4239_v29 = vadd.f32 %v678_v5, %v6016_v30  ;;  %v725_v7 = vld [vmem:[#allocation3 + $0x170] sm:$0xff]  ;;  %v726_v17 = vld [vmem:[#allocation3 + $0x178] sm:$0xff]  ;;  %v738_v26 = vsub.f32 %v722_v28, %v4224_v20  ;;  %v740_v42 = vsub.f32 %v724_v44, %v708_v36 }
  0xc2   :  { %v743_v2 = vld [vmem:[#allocation6 + $0x100] sm:$0xff]  ;;  %v744_v10 = vld [vmem:[#allocation6 + $0x108] sm:$0xff]  ;;  %v745_v5 = vld [vmem:[#allocation6 + $0x110] sm:$0xff]  ;;  %v741_v9 = vsub.f32 %v725_v7, %v709_v16  ;;  %v742_v50 = vsub.f32 %v726_v17, %v710_v40 }
  0xc3   :  { %6017 = vst [vmem:[#allocation26_spill] sm:$0xff] %v4239_v29  ;;  %v6018_v12 = vld [vmem:[#allocation28_spill] sm:$0xff]  ;;  %v746_v51 = vld [vmem:[#allocation6 + $0x118] sm:$0xff]  ;;  %v748_v30 = vld [vmem:[#allocation6 + $0x128] sm:$0xff]  ;;  %v739_v29 = vsub.f32 %v723_v22, %v4226_v45  ;;  %v759_v56 = vsub.f32 %v743_v2, %v4168_v57  ;;  %v760_v63 = vsub.f32 %v744_v10, %v4170_v0  ;;  %v761_v28 = vsub.f32 %v745_v5, %v4172_v53 }
  0xc4   :  { %v405_v32 = vadd.f32 %v6018_v12, %v403_v4  ;;  %v747_v49 = vld [vmem:[#allocation6 + $0x120] sm:$0xff]  ;;  %v749_v4 = vld [vmem:[#allocation6 + $0x130] sm:$0xff]  ;;  %v6019_v12 = vld [vmem:[#allocation29_spill] sm:$0xff]  ;;  %v762_v22 = vsub.f32 %v746_v51, %v4186_v31  ;;  %v764_v44 = vsub.f32 %v748_v30, %v4190_v33  ;;  %v776_v51 = vmul.f32 %v728_v13, %v728_v13 }
  0xc5   :  { %v750_v6 = vld [vmem:[#allocation6 + $0x138] sm:$0xff]  ;;  %v751_v15 = vld [vmem:[#allocation6 + $0x140] sm:$0xff]  ;;  %v752_v58 = vld [vmem:[#allocation6 + $0x148] sm:$0xff]  ;;  %v763_v14 = vsub.f32 %v747_v49, %v4188_v1  ;;  %v765_v7 = vsub.f32 %v749_v4, %v4202_v48  ;;  %v775_v1 = vmul.f32 %v727_v46, %v727_v46  ;;  %v777_v33 = vmul.f32 %v729_v18, %v729_v18 }
  0xc6   :  { %v407_v43 = vadd.f32 %v6019_v12, %v405_v32  ;;  %v753_v39 = vld [vmem:[#allocation6 + $0x150] sm:$0xff]  ;;  %v754_v37 = vld [vmem:[#allocation6 + $0x158] sm:$0xff]  ;;  %v755_v34 = vld [vmem:[#allocation6 + $0x160] sm:$0xff]  ;;  %v766_v17 = vsub.f32 %v750_v6, %v4204_v8  ;;  %v767_v57 = vsub.f32 %v751_v15, %v4206_v23  ;;  %v768_v2 = vsub.f32 %v752_v58, %v4208_v47 }
  0xc7   :  { %v756_v27 = vld [vmem:[#allocation6 + $0x168] sm:$0xff]  ;;  %v757_v32 = vld [vmem:[#allocation6 + $0x170] sm:$0xff]  ;;  %v758_v12 = vld [vmem:[#allocation6 + $0x178] sm:$0xff]  ;;  %v770_v0 = vsub.f32 %v754_v37, %v4224_v20  ;;  %v771_v53 = vsub.f32 %v755_v34, %v4226_v45  ;;  %v778_v49 = vmul.f32 %v730_v21, %v730_v21  ;;  %v779_v48 = vmul.f32 %v731_v55, %v731_v55 }
  0xc8   :  { %408 = vadd.xlane.f32.xlu0 %v407_v43  ;;  %v769_v43 = vsub.f32 %v753_v39, %v4222_v19  ;;  %v772_v10 = vsub.f32 %v756_v27, %v708_v36  ;;  %v773_v31 = vsub.f32 %v757_v32, %v709_v16  ;;  %v774_v5 = vsub.f32 %v758_v12, %v710_v40 }
  0xc9   :  { %v780_v30 = vmul.f32 %v732_v24, %v732_v24  ;;  %v781_v8 = vmul.f32 %v733_v25, %v733_v25  ;;  %v782_v6 = vmul.f32 %v734_v35, %v734_v35  ;;  %v783_v23 = vmul.f32 %v735_v3, %v735_v3 }
  0xca   :  { %v784_v15 = vmul.f32 %v736_v61, %v736_v61  ;;  %v785_v47 = vmul.f32 %v737_v41, %v737_v41  ;;  %v786_v4 = vmul.f32 %v738_v26, %v738_v26  ;;  %v787_v19 = vmul.f32 %v739_v29, %v739_v29 }
  0xcb   :  { %v788_v58 = vmul.f32 %v740_v42, %v740_v42  ;;  %v789_v37 = vmul.f32 %v741_v9, %v741_v9  ;;  %v790_v20 = vmul.f32 %v742_v50, %v742_v50  ;;  %v791_v45 = vmul.f32 %v759_v56, %v759_v56 }
  0xcc   :  { %v792_v27 = vmul.f32 %v760_v63, %v760_v63  ;;  %v793_v36 = vmul.f32 %v761_v28, %v761_v28  ;;  %v794_v16 = vmul.f32 %v762_v22, %v762_v22  ;;  %v795_v40 = vmul.f32 %v763_v14, %v763_v14  ;;  %v4269_v22 = vld [vmem:[#allocation8 + $0x180] sm:$0xff] }
  0xcd   :  { %v796_v46 = vmul.f32 %v764_v44, %v764_v44  ;;  %v797_v13 = vmul.f32 %v765_v7, %v765_v7  ;;  %v798_v18 = vmul.f32 %v766_v17, %v766_v17  ;;  %v799_v21 = vmul.f32 %v767_v57, %v767_v57  ;;  %v855_v44 = vld [vmem:[#allocation3 + $0x180] sm:$0xff] }
  0xce   :  { %v800_v55 = vmul.f32 %v768_v2, %v768_v2  ;;  %v801_v24 = vmul.f32 %v769_v43, %v769_v43  ;;  %v802_v25 = vmul.f32 %v770_v0, %v770_v0  ;;  %v803_v35 = vmul.f32 %v771_v53, %v771_v53  ;;  %v4274_v43 = vld [vmem:[#allocation8 + $0x188] sm:$0xff]  ;;  %v4276_v0 = vld [vmem:[#allocation8 + $0x190] sm:$0xff]  ;;  %v4278_v53 = vld [vmem:[#allocation8 + $0x198] sm:$0xff] }
  0xcf   :  { %v804_v3 = vmul.f32 %v772_v10, %v772_v10  ;;  %v805_v61 = vmul.f32 %v773_v31, %v773_v31  ;;  %v806_v41 = vmul.f32 %v774_v5, %v774_v5  ;;  %v807_v29 = vadd.f32 %v791_v45, %v775_v1  ;;  %v4280_v10 = vld [vmem:[#allocation8 + $0x1a0] sm:$0xff]  ;;  %v856_v31 = vld [vmem:[#allocation3 + $0x188] sm:$0xff]  ;;  %v857_v5 = vld [vmem:[#allocation3 + $0x190] sm:$0xff] }
  0xd0   :  { %v808_v42 = vadd.f32 %v792_v27, %v776_v51  ;;  %v809_v26 = vadd.f32 %v793_v36, %v777_v33  ;;  %v810_v50 = vadd.f32 %v794_v16, %v778_v49  ;;  %v811_v56 = vadd.f32 %v795_v40, %v779_v48  ;;  %v858_v1 = vld [vmem:[#allocation3 + $0x198] sm:$0xff]  ;;  %v859_v51 = vld [vmem:[#allocation3 + $0x1a0] sm:$0xff]  ;;  %v865_v16 = vld [vmem:[#allocation3 + $0x1d0] sm:$0xff] }
  0xd1   :  { %v812_v9 = vadd.f32 %v796_v46, %v780_v30  ;;  %v813_v39 = vadd.f32 %v797_v13, %v781_v8  ;;  %v814_v34 = vadd.f32 %v798_v18, %v782_v6  ;;  %v815_v14 = vadd.f32 %v799_v21, %v783_v23  ;;  %v4294_v30 = vld [vmem:[#allocation8 + $0x1a8] sm:$0xff]  ;;  %v4296_v8 = vld [vmem:[#allocation8 + $0x1b0] sm:$0xff]  ;;  %v4298_v6 = vld [vmem:[#allocation8 + $0x1b8] sm:$0xff] }
  0xd2   :  { %v816_v32 = vadd.f32 %v800_v55, %v784_v15  ;;  %v817_v12 = vadd.f32 %v801_v24, %v785_v47  ;;  %v818_v63 = vadd.f32 %v802_v25, %v786_v4  ;;  %v819_v28 = vadd.f32 %v803_v35, %v787_v19  ;;  %v4300_v23 = vld [vmem:[#allocation8 + $0x1c0] sm:$0xff]  ;;  %v860_v15 = vld [vmem:[#allocation3 + $0x1a8] sm:$0xff]  ;;  %v862_v47 = vld [vmem:[#allocation3 + $0x1b8] sm:$0xff] }
  0xd3   :  { %v820_v7 = vadd.f32 %v804_v3, %v788_v58  ;;  %v821_v17 = vadd.f32 %v805_v61, %v789_v37  ;;  %v822_v57 = vadd.f32 %v806_v41, %v790_v20  ;;  %v4272_v2 = vadd.f32 %v807_v29, %v4166_v59  ;;  %v6020_v4 = vld [vmem:[#allocation18_spill] sm:$0xff]  ;;  %v6022_v19 = vld [vmem:[#allocation24_spill] sm:$0xff]  ;;  %v4314_v37 = vld [vmem:[#allocation8 + $0x1c8] sm:$0xff] }
  0xd4   :  { %v4283_v33 = vadd.f32 %v808_v42, %v4175_v62  ;;  %v4286_v49 = vadd.f32 %v809_v26, %v4178_v54  ;;  %v4289_v59 = vadd.f32 %v810_v50, %v4181_v60  ;;  %v4292_v48 = vadd.f32 %v811_v56, %v4184_v38  ;;  %v861_v62 = vld [vmem:[#allocation3 + $0x1b0] sm:$0xff]  ;;  %v4318_v45 = vld [vmem:[#allocation8 + $0x1d8] sm:$0xff]  ;;  %v4320_v27 = vld [vmem:[#allocation8 + $0x1e0] sm:$0xff] }
  0xd5   :  { %v4303_v54 = vadd.f32 %v812_v9, %v4194_v11  ;;  %v4306_v60 = vadd.f32 %v813_v39, %v4197_v52  ;;  %v4309_v38 = vadd.f32 %v814_v34, %v6020_v4  ;;  %v4312_v58 = vadd.f32 %v815_v14, %v6022_v19  ;;  %v4316_v20 = vld [vmem:[#allocation8 + $0x1d0] sm:$0xff]  ;;  %v863_v36 = vld [vmem:[#allocation3 + $0x1c0] sm:$0xff]  ;;  %v864_v11 = vld [vmem:[#allocation3 + $0x1c8] sm:$0xff] }
  0xd6   :  { %v6024_v40 = vld [vmem:[#allocation25_spill] sm:$0xff]  ;;  %v6026_v46 = vld [vmem:[#allocation19_spill] sm:$0xff]  ;;  %v6028_v18 = vld [vmem:[#allocation20_spill] sm:$0xff]  ;;  %v874_v4 = vsub.f32 %v858_v1, %v4278_v53  ;;  %v881_v1 = vsub.f32 %v865_v16, %v4316_v20 }
  0xd7   :  { %6021 = vst [vmem:[#allocation23_spill] sm:$0xff] %v4309_v38  ;;  %6023 = vst [vmem:[#allocation31_spill] sm:$0xff] %v4312_v58  ;;  %v4323_v52 = vadd.f32 %v816_v32, %v6024_v40  ;;  %v4326_v13 = vadd.f32 %v817_v12, %v6026_v46  ;;  %v4329_v21 = vadd.f32 %v818_v63, %v6028_v18  ;;  %v6030_v55 = vld [vmem:[#allocation21_spill] sm:$0xff]  ;;  %v853_v35 = vld [vmem:[#allocation8 + $0x1f0] sm:$0xff] }
  0xd8   :  { %v4332_v24 = vadd.f32 %v819_v28, %v6030_v55  ;;  %v852_v25 = vld [vmem:[#allocation8 + $0x1e8] sm:$0xff]  ;;  %v854_v3 = vld [vmem:[#allocation8 + $0x1f8] sm:$0xff]  ;;  %v867_v41 = vld [vmem:[#allocation3 + $0x1e0] sm:$0xff]  ;;  %v871_v32 = vsub.f32 %v855_v44, %v4269_v22  ;;  %v872_v63 = vsub.f32 %v856_v31, %v4274_v43  ;;  %v873_v28 = vsub.f32 %v857_v5, %v4276_v0 }
  0xd9   :  { %6025 = vst [vmem:[#allocation32_spill] sm:$0xff] %v4323_v52  ;;  %6027 = vst [vmem:[#allocation33_spill] sm:$0xff] %v4326_v13  ;;  %v866_v61 = vld [vmem:[#allocation3 + $0x1d8] sm:$0xff]  ;;  %v868_v29 = vld [vmem:[#allocation3 + $0x1e8] sm:$0xff]  ;;  %v876_v46 = vsub.f32 %v860_v15, %v4294_v30  ;;  %v878_v18 = vsub.f32 %v862_v47, %v4298_v6  ;;  %v879_v44 = vsub.f32 %v863_v36, %v4300_v23 }
  0xda   :  { %6029 = vst [vmem:[#allocation34_spill] sm:$0xff] %v4329_v21  ;;  %6031 = vst [vmem:[#allocation35_spill] sm:$0xff] %v4332_v24  ;;  %v6032_v42 = vld [vmem:[#allocation22_spill] sm:$0xff]  ;;  %v870_v14 = vld [vmem:[#allocation3 + $0x1f8] sm:$0xff]  ;;  %v880_v5 = vsub.f32 %v864_v11, %v4314_v37 }
  0xdb   :  { %v4335_v26 = vadd.f32 %v820_v7, %v6032_v42  ;;  %v6034_v50 = vld [vmem:[#allocation30_spill] sm:$0xff]  ;;  %v887_v12 = vld [vmem:[#allocation6 + $0x180] sm:$0xff]  ;;  %v875_v7 = vsub.f32 %v859_v51, %v4280_v10  ;;  %v888_v19 = vld [vmem:[#allocation6 + $0x188] sm:$0xff]  ;;  %v882_v51 = vsub.f32 %v866_v61, %v4318_v45 }
  0xdc   :  { %v4338_v56 = vadd.f32 %v821_v17, %v6034_v50  ;;  %v6036_v9 = vld [vmem:[#allocation26_spill] sm:$0xff]  ;;  %v890_v17 = vld [vmem:[#allocation6 + $0x198] sm:$0xff]  ;;  %v891_v55 = vld [vmem:[#allocation6 + $0x1a0] sm:$0xff]  ;;  %v883_v50 = vsub.f32 %v867_v41, %v4320_v27  ;;  %v903_v21 = vsub.f32 %v887_v12, %v4269_v22  ;;  %v904_v16 = vsub.f32 %v888_v19, %v4274_v43 }
  0xdd   :  { %6033 = vst [vmem:[#allocation36_spill] sm:$0xff] %v4335_v26  ;;  %v4341_v39 = vadd.f32 %v822_v57, %v6036_v9  ;;  %v869_v34 = vld [vmem:[#allocation3 + $0x1f0] sm:$0xff]  ;;  %v877_v57 = vsub.f32 %v861_v62, %v4296_v8  ;;  %v892_v42 = vld [vmem:[#allocation6 + $0x1a8] sm:$0xff]  ;;  %v894_v9 = vld [vmem:[#allocation6 + $0x1b8] sm:$0xff]  ;;  %v886_v26 = vsub.f32 %v870_v14, %v854_v3  ;;  %v906_v41 = vsub.f32 %v890_v17, %v4278_v53 }
  0xde   :  { %6035 = vst [vmem:[#allocation27_spill] sm:$0xff] %v4338_v56  ;;  %v889_v40 = vld [vmem:[#allocation6 + $0x190] sm:$0xff]  ;;  %v896_v15 = vld [vmem:[#allocation6 + $0x1c8] sm:$0xff]  ;;  %v884_v56 = vsub.f32 %v868_v29, %v852_v25  ;;  %v885_v62 = vsub.f32 %v869_v34, %v853_v35  ;;  %v898_v24 = vld [vmem:[#allocation6 + $0x1d8] sm:$0xff]  ;;  %v907_v58 = vsub.f32 %v891_v55, %v4280_v10  ;;  %v908_v29 = vsub.f32 %v892_v42, %v4294_v30 }
  0xdf   :  { %6037 = vst [vmem:[#allocation37_spill] sm:$0xff] %v4341_v39  ;;  %v893_v31 = vld [vmem:[#allocation6 + $0x1b0] sm:$0xff]  ;;  %v895_v39 = vld [vmem:[#allocation6 + $0x1c0] sm:$0xff]  ;;  %v900_v13 = vld [vmem:[#allocation6 + $0x1e8] sm:$0xff]  ;;  %v905_v61 = vsub.f32 %v889_v40, %v4276_v0  ;;  %v910_v14 = vsub.f32 %v894_v9, %v4298_v6  ;;  %v912_v22 = vsub.f32 %v896_v15, %v4314_v37  ;;  %v914_v43 = vsub.f32 %v898_v24, %v4318_v45 }
  0xe0   :  { %v897_v47 = vld [vmem:[#allocation6 + $0x1d0] sm:$0xff]  ;;  %v899_v36 = vld [vmem:[#allocation6 + $0x1e0] sm:$0xff]  ;;  %v902_v11 = vld [vmem:[#allocation6 + $0x1f8] sm:$0xff]  ;;  %v909_v34 = vsub.f32 %v893_v31, %v4296_v8  ;;  %v911_v38 = vsub.f32 %v895_v39, %v4300_v23  ;;  %v916_v19 = vsub.f32 %v900_v13, %v852_v25  ;;  %v919_v10 = vmul.f32 %v871_v32, %v871_v32 }
  0xe1   :  { %v901_v52 = vld [vmem:[#allocation6 + $0x1f0] sm:$0xff]  ;;  %v913_v12 = vsub.f32 %v897_v47, %v4316_v20  ;;  %v915_v0 = vsub.f32 %v899_v36, %v4320_v27  ;;  %v918_v40 = vsub.f32 %v902_v11, %v854_v3  ;;  %v920_v17 = vmul.f32 %v872_v63, %v872_v63 }
  0xe2   :  { %v917_v53 = vsub.f32 %v901_v52, %v853_v35  ;;  %v921_v30 = vmul.f32 %v873_v28, %v873_v28  ;;  %v922_v55 = vmul.f32 %v874_v4, %v874_v4  ;;  %v923_v8 = vmul.f32 %v875_v7, %v875_v7 }
  0xe3   :  { %v924_v42 = vmul.f32 %v876_v46, %v876_v46  ;;  %v925_v6 = vmul.f32 %v877_v57, %v877_v57  ;;  %v926_v31 = vmul.f32 %v878_v18, %v878_v18  ;;  %v927_v23 = vmul.f32 %v879_v44, %v879_v44 }
  0xe4   :  { %v928_v39 = vmul.f32 %v880_v5, %v880_v5  ;;  %v929_v37 = vmul.f32 %v881_v1, %v881_v1  ;;  %v930_v9 = vmul.f32 %v882_v51, %v882_v51  ;;  %v931_v20 = vmul.f32 %v883_v50, %v883_v50 }
  0xe5   :  { %v932_v15 = vmul.f32 %v884_v56, %v884_v56  ;;  %v933_v45 = vmul.f32 %v885_v62, %v885_v62  ;;  %v934_v24 = vmul.f32 %v886_v26, %v886_v26  ;;  %v935_v27 = vmul.f32 %v903_v21, %v903_v21 }
  0xe6   :  { %v936_v13 = vmul.f32 %v904_v16, %v904_v16  ;;  %v937_v52 = vmul.f32 %v905_v61, %v905_v61  ;;  %v938_v25 = vmul.f32 %v906_v41, %v906_v41  ;;  %v939_v35 = vmul.f32 %v907_v58, %v907_v58  ;;  %v4369_v61 = vld [vmem:[#allocation8 + $0x200] sm:$0xff] }
  0xe7   :  { %v940_v3 = vmul.f32 %v908_v29, %v908_v29  ;;  %v941_v32 = vmul.f32 %v909_v34, %v909_v34  ;;  %v942_v63 = vmul.f32 %v910_v14, %v910_v14  ;;  %v943_v28 = vmul.f32 %v911_v38, %v911_v38  ;;  %v999_v41 = vld [vmem:[#allocation3 + $0x200] sm:$0xff] }
  0xe8   :  { %v944_v4 = vmul.f32 %v912_v22, %v912_v22  ;;  %v945_v7 = vmul.f32 %v913_v12, %v913_v12  ;;  %v946_v46 = vmul.f32 %v914_v43, %v914_v43  ;;  %v947_v57 = vmul.f32 %v915_v0, %v915_v0  ;;  %v4374_v12 = vld [vmem:[#allocation8 + $0x208] sm:$0xff]  ;;  %v4376_v43 = vld [vmem:[#allocation8 + $0x210] sm:$0xff]  ;;  %v4378_v0 = vld [vmem:[#allocation8 + $0x218] sm:$0xff] }
  0xe9   :  { %v948_v18 = vmul.f32 %v916_v19, %v916_v19  ;;  %v949_v44 = vmul.f32 %v917_v53, %v917_v53  ;;  %v950_v5 = vmul.f32 %v918_v40, %v918_v40  ;;  %v951_v1 = vadd.f32 %v935_v27, %v919_v10  ;;  %v4380_v19 = vld [vmem:[#allocation8 + $0x220] sm:$0xff]  ;;  %v1000_v53 = vld [vmem:[#allocation3 + $0x208] sm:$0xff]  ;;  %v1001_v40 = vld [vmem:[#allocation3 + $0x210] sm:$0xff] }
  0xea   :  { %v952_v56 = vadd.f32 %v936_v13, %v920_v17  ;;  %v953_v51 = vadd.f32 %v937_v52, %v921_v30  ;;  %v954_v26 = vadd.f32 %v938_v25, %v922_v55  ;;  %v955_v21 = vadd.f32 %v939_v35, %v923_v8  ;;  %v1002_v10 = vld [vmem:[#allocation3 + $0x218] sm:$0xff]  ;;  %v1003_v17 = vld [vmem:[#allocation3 + $0x220] sm:$0xff]  ;;  %v1009_v25 = vld [vmem:[#allocation3 + $0x250] sm:$0xff] }
  0xeb   :  { %v956_v50 = vadd.f32 %v940_v3, %v924_v42  ;;  %v957_v62 = vadd.f32 %v941_v32, %v925_v6  ;;  %v958_v47 = vadd.f32 %v942_v63, %v926_v31  ;;  %v959_v58 = vadd.f32 %v943_v28, %v927_v23  ;;  %v4394_v42 = vld [vmem:[#allocation8 + $0x228] sm:$0xff]  ;;  %v4396_v6 = vld [vmem:[#allocation8 + $0x230] sm:$0xff]  ;;  %v4398_v31 = vld [vmem:[#allocation8 + $0x238] sm:$0xff] }
  0xec   :  { %v960_v36 = vadd.f32 %v944_v4, %v928_v39  ;;  %v961_v11 = vadd.f32 %v945_v7, %v929_v37  ;;  %v962_v16 = vadd.f32 %v946_v46, %v930_v9  ;;  %v963_v38 = vadd.f32 %v947_v57, %v931_v20  ;;  %v4400_v23 = vld [vmem:[#allocation8 + $0x240] sm:$0xff]  ;;  %v1004_v39 = vld [vmem:[#allocation3 + $0x228] sm:$0xff]  ;;  %v1006_v37 = vld [vmem:[#allocation3 + $0x238] sm:$0xff] }
  0xed   :  { %v964_v29 = vadd.f32 %v948_v18, %v932_v15  ;;  %v965_v34 = vadd.f32 %v949_v44, %v933_v45  ;;  %v966_v14 = vadd.f32 %v950_v5, %v934_v24  ;;  %v4372_v22 = vadd.f32 %v951_v1, %v4272_v2  ;;  %v6038_v9 = vld [vmem:[#allocation23_spill] sm:$0xff]  ;;  %v4414_v45 = vld [vmem:[#allocation8 + $0x248] sm:$0xff]  ;;  %v4416_v24 = vld [vmem:[#allocation8 + $0x250] sm:$0xff] }
  0xee   :  { %v4383_v30 = vadd.f32 %v952_v56, %v4283_v33  ;;  %v4386_v55 = vadd.f32 %v953_v51, %v4286_v49  ;;  %v4389_v2 = vadd.f32 %v954_v26, %v4289_v59  ;;  %v4392_v8 = vadd.f32 %v955_v21, %v4292_v48  ;;  %v1005_v33 = vld [vmem:[#allocation3 + $0x230] sm:$0xff]  ;;  %v6040_v20 = vld [vmem:[#allocation31_spill] sm:$0xff]  ;;  %v4420_v13 = vld [vmem:[#allocation8 + $0x260] sm:$0xff] }
  0xef   :  { %v4403_v49 = vadd.f32 %v956_v50, %v4303_v54  ;;  %v4406_v59 = vadd.f32 %v957_v62, %v4306_v60  ;;  %v4409_v48 = vadd.f32 %v958_v47, %v6038_v9  ;;  %v4412_v15 = vadd.f32 %v959_v58, %v6040_v20  ;;  %v4418_v27 = vld [vmem:[#allocation8 + $0x258] sm:$0xff]  ;;  %v1007_v52 = vld [vmem:[#allocation3 + $0x240] sm:$0xff]  ;;  %v1008_v54 = vld [vmem:[#allocation3 + $0x248] sm:$0xff] }
  0xf0   :  { %v6042_v35 = vld [vmem:[#allocation32_spill] sm:$0xff]  ;;  %v6044_v3 = vld [vmem:[#allocation33_spill] sm:$0xff]  ;;  %v6046_v63 = vld [vmem:[#allocation34_spill] sm:$0xff]  ;;  %v1018_v9 = vsub.f32 %v1002_v10, %v4378_v0  ;;  %v1025_v10 = vsub.f32 %v1009_v25, %v4416_v24 }
  0xf1   :  { %6039 = vst [vmem:[#allocation38_spill] sm:$0xff] %v4409_v48  ;;  %6041 = vst [vmem:[#allocation39_spill] sm:$0xff] %v4412_v15  ;;  %v4423_v60 = vadd.f32 %v960_v36, %v6042_v35  ;;  %v4426_v32 = vadd.f32 %v961_v11, %v6044_v3  ;;  %v4429_v28 = vadd.f32 %v962_v16, %v6046_v63  ;;  %v6048_v4 = vld [vmem:[#allocation35_spill] sm:$0xff]  ;;  %v996_v46 = vld [vmem:[#allocation8 + $0x268] sm:$0xff] }
  0xf2   :  { %v4432_v7 = vadd.f32 %v963_v38, %v6048_v4  ;;  %v997_v57 = vld [vmem:[#allocation8 + $0x270] sm:$0xff]  ;;  %v998_v18 = vld [vmem:[#allocation8 + $0x278] sm:$0xff]  ;;  %v1011_v5 = vld [vmem:[#allocation3 + $0x260] sm:$0xff]  ;;  %v1015_v36 = vsub.f32 %v999_v41, %v4369_v61  ;;  %v1016_v16 = vsub.f32 %v1000_v53, %v4374_v12  ;;  %v1017_v38 = vsub.f32 %v1001_v40, %v4376_v43 }
  0xf3   :  { %6043 = vst [vmem:[#allocation40_spill] sm:$0xff] %v4423_v60  ;;  %6045 = vst [vmem:[#allocation28_spill] sm:$0xff] %v4426_v32  ;;  %v1010_v44 = vld [vmem:[#allocation3 + $0x258] sm:$0xff]  ;;  %v1012_v1 = vld [vmem:[#allocation3 + $0x268] sm:$0xff]  ;;  %v1020_v3 = vsub.f32 %v1004_v39, %v4394_v42  ;;  %v1022_v63 = vsub.f32 %v1006_v37, %v4398_v31  ;;  %v1023_v41 = vsub.f32 %v1007_v52, %v4400_v23 }
  0xf4   :  { %6047 = vst [vmem:[#allocation29_spill] sm:$0xff] %v4429_v28  ;;  %6049 = vst [vmem:[#allocation18_spill] sm:$0xff] %v4432_v7  ;;  %v6050_v56 = vld [vmem:[#allocation36_spill] sm:$0xff]  ;;  %v6052_v26 = vld [vmem:[#allocation27_spill] sm:$0xff]  ;;  %v1024_v40 = vsub.f32 %v1008_v54, %v4414_v45 }
  0xf5   :  { %v4435_v51 = vadd.f32 %v964_v29, %v6050_v56  ;;  %v4438_v21 = vadd.f32 %v965_v34, %v6052_v26  ;;  %v6054_v50 = vld [vmem:[#allocation37_spill] sm:$0xff]  ;;  %v1013_v47 = vld [vmem:[#allocation3 + $0x270] sm:$0xff]  ;;  %v1014_v58 = vld [vmem:[#allocation3 + $0x278] sm:$0xff]  ;;  %v1019_v29 = vsub.f32 %v1003_v17, %v4380_v19  ;;  %v1026_v17 = vsub.f32 %v1010_v44, %v4418_v27 }
  0xf6   :  { %v4441_v62 = vadd.f32 %v966_v14, %v6054_v50  ;;  %v1031_v11 = vld [vmem:[#allocation6 + $0x200] sm:$0xff]  ;;  %v1032_v20 = vld [vmem:[#allocation6 + $0x208] sm:$0xff]  ;;  %v1033_v35 = vld [vmem:[#allocation6 + $0x210] sm:$0xff]  ;;  %v1021_v14 = vsub.f32 %v1005_v33, %v4396_v6  ;;  %v1027_v26 = vsub.f32 %v1011_v5, %v4420_v13  ;;  %v1029_v33 = vsub.f32 %v1013_v47, %v997_v57 }
  0xf7   :  { %6051 = vst [vmem:[#allocation24_spill] sm:$0xff] %v4435_v51  ;;  %6053 = vst [vmem:[#allocation25_spill] sm:$0xff] %v4438_v21  ;;  %v1034_v34 = vld [vmem:[#allocation6 + $0x218] sm:$0xff]  ;;  %v1035_v4 = vld [vmem:[#allocation6 + $0x220] sm:$0xff]  ;;  %v1028_v21 = vsub.f32 %v1012_v1, %v996_v46  ;;  %v1030_v51 = vsub.f32 %v1014_v58, %v998_v18  ;;  %v1047_v28 = vsub.f32 %v1031_v11, %v4369_v61 }
  0xf8   :  { %6055 = vst [vmem:[#allocation19_spill] sm:$0xff] %v4441_v62  ;;  %v1036_v56 = vld [vmem:[#allocation6 + $0x228] sm:$0xff]  ;;  %v1037_v53 = vld [vmem:[#allocation6 + $0x230] sm:$0xff]  ;;  %v1038_v50 = vld [vmem:[#allocation6 + $0x238] sm:$0xff]  ;;  %v1048_v25 = vsub.f32 %v1032_v20, %v4374_v12  ;;  %v1049_v44 = vsub.f32 %v1033_v35, %v4376_v43  ;;  %v1050_v5 = vsub.f32 %v1034_v34, %v4378_v0  ;;  %v1051_v15 = vsub.f32 %v1035_v4, %v4380_v19 }
  0xf9   :  { %v1039_v62 = vld [vmem:[#allocation6 + $0x240] sm:$0xff]  ;;  %v1040_v39 = vld [vmem:[#allocation6 + $0x248] sm:$0xff]  ;;  %v1041_v37 = vld [vmem:[#allocation6 + $0x250] sm:$0xff]  ;;  %v1052_v1 = vsub.f32 %v1036_v56, %v4394_v42  ;;  %v1053_v47 = vsub.f32 %v1037_v53, %v4396_v6  ;;  %v1054_v58 = vsub.f32 %v1038_v50, %v4398_v31  ;;  %v1063_v19 = vmul.f32 %v1015_v36, %v1015_v36 }
  0xfa   :  { %v1042_v7 = vld [vmem:[#allocation6 + $0x258] sm:$0xff]  ;;  %v1043_v52 = vld [vmem:[#allocation6 + $0x260] sm:$0xff]  ;;  %v1044_v32 = vld [vmem:[#allocation6 + $0x268] sm:$0xff]  ;;  %v1055_v48 = vsub.f32 %v1039_v62, %v4400_v23  ;;  %v1056_v61 = vsub.f32 %v1040_v39, %v4414_v45  ;;  %v1057_v11 = vsub.f32 %v1041_v37, %v4416_v24  ;;  %v1064_v34 = vmul.f32 %v1016_v16, %v1016_v16 }
  0xfb   :  { %v1045_v60 = vld [vmem:[#allocation6 + $0x270] sm:$0xff]  ;;  %v1046_v54 = vld [vmem:[#allocation6 + $0x278] sm:$0xff]  ;;  %v1058_v12 = vsub.f32 %v1042_v7, %v4418_v27  ;;  %v1059_v43 = vsub.f32 %v1043_v52, %v4420_v13  ;;  %v1060_v20 = vsub.f32 %v1044_v32, %v996_v46  ;;  %v1065_v42 = vmul.f32 %v1017_v38, %v1017_v38 }
  0xfc   :  { %v1061_v0 = vsub.f32 %v1045_v60, %v997_v57  ;;  %v1062_v35 = vsub.f32 %v1046_v54, %v998_v18  ;;  %v1066_v4 = vmul.f32 %v1018_v9, %v1018_v9  ;;  %v1067_v6 = vmul.f32 %v1019_v29, %v1019_v29 }
  0xfd   :  { %v1068_v56 = vmul.f32 %v1020_v3, %v1020_v3  ;;  %v1069_v31 = vmul.f32 %v1021_v14, %v1021_v14  ;;  %v1070_v53 = vmul.f32 %v1022_v63, %v1022_v63  ;;  %v1071_v23 = vmul.f32 %v1023_v41, %v1023_v41 }
  0xfe   :  { %v1072_v62 = vmul.f32 %v1024_v40, %v1024_v40  ;;  %v1073_v45 = vmul.f32 %v1025_v10, %v1025_v10  ;;  %v1074_v50 = vmul.f32 %v1026_v17, %v1026_v17  ;;  %v1075_v24 = vmul.f32 %v1027_v26, %v1027_v26 }
  0xff   :  { %v1076_v39 = vmul.f32 %v1028_v21, %v1028_v21  ;;  %v1077_v27 = vmul.f32 %v1029_v33, %v1029_v33  ;;  %v1078_v7 = vmul.f32 %v1030_v51, %v1030_v51  ;;  %v1079_v13 = vmul.f32 %v1047_v28, %v1047_v28 }
 0x100   :  { %v1080_v32 = vmul.f32 %v1048_v25, %v1048_v25  ;;  %v1081_v60 = vmul.f32 %v1049_v44, %v1049_v44  ;;  %v1082_v46 = vmul.f32 %v1050_v5, %v1050_v5  ;;  %v1083_v57 = vmul.f32 %v1051_v15, %v1051_v15  ;;  %v4469_v44 = vld [vmem:[#allocation8 + $0x280] sm:$0xff] }
 0x101   :  { %v1084_v18 = vmul.f32 %v1052_v1, %v1052_v1  ;;  %v1085_v36 = vmul.f32 %v1053_v47, %v1053_v47  ;;  %v1086_v16 = vmul.f32 %v1054_v58, %v1054_v58  ;;  %v1087_v38 = vmul.f32 %v1055_v48, %v1055_v48  ;;  %v1143_v5 = vld [vmem:[#allocation3 + $0x280] sm:$0xff] }
 0x102   :  { %v1088_v9 = vmul.f32 %v1056_v61, %v1056_v61  ;;  %v1089_v29 = vmul.f32 %v1057_v11, %v1057_v11  ;;  %v1090_v3 = vmul.f32 %v1058_v12, %v1058_v12  ;;  %v1091_v14 = vmul.f32 %v1059_v43, %v1059_v43  ;;  %v4474_v11 = vld [vmem:[#allocation8 + $0x288] sm:$0xff]  ;;  %v4476_v12 = vld [vmem:[#allocation8 + $0x290] sm:$0xff]  ;;  %v4478_v43 = vld [vmem:[#allocation8 + $0x298] sm:$0xff] }
 0x103   :  { %v1092_v63 = vmul.f32 %v1060_v20, %v1060_v20  ;;  %v1093_v41 = vmul.f32 %v1061_v0, %v1061_v0  ;;  %v1094_v40 = vmul.f32 %v1062_v35, %v1062_v35  ;;  %v1095_v10 = vadd.f32 %v1079_v13, %v1063_v19  ;;  %v4480_v20 = vld [vmem:[#allocation8 + $0x2a0] sm:$0xff]  ;;  %v1144_v0 = vld [vmem:[#allocation3 + $0x288] sm:$0xff]  ;;  %v1145_v35 = vld [vmem:[#allocation3 + $0x290] sm:$0xff] }
 0x104   :  { %v1096_v21 = vadd.f32 %v1080_v32, %v1064_v34  ;;  %v1097_v17 = vadd.f32 %v1081_v60, %v1065_v42  ;;  %v1098_v51 = vadd.f32 %v1082_v46, %v1066_v4  ;;  %v1099_v28 = vadd.f32 %v1083_v57, %v1067_v6  ;;  %v1146_v19 = vld [vmem:[#allocation3 + $0x298] sm:$0xff]  ;;  %v1147_v34 = vld [vmem:[#allocation3 + $0x2a0] sm:$0xff]  ;;  %v1153_v46 = vld [vmem:[#allocation3 + $0x2d0] sm:$0xff] }
 0x105   :  { %v1100_v26 = vadd.f32 %v1084_v18, %v1068_v56  ;;  %v1101_v33 = vadd.f32 %v1085_v36, %v1069_v31  ;;  %v1102_v37 = vadd.f32 %v1086_v16, %v1070_v53  ;;  %v1103_v15 = vadd.f32 %v1087_v38, %v1071_v23  ;;  %v4494_v56 = vld [vmem:[#allocation8 + $0x2a8] sm:$0xff]  ;;  %v4496_v31 = vld [vmem:[#allocation8 + $0x2b0] sm:$0xff]  ;;  %v4498_v53 = vld [vmem:[#allocation8 + $0x2b8] sm:$0xff] }
 0x106   :  { %v1104_v52 = vadd.f32 %v1088_v9, %v1072_v62  ;;  %v1105_v54 = vadd.f32 %v1089_v29, %v1073_v45  ;;  %v1106_v25 = vadd.f32 %v1090_v3, %v1074_v50  ;;  %v1107_v48 = vadd.f32 %v1091_v14, %v1075_v24  ;;  %v4500_v23 = vld [vmem:[#allocation8 + $0x2c0] sm:$0xff]  ;;  %v1148_v62 = vld [vmem:[#allocation3 + $0x2a8] sm:$0xff]  ;;  %v1150_v45 = vld [vmem:[#allocation3 + $0x2b8] sm:$0xff] }
 0x107   :  { %v1108_v1 = vadd.f32 %v1092_v63, %v1076_v39  ;;  %v1109_v47 = vadd.f32 %v1093_v41, %v1077_v27  ;;  %v1110_v58 = vadd.f32 %v1094_v40, %v1078_v7  ;;  %v4472_v61 = vadd.f32 %v1095_v10, %v4372_v22  ;;  %v6056_v50 = vld [vmem:[#allocation38_spill] sm:$0xff]  ;;  %v6058_v24 = vld [vmem:[#allocation39_spill] sm:$0xff]  ;;  %v4514_v27 = vld [vmem:[#allocation8 + $0x2c8] sm:$0xff] }
 0x108   :  { %v4483_v42 = vadd.f32 %v1096_v21, %v4383_v30  ;;  %v4486_v4 = vadd.f32 %v1097_v17, %v4386_v55  ;;  %v4489_v22 = vadd.f32 %v1098_v51, %v4389_v2  ;;  %v4492_v6 = vadd.f32 %v1099_v28, %v4392_v8  ;;  %v1149_v30 = vld [vmem:[#allocation3 + $0x2b0] sm:$0xff]  ;;  %v4518_v13 = vld [vmem:[#allocation8 + $0x2d8] sm:$0xff]  ;;  %v4520_v32 = vld [vmem:[#allocation8 + $0x2e0] sm:$0xff] }
 0x109   :  { %v4503_v55 = vadd.f32 %v1100_v26, %v4403_v49  ;;  %v4506_v2 = vadd.f32 %v1101_v33, %v4406_v59  ;;  %v4509_v8 = vadd.f32 %v1102_v37, %v6056_v50  ;;  %v4512_v39 = vadd.f32 %v1103_v15, %v6058_v24  ;;  %v4516_v7 = vld [vmem:[#allocation8 + $0x2d0] sm:$0xff]  ;;  %v1151_v60 = vld [vmem:[#allocation3 + $0x2c0] sm:$0xff]  ;;  %v1152_v49 = vld [vmem:[#allocation3 + $0x2c8] sm:$0xff] }
 0x10a   :  { %v6060_v57 = vld [vmem:[#allocation40_spill] sm:$0xff]  ;;  %v6064_v16 = vld [vmem:[#allocation29_spill] sm:$0xff]  ;;  %v6066_v9 = vld [vmem:[#allocation18_spill] sm:$0xff]  ;;  %v1162_v50 = vsub.f32 %v1146_v19, %v4478_v43  ;;  %v1169_v19 = vsub.f32 %v1153_v46, %v4516_v7 }
 0x10b   :  { %6057 = vst [vmem:[#allocation20_spill] sm:$0xff] %v4509_v8  ;;  %6059 = vst [vmem:[#allocation21_spill] sm:$0xff] %v4512_v39  ;;  %v4523_v59 = vadd.f32 %v1104_v52, %v6060_v57  ;;  %v6062_v18 = vld [vmem:[#allocation28_spill] sm:$0xff]  ;;  %v4529_v38 = vadd.f32 %v1106_v25, %v6064_v16  ;;  %v4532_v29 = vadd.f32 %v1107_v48, %v6066_v9  ;;  %v1140_v3 = vld [vmem:[#allocation8 + $0x2e8] sm:$0xff] }
 0x10c   :  { %v4526_v36 = vadd.f32 %v1105_v54, %v6062_v18  ;;  %v1141_v14 = vld [vmem:[#allocation8 + $0x2f0] sm:$0xff]  ;;  %v1142_v63 = vld [vmem:[#allocation8 + $0x2f8] sm:$0xff]  ;;  %v1155_v40 = vld [vmem:[#allocation3 + $0x2e0] sm:$0xff]  ;;  %v1159_v52 = vsub.f32 %v1143_v5, %v4469_v44  ;;  %v1160_v25 = vsub.f32 %v1144_v0, %v4474_v11  ;;  %v1161_v48 = vsub.f32 %v1145_v35, %v4476_v12 }
 0x10d   :  { %6061 = vst [vmem:[#allocation22_spill] sm:$0xff] %v4523_v59  ;;  %6065 = vst [vmem:[#allocation26_spill] sm:$0xff] %v4529_v38  ;;  %v1154_v41 = vld [vmem:[#allocation3 + $0x2d8] sm:$0xff]  ;;  %v1156_v10 = vld [vmem:[#allocation3 + $0x2e8] sm:$0xff]  ;;  %v1164_v18 = vsub.f32 %v1148_v62, %v4494_v56  ;;  %v1166_v16 = vsub.f32 %v1150_v45, %v4498_v53  ;;  %v1167_v5 = vsub.f32 %v1151_v60, %v4500_v23 }
 0x10e   :  { %6063 = vst [vmem:[#allocation30_spill] sm:$0xff] %v4526_v36  ;;  %6067 = vst [vmem:[#allocation23_spill] sm:$0xff] %v4532_v29  ;;  %v6068_v21 = vld [vmem:[#allocation24_spill] sm:$0xff]  ;;  %v6070_v51 = vld [vmem:[#allocation25_spill] sm:$0xff]  ;;  %v1168_v35 = vsub.f32 %v1152_v49, %v4514_v27 }
 0x10f   :  { %v4535_v17 = vadd.f32 %v1108_v1, %v6068_v21  ;;  %v4538_v28 = vadd.f32 %v1109_v47, %v6070_v51  ;;  %v6072_v26 = vld [vmem:[#allocation19_spill] sm:$0xff]  ;;  %v1157_v37 = vld [vmem:[#allocation3 + $0x2f0] sm:$0xff]  ;;  %v1175_v54 = vld [vmem:[#allocation6 + $0x280] sm:$0xff]  ;;  %v1163_v1 = vsub.f32 %v1147_v34, %v4480_v20  ;;  %v1170_v34 = vsub.f32 %v1154_v41, %v4518_v13 }
 0x110   :  { %v4541_v33 = vadd.f32 %v1110_v58, %v6072_v26  ;;  %v1158_v15 = vld [vmem:[#allocation3 + $0x2f8] sm:$0xff]  ;;  %v1176_v24 = vld [vmem:[#allocation6 + $0x288] sm:$0xff]  ;;  %v1177_v57 = vld [vmem:[#allocation6 + $0x290] sm:$0xff]  ;;  %v1165_v58 = vsub.f32 %v1149_v30, %v4496_v31  ;;  %v1171_v51 = vsub.f32 %v1155_v40, %v4520_v32  ;;  %v1173_v30 = vsub.f32 %v1157_v37, %v1141_v14 }
 0x111   :  { %6069 = vst [vmem:[#allocation31_spill] sm:$0xff] %v4535_v17  ;;  %6071 = vst [vmem:[#allocation32_spill] sm:$0xff] %v4538_v28  ;;  %v1178_v47 = vld [vmem:[#allocation6 + $0x298] sm:$0xff]  ;;  %v1179_v9 = vld [vmem:[#allocation6 + $0x2a0] sm:$0xff]  ;;  %v1172_v28 = vsub.f32 %v1156_v10, %v1140_v3  ;;  %v1174_v17 = vsub.f32 %v1158_v15, %v1142_v63  ;;  %v1191_v38 = vsub.f32 %v1175_v54, %v4469_v44 }
 0x112   :  { %6073 = vst [vmem:[#allocation33_spill] sm:$0xff] %v4541_v33  ;;  %v1180_v21 = vld [vmem:[#allocation6 + $0x2a8] sm:$0xff]  ;;  %v1181_v0 = vld [vmem:[#allocation6 + $0x2b0] sm:$0xff]  ;;  %v1182_v26 = vld [vmem:[#allocation6 + $0x2b8] sm:$0xff]  ;;  %v1192_v46 = vsub.f32 %v1176_v24, %v4474_v11  ;;  %v1193_v41 = vsub.f32 %v1177_v57, %v4476_v12  ;;  %v1194_v40 = vsub.f32 %v1178_v47, %v4478_v43  ;;  %v1195_v39 = vsub.f32 %v1179_v9, %v4480_v20 }
 0x113   :  { %v1183_v33 = vld [vmem:[#allocation6 + $0x2c0] sm:$0xff]  ;;  %v1184_v62 = vld [vmem:[#allocation6 + $0x2c8] sm:$0xff]  ;;  %v1185_v45 = vld [vmem:[#allocation6 + $0x2d0] sm:$0xff]  ;;  %v1196_v10 = vsub.f32 %v1180_v21, %v4494_v56  ;;  %v1197_v37 = vsub.f32 %v1181_v0, %v4496_v31  ;;  %v1198_v15 = vsub.f32 %v1182_v26, %v4498_v53  ;;  %v1207_v20 = vmul.f32 %v1159_v52, %v1159_v52 }
 0x114   :  { %v1186_v29 = vld [vmem:[#allocation6 + $0x2d8] sm:$0xff]  ;;  %v1187_v60 = vld [vmem:[#allocation6 + $0x2e0] sm:$0xff]  ;;  %v1188_v36 = vld [vmem:[#allocation6 + $0x2e8] sm:$0xff]  ;;  %v1199_v8 = vsub.f32 %v1183_v33, %v4500_v23  ;;  %v1200_v44 = vsub.f32 %v1184_v62, %v4514_v27  ;;  %v1201_v54 = vsub.f32 %v1185_v45, %v4516_v7  ;;  %v1208_v47 = vmul.f32 %v1160_v25, %v1160_v25 }
 0x115   :  { %v1189_v59 = vld [vmem:[#allocation6 + $0x2f0] sm:$0xff]  ;;  %v1190_v49 = vld [vmem:[#allocation6 + $0x2f8] sm:$0xff]  ;;  %v1202_v11 = vsub.f32 %v1186_v29, %v4518_v13  ;;  %v1203_v12 = vsub.f32 %v1187_v60, %v4520_v32  ;;  %v1204_v24 = vsub.f32 %v1188_v36, %v1140_v3  ;;  %v1209_v56 = vmul.f32 %v1161_v48, %v1161_v48 }
 0x116   :  { %v1205_v43 = vsub.f32 %v1189_v59, %v1141_v14  ;;  %v1206_v57 = vsub.f32 %v1190_v49, %v1142_v63  ;;  %v1210_v9 = vmul.f32 %v1162_v50, %v1162_v50  ;;  %v1211_v31 = vmul.f32 %v1163_v1, %v1163_v1 }
 0x117   :  { %v1212_v21 = vmul.f32 %v1164_v18, %v1164_v18  ;;  %v1213_v53 = vmul.f32 %v1165_v58, %v1165_v58  ;;  %v1214_v0 = vmul.f32 %v1166_v16, %v1166_v16  ;;  %v1215_v23 = vmul.f32 %v1167_v5, %v1167_v5 }
 0x118   :  { %v1216_v33 = vmul.f32 %v1168_v35, %v1168_v35  ;;  %v1217_v27 = vmul.f32 %v1169_v19, %v1169_v19  ;;  %v1218_v26 = vmul.f32 %v1170_v34, %v1170_v34  ;;  %v1219_v7 = vmul.f32 %v1171_v51, %v1171_v51 }
 0x119   :  { %v1220_v62 = vmul.f32 %v1172_v28, %v1172_v28  ;;  %v1221_v13 = vmul.f32 %v1173_v30, %v1173_v30  ;;  %v1222_v29 = vmul.f32 %v1174_v17, %v1174_v17  ;;  %v1223_v32 = vmul.f32 %v1191_v38, %v1191_v38 }
 0x11a   :  { %v1224_v36 = vmul.f32 %v1192_v46, %v1192_v46  ;;  %v1225_v59 = vmul.f32 %v1193_v41, %v1193_v41  ;;  %v1226_v3 = vmul.f32 %v1194_v40, %v1194_v40  ;;  %v1227_v14 = vmul.f32 %v1195_v39, %v1195_v39  ;;  %v4569_v41 = vld [vmem:[#allocation8 + $0x300] sm:$0xff] }
 0x11b   :  { %v1228_v63 = vmul.f32 %v1196_v10, %v1196_v10  ;;  %v1229_v52 = vmul.f32 %v1197_v37, %v1197_v37  ;;  %v1230_v25 = vmul.f32 %v1198_v15, %v1198_v15  ;;  %v1231_v48 = vmul.f32 %v1199_v8, %v1199_v8  ;;  %v1287_v40 = vld [vmem:[#allocation3 + $0x300] sm:$0xff] }
 0x11c   :  { %v1232_v50 = vmul.f32 %v1200_v44, %v1200_v44  ;;  %v1233_v1 = vmul.f32 %v1201_v54, %v1201_v54  ;;  %v1234_v18 = vmul.f32 %v1202_v11, %v1202_v11  ;;  %v1235_v58 = vmul.f32 %v1203_v12, %v1203_v12  ;;  %v4574_v54 = vld [vmem:[#allocation8 + $0x308] sm:$0xff]  ;;  %v4576_v11 = vld [vmem:[#allocation8 + $0x310] sm:$0xff]  ;;  %v4578_v12 = vld [vmem:[#allocation8 + $0x318] sm:$0xff] }
 0x11d   :  { %v1236_v16 = vmul.f32 %v1204_v24, %v1204_v24  ;;  %v1237_v5 = vmul.f32 %v1205_v43, %v1205_v43  ;;  %v1238_v35 = vmul.f32 %v1206_v57, %v1206_v57  ;;  %v1239_v19 = vadd.f32 %v1223_v32, %v1207_v20  ;;  %v4580_v24 = vld [vmem:[#allocation8 + $0x320] sm:$0xff]  ;;  %v1288_v43 = vld [vmem:[#allocation3 + $0x308] sm:$0xff]  ;;  %v1289_v57 = vld [vmem:[#allocation3 + $0x310] sm:$0xff] }
 0x11e   :  { %v1240_v28 = vadd.f32 %v1224_v36, %v1208_v47  ;;  %v1241_v34 = vadd.f32 %v1225_v59, %v1209_v56  ;;  %v1242_v17 = vadd.f32 %v1226_v3, %v1210_v9  ;;  %v1243_v38 = vadd.f32 %v1227_v14, %v1211_v31  ;;  %v1290_v20 = vld [vmem:[#allocation3 + $0x318] sm:$0xff]  ;;  %v1291_v47 = vld [vmem:[#allocation3 + $0x320] sm:$0xff]  ;;  %v1297_v3 = vld [vmem:[#allocation3 + $0x350] sm:$0xff] }
 0x11f   :  { %v1244_v51 = vadd.f32 %v1228_v63, %v1212_v21  ;;  %v1245_v30 = vadd.f32 %v1229_v52, %v1213_v53  ;;  %v1246_v45 = vadd.f32 %v1230_v25, %v1214_v0  ;;  %v1247_v39 = vadd.f32 %v1231_v48, %v1215_v23  ;;  %v4594_v21 = vld [vmem:[#allocation8 + $0x328] sm:$0xff]  ;;  %v4596_v53 = vld [vmem:[#allocation8 + $0x330] sm:$0xff]  ;;  %v4598_v0 = vld [vmem:[#allocation8 + $0x338] sm:$0xff] }
 0x120   :  { %v1248_v60 = vadd.f32 %v1232_v50, %v1216_v33  ;;  %v1249_v49 = vadd.f32 %v1233_v1, %v1217_v27  ;;  %v1250_v46 = vadd.f32 %v1234_v18, %v1218_v26  ;;  %v1251_v8 = vadd.f32 %v1235_v58, %v1219_v7  ;;  %v4600_v23 = vld [vmem:[#allocation8 + $0x340] sm:$0xff]  ;;  %v1292_v33 = vld [vmem:[#allocation3 + $0x328] sm:$0xff]  ;;  %v1294_v27 = vld [vmem:[#allocation3 + $0x338] sm:$0xff] }
 0x121   :  { %v1252_v10 = vadd.f32 %v1236_v16, %v1220_v62  ;;  %v1253_v37 = vadd.f32 %v1237_v5, %v1221_v13  ;;  %v1254_v15 = vadd.f32 %v1238_v35, %v1222_v29  ;;  %v4572_v44 = vadd.f32 %v1239_v19, %v4472_v61  ;;  %v6074_v26 = vld [vmem:[#allocation20_spill] sm:$0xff]  ;;  %v6076_v7 = vld [vmem:[#allocation21_spill] sm:$0xff]  ;;  %v4616_v29 = vld [vmem:[#allocation8 + $0x350] sm:$0xff] }
 0x122   :  { %v4583_v56 = vadd.f32 %v1240_v28, %v4483_v42  ;;  %v4586_v9 = vadd.f32 %v1241_v34, %v4486_v4  ;;  %v4589_v61 = vadd.f32 %v1242_v17, %v4489_v22  ;;  %v4592_v31 = vadd.f32 %v1243_v38, %v4492_v6  ;;  %v1293_v42 = vld [vmem:[#allocation3 + $0x330] sm:$0xff]  ;;  %v4614_v13 = vld [vmem:[#allocation8 + $0x348] sm:$0xff]  ;;  %v4618_v32 = vld [vmem:[#allocation8 + $0x358] sm:$0xff] }
 0x123   :  { %v4603_v4 = vadd.f32 %v1244_v51, %v4503_v55  ;;  %v4606_v22 = vadd.f32 %v1245_v30, %v4506_v2  ;;  %v4609_v6 = vadd.f32 %v1246_v45, %v6074_v26  ;;  %v4612_v62 = vadd.f32 %v1247_v39, %v6076_v7  ;;  %v4620_v36 = vld [vmem:[#allocation8 + $0x360] sm:$0xff]  ;;  %v1296_v55 = vld [vmem:[#allocation3 + $0x348] sm:$0xff]  ;;  %v6078_v14 = vld [vmem:[#allocation22_spill] sm:$0xff] }
 0x124   :  { %v1295_v59 = vld [vmem:[#allocation3 + $0x340] sm:$0xff]  ;;  %v4623_v2 = vadd.f32 %v1248_v60, %v6078_v14  ;;  %v6080_v63 = vld [vmem:[#allocation30_spill] sm:$0xff]  ;;  %v6084_v50 = vld [vmem:[#allocation23_spill] sm:$0xff]  ;;  %v1303_v60 = vsub.f32 %v1287_v40, %v4569_v41  ;;  %v1306_v26 = vsub.f32 %v1290_v20, %v4578_v12  ;;  %v1313_v20 = vsub.f32 %v1297_v3, %v4616_v29 }
 0x125   :  { %6075 = vst [vmem:[#allocation34_spill] sm:$0xff] %v4609_v6  ;;  %6077 = vst [vmem:[#allocation35_spill] sm:$0xff] %v4612_v62  ;;  %v4626_v52 = vadd.f32 %v1249_v49, %v6080_v63  ;;  %v6082_v25 = vld [vmem:[#allocation26_spill] sm:$0xff]  ;;  %v4632_v1 = vadd.f32 %v1251_v8, %v6084_v50  ;;  %v1284_v18 = vld [vmem:[#allocation8 + $0x368] sm:$0xff]  ;;  %v1305_v8 = vsub.f32 %v1289_v57, %v4576_v11 }
 0x126   :  { %6079 = vst [vmem:[#allocation36_spill] sm:$0xff] %v4623_v2  ;;  %v4629_v48 = vadd.f32 %v1250_v46, %v6082_v25  ;;  %v1285_v58 = vld [vmem:[#allocation8 + $0x370] sm:$0xff]  ;;  %v1286_v16 = vld [vmem:[#allocation8 + $0x378] sm:$0xff]  ;;  %v1299_v35 = vld [vmem:[#allocation3 + $0x360] sm:$0xff]  ;;  %v1304_v46 = vsub.f32 %v1288_v43, %v4574_v54  ;;  %v1308_v63 = vsub.f32 %v1292_v33, %v4594_v21  ;;  %v1310_v25 = vsub.f32 %v1294_v27, %v4598_v0 }
 0x127   :  { %6081 = vst [vmem:[#allocation27_spill] sm:$0xff] %v4626_v52  ;;  %6085 = vst [vmem:[#allocation38_spill] sm:$0xff] %v4632_v1  ;;  %v1298_v5 = vld [vmem:[#allocation3 + $0x358] sm:$0xff]  ;;  %v1300_v19 = vld [vmem:[#allocation3 + $0x368] sm:$0xff]  ;;  %v1311_v40 = vsub.f32 %v1295_v59, %v4600_v23  ;;  %v1312_v57 = vsub.f32 %v1296_v55, %v4614_v13 }
 0x128   :  { %6083 = vst [vmem:[#allocation37_spill] sm:$0xff] %v4629_v48  ;;  %v6086_v28 = vld [vmem:[#allocation31_spill] sm:$0xff]  ;;  %v6088_v17 = vld [vmem:[#allocation32_spill] sm:$0xff]  ;;  %v6090_v51 = vld [vmem:[#allocation33_spill] sm:$0xff] }
 0x129   :  { %v4635_v34 = vadd.f32 %v1252_v10, %v6086_v28  ;;  %v4638_v38 = vadd.f32 %v1253_v37, %v6088_v17  ;;  %v4641_v30 = vadd.f32 %v1254_v15, %v6090_v51  ;;  %v1301_v45 = vld [vmem:[#allocation3 + $0x370] sm:$0xff]  ;;  %v1302_v39 = vld [vmem:[#allocation3 + $0x378] sm:$0xff]  ;;  %v1319_v49 = vld [vmem:[#allocation6 + $0x300] sm:$0xff]  ;;  %v1307_v10 = vsub.f32 %v1291_v47, %v4580_v24 }
 0x12a   :  { %v1320_v7 = vld [vmem:[#allocation6 + $0x308] sm:$0xff]  ;;  %v1321_v14 = vld [vmem:[#allocation6 + $0x310] sm:$0xff]  ;;  %v1322_v37 = vld [vmem:[#allocation6 + $0x318] sm:$0xff]  ;;  %v1309_v15 = vsub.f32 %v1293_v42, %v4596_v53  ;;  %v1314_v47 = vsub.f32 %v1298_v5, %v4618_v32  ;;  %v1315_v17 = vsub.f32 %v1299_v35, %v4620_v36  ;;  %v1317_v42 = vsub.f32 %v1301_v45, %v1285_v58 }
 0x12b   :  { %6087 = vst [vmem:[#allocation39_spill] sm:$0xff] %v4635_v34  ;;  %6089 = vst [vmem:[#allocation40_spill] sm:$0xff] %v4638_v38  ;;  %v1323_v50 = vld [vmem:[#allocation6 + $0x320] sm:$0xff]  ;;  %v1324_v28 = vld [vmem:[#allocation6 + $0x328] sm:$0xff]  ;;  %v1316_v38 = vsub.f32 %v1300_v19, %v1284_v18  ;;  %v1318_v34 = vsub.f32 %v1302_v39, %v1286_v16  ;;  %v1335_v48 = vsub.f32 %v1319_v49, %v4569_v41 }
 0x12c   :  { %6091 = vst [vmem:[#allocation28_spill] sm:$0xff] %v4641_v30  ;;  %v1325_v43 = vld [vmem:[#allocation6 + $0x330] sm:$0xff]  ;;  %v1326_v51 = vld [vmem:[#allocation6 + $0x338] sm:$0xff]  ;;  %v1327_v30 = vld [vmem:[#allocation6 + $0x340] sm:$0xff]  ;;  %v1336_v3 = vsub.f32 %v1320_v7, %v4574_v54  ;;  %v1337_v5 = vsub.f32 %v1321_v14, %v4576_v11  ;;  %v1338_v35 = vsub.f32 %v1322_v37, %v4578_v12  ;;  %v1339_v62 = vsub.f32 %v1323_v50, %v4580_v24 }
 0x12d   :  { %v1328_v33 = vld [vmem:[#allocation6 + $0x348] sm:$0xff]  ;;  %v1329_v27 = vld [vmem:[#allocation6 + $0x350] sm:$0xff]  ;;  %v1330_v1 = vld [vmem:[#allocation6 + $0x358] sm:$0xff]  ;;  %v1340_v19 = vsub.f32 %v1324_v28, %v4594_v21  ;;  %v1341_v45 = vsub.f32 %v1325_v43, %v4596_v53  ;;  %v1342_v39 = vsub.f32 %v1326_v51, %v4598_v0  ;;  %v1343_v6 = vsub.f32 %v1327_v30, %v4600_v23 }
 0x12e   :  { %v1331_v59 = vld [vmem:[#allocation6 + $0x360] sm:$0xff]  ;;  %v1332_v52 = vld [vmem:[#allocation6 + $0x368] sm:$0xff]  ;;  %v1333_v2 = vld [vmem:[#allocation6 + $0x370] sm:$0xff]  ;;  %v1344_v41 = vsub.f32 %v1328_v33, %v4614_v13  ;;  %v1345_v49 = vsub.f32 %v1329_v27, %v4616_v29  ;;  %v1346_v54 = vsub.f32 %v1330_v1, %v4618_v32  ;;  %v1351_v24 = vmul.f32 %v1303_v60, %v1303_v60 }
 0x12f   :  { %v1334_v55 = vld [vmem:[#allocation6 + $0x378] sm:$0xff]  ;;  %v1347_v11 = vsub.f32 %v1331_v59, %v4620_v36  ;;  %v1348_v7 = vsub.f32 %v1332_v52, %v1284_v18  ;;  %v1349_v12 = vsub.f32 %v1333_v2, %v1285_v58  ;;  %v1352_v37 = vmul.f32 %v1304_v46, %v1304_v46 }
 0x130   :  { %v1350_v14 = vsub.f32 %v1334_v55, %v1286_v16  ;;  %v1353_v21 = vmul.f32 %v1305_v8, %v1305_v8  ;;  %v1354_v50 = vmul.f32 %v1306_v26, %v1306_v26  ;;  %v1355_v53 = vmul.f32 %v1307_v10, %v1307_v10 }
 0x131   :  { %v1356_v28 = vmul.f32 %v1308_v63, %v1308_v63  ;;  %v1357_v0 = vmul.f32 %v1309_v15, %v1309_v15  ;;  %v1358_v43 = vmul.f32 %v1310_v25, %v1310_v25  ;;  %v1359_v23 = vmul.f32 %v1311_v40, %v1311_v40 }
 0x132   :  { %v1360_v30 = vmul.f32 %v1312_v57, %v1312_v57  ;;  %v1361_v13 = vmul.f32 %v1313_v20, %v1313_v20  ;;  %v1362_v51 = vmul.f32 %v1314_v47, %v1314_v47  ;;  %v1363_v29 = vmul.f32 %v1315_v17, %v1315_v17 }
 0x133   :  { %v1364_v33 = vmul.f32 %v1316_v38, %v1316_v38  ;;  %v1365_v32 = vmul.f32 %v1317_v42, %v1317_v42  ;;  %v1366_v1 = vmul.f32 %v1318_v34, %v1318_v34  ;;  %v1367_v36 = vmul.f32 %v1335_v48, %v1335_v48 }
 0x134   :  { %v1368_v52 = vmul.f32 %v1336_v3, %v1336_v3  ;;  %v1369_v2 = vmul.f32 %v1337_v5, %v1337_v5  ;;  %v1370_v18 = vmul.f32 %v1338_v35, %v1338_v35  ;;  %v1371_v58 = vmul.f32 %v1339_v62, %v1339_v62  ;;  %v4669_v5 = vld [vmem:[#allocation8 + $0x380] sm:$0xff] }
 0x135   :  { %v1372_v16 = vmul.f32 %v1340_v19, %v1340_v19  ;;  %v1373_v60 = vmul.f32 %v1341_v45, %v1341_v45  ;;  %v1374_v46 = vmul.f32 %v1342_v39, %v1342_v39  ;;  %v1375_v8 = vmul.f32 %v1343_v6, %v1343_v6  ;;  %v1431_v35 = vld [vmem:[#allocation3 + $0x380] sm:$0xff] }
 0x136   :  { %v1376_v26 = vmul.f32 %v1344_v41, %v1344_v41  ;;  %v1377_v10 = vmul.f32 %v1345_v49, %v1345_v49  ;;  %v1378_v63 = vmul.f32 %v1346_v54, %v1346_v54  ;;  %v1379_v15 = vmul.f32 %v1347_v11, %v1347_v11  ;;  %v4674_v49 = vld [vmem:[#allocation8 + $0x388] sm:$0xff]  ;;  %v4676_v54 = vld [vmem:[#allocation8 + $0x390] sm:$0xff]  ;;  %v4678_v11 = vld [vmem:[#allocation8 + $0x398] sm:$0xff] }
 0x137   :  { %v1380_v25 = vmul.f32 %v1348_v7, %v1348_v7  ;;  %v1381_v40 = vmul.f32 %v1349_v12, %v1349_v12  ;;  %v1382_v57 = vmul.f32 %v1350_v14, %v1350_v14  ;;  %v1383_v20 = vadd.f32 %v1367_v36, %v1351_v24  ;;  %v4680_v7 = vld [vmem:[#allocation8 + $0x3a0] sm:$0xff]  ;;  %v1432_v12 = vld [vmem:[#allocation3 + $0x388] sm:$0xff]  ;;  %v1433_v14 = vld [vmem:[#allocation3 + $0x390] sm:$0xff] }
 0x138   :  { %v1384_v38 = vadd.f32 %v1368_v52, %v1352_v37  ;;  %v1385_v47 = vadd.f32 %v1369_v2, %v1353_v21  ;;  %v1386_v34 = vadd.f32 %v1370_v18, %v1354_v50  ;;  %v1387_v48 = vadd.f32 %v1371_v58, %v1355_v53  ;;  %v1434_v24 = vld [vmem:[#allocation3 + $0x398] sm:$0xff]  ;;  %v1435_v37 = vld [vmem:[#allocation3 + $0x3a0] sm:$0xff]  ;;  %v1441_v18 = vld [vmem:[#allocation3 + $0x3d0] sm:$0xff] }
 0x139   :  { %v1388_v17 = vadd.f32 %v1372_v16, %v1356_v28  ;;  %v1389_v42 = vadd.f32 %v1373_v60, %v1357_v0  ;;  %v1390_v27 = vadd.f32 %v1374_v46, %v1358_v43  ;;  %v1391_v62 = vadd.f32 %v1375_v8, %v1359_v23  ;;  %v4694_v28 = vld [vmem:[#allocation8 + $0x3a8] sm:$0xff]  ;;  %v4696_v0 = vld [vmem:[#allocation8 + $0x3b0] sm:$0xff]  ;;  %v4698_v43 = vld [vmem:[#allocation8 + $0x3b8] sm:$0xff] }
 0x13a   :  { %v1392_v59 = vadd.f32 %v1376_v26, %v1360_v30  ;;  %v1393_v55 = vadd.f32 %v1377_v10, %v1361_v13  ;;  %v1394_v3 = vadd.f32 %v1378_v63, %v1362_v51  ;;  %v1395_v6 = vadd.f32 %v1379_v15, %v1363_v29  ;;  %v4700_v23 = vld [vmem:[#allocation8 + $0x3c0] sm:$0xff]  ;;  %v1436_v30 = vld [vmem:[#allocation3 + $0x3a8] sm:$0xff]  ;;  %v1438_v13 = vld [vmem:[#allocation3 + $0x3b8] sm:$0xff] }
 0x13b   :  { %v1396_v19 = vadd.f32 %v1380_v25, %v1364_v33  ;;  %v1397_v45 = vadd.f32 %v1381_v40, %v1365_v32  ;;  %v1398_v39 = vadd.f32 %v1382_v57, %v1366_v1  ;;  %v4672_v41 = vadd.f32 %v1383_v20, %v4572_v44  ;;  %v6092_v51 = vld [vmem:[#allocation34_spill] sm:$0xff]  ;;  %v6094_v29 = vld [vmem:[#allocation35_spill] sm:$0xff]  ;;  %v4714_v32 = vld [vmem:[#allocation8 + $0x3c8] sm:$0xff] }
 0x13c   :  { %v4683_v21 = vadd.f32 %v1384_v38, %v4583_v56  ;;  %v4686_v50 = vadd.f32 %v1385_v47, %v4586_v9  ;;  %v4689_v44 = vadd.f32 %v1386_v34, %v4589_v61  ;;  %v4692_v53 = vadd.f32 %v1387_v48, %v4592_v31  ;;  %v1437_v56 = vld [vmem:[#allocation3 + $0x3b0] sm:$0xff]  ;;  %v4718_v36 = vld [vmem:[#allocation8 + $0x3d8] sm:$0xff]  ;;  %v4720_v52 = vld [vmem:[#allocation8 + $0x3e0] sm:$0xff] }
 0x13d   :  { %v4703_v9 = vadd.f32 %v1388_v17, %v4603_v4  ;;  %v4706_v61 = vadd.f32 %v1389_v42, %v4606_v22  ;;  %v4709_v31 = vadd.f32 %v1390_v27, %v6092_v51  ;;  %v4712_v33 = vadd.f32 %v1391_v62, %v6094_v29  ;;  %v4716_v1 = vld [vmem:[#allocation8 + $0x3d0] sm:$0xff]  ;;  %v1439_v2 = vld [vmem:[#allocation3 + $0x3c0] sm:$0xff]  ;;  %v1440_v4 = vld [vmem:[#allocation3 + $0x3c8] sm:$0xff] }
 0x13e   :  { %v6096_v58 = vld [vmem:[#allocation36_spill] sm:$0xff]  ;;  %v6098_v16 = vld [vmem:[#allocation27_spill] sm:$0xff]  ;;  %v6100_v46 = vld [vmem:[#allocation37_spill] sm:$0xff]  ;;  %v1450_v51 = vsub.f32 %v1434_v24, %v4678_v11  ;;  %v1457_v24 = vsub.f32 %v1441_v18, %v4716_v1 }
 0x13f   :  { %6093 = vst [vmem:[#allocation29_spill] sm:$0xff] %v4709_v31  ;;  %6095 = vst [vmem:[#allocation18_spill] sm:$0xff] %v4712_v33  ;;  %v4723_v22 = vadd.f32 %v1392_v59, %v6096_v58  ;;  %v4726_v60 = vadd.f32 %v1393_v55, %v6098_v16  ;;  %v4729_v8 = vadd.f32 %v1394_v3, %v6100_v46  ;;  %v6102_v26 = vld [vmem:[#allocation38_spill] sm:$0xff]  ;;  %v1428_v63 = vld [vmem:[#allocation8 + $0x3e8] sm:$0xff] }
 0x140   :  { %v4732_v10 = vadd.f32 %v1395_v6, %v6102_v26  ;;  %v1429_v15 = vld [vmem:[#allocation8 + $0x3f0] sm:$0xff]  ;;  %v1430_v25 = vld [vmem:[#allocation8 + $0x3f8] sm:$0xff]  ;;  %v1443_v57 = vld [vmem:[#allocation3 + $0x3e0] sm:$0xff]  ;;  %v1447_v59 = vsub.f32 %v1431_v35, %v4669_v5  ;;  %v1448_v3 = vsub.f32 %v1432_v12, %v4674_v49  ;;  %v1449_v6 = vsub.f32 %v1433_v14, %v4676_v54 }
 0x141   :  { %6097 = vst [vmem:[#allocation24_spill] sm:$0xff] %v4723_v22  ;;  %6099 = vst [vmem:[#allocation25_spill] sm:$0xff] %v4726_v60  ;;  %v1442_v40 = vld [vmem:[#allocation3 + $0x3d8] sm:$0xff]  ;;  %v1444_v20 = vld [vmem:[#allocation3 + $0x3e8] sm:$0xff]  ;;  %v1452_v16 = vsub.f32 %v1436_v30, %v4694_v28  ;;  %v1454_v46 = vsub.f32 %v1438_v13, %v4698_v43  ;;  %v1455_v35 = vsub.f32 %v1439_v2, %v4700_v23 }
 0x142   :  { %6101 = vst [vmem:[#allocation19_spill] sm:$0xff] %v4729_v8  ;;  %6103 = vst [vmem:[#allocation20_spill] sm:$0xff] %v4732_v10  ;;  %v6104_v38 = vld [vmem:[#allocation39_spill] sm:$0xff]  ;;  %v6106_v34 = vld [vmem:[#allocation40_spill] sm:$0xff]  ;;  %v1456_v14 = vsub.f32 %v1440_v4, %v4714_v32 }
 0x143   :  { %v4735_v47 = vadd.f32 %v1396_v19, %v6104_v38  ;;  %v4738_v48 = vadd.f32 %v1397_v45, %v6106_v34  ;;  %v6108_v17 = vld [vmem:[#allocation28_spill] sm:$0xff]  ;;  %v1445_v27 = vld [vmem:[#allocation3 + $0x3f0] sm:$0xff]  ;;  %v1446_v62 = vld [vmem:[#allocation3 + $0x3f8] sm:$0xff]  ;;  %v1451_v19 = vsub.f32 %v1435_v37, %v4680_v7  ;;  %v1458_v37 = vsub.f32 %v1442_v40, %v4718_v36 }
 0x144   :  { %v4741_v42 = vadd.f32 %v1398_v39, %v6108_v17  ;;  %v1463_v55 = vld [vmem:[#allocation6 + $0x380] sm:$0xff]  ;;  %v1464_v29 = vld [vmem:[#allocation6 + $0x388] sm:$0xff]  ;;  %v1465_v58 = vld [vmem:[#allocation6 + $0x390] sm:$0xff]  ;;  %v1453_v39 = vsub.f32 %v1437_v56, %v4696_v0  ;;  %v1459_v34 = vsub.f32 %v1443_v57, %v4720_v52  ;;  %v1461_v56 = vsub.f32 %v1445_v27, %v1429_v15 }
 0x145   :  { %6105 = vst [vmem:[#allocation21_spill] sm:$0xff] %v4735_v47  ;;  %6107 = vst [vmem:[#allocation22_spill] sm:$0xff] %v4738_v48  ;;  %v1466_v45 = vld [vmem:[#allocation6 + $0x398] sm:$0xff]  ;;  %v1467_v26 = vld [vmem:[#allocation6 + $0x3a0] sm:$0xff]  ;;  %v1460_v48 = vsub.f32 %v1444_v20, %v1428_v63  ;;  %v1462_v47 = vsub.f32 %v1446_v62, %v1430_v25  ;;  %v1479_v8 = vsub.f32 %v1463_v55, %v4669_v5 }
 0x146   :  { %6109 = vst [vmem:[#allocation30_spill] sm:$0xff] %v4741_v42  ;;  %v1468_v38 = vld [vmem:[#allocation6 + $0x3a8] sm:$0xff]  ;;  %v1469_v12 = vld [vmem:[#allocation6 + $0x3b0] sm:$0xff]  ;;  %v1470_v17 = vld [vmem:[#allocation6 + $0x3b8] sm:$0xff]  ;;  %v1480_v18 = vsub.f32 %v1464_v29, %v4674_v49  ;;  %v1481_v40 = vsub.f32 %v1465_v58, %v4676_v54  ;;  %v1482_v57 = vsub.f32 %v1466_v45, %v4678_v11  ;;  %v1483_v33 = vsub.f32 %v1467_v26, %v4680_v7 }
 0x147   :  { %v1471_v42 = vld [vmem:[#allocation6 + $0x3c0] sm:$0xff]  ;;  %v1472_v30 = vld [vmem:[#allocation6 + $0x3c8] sm:$0xff]  ;;  %v1473_v13 = vld [vmem:[#allocation6 + $0x3d0] sm:$0xff]  ;;  %v1484_v20 = vsub.f32 %v1468_v38, %v4694_v28  ;;  %v1485_v27 = vsub.f32 %v1469_v12, %v4696_v0  ;;  %v1486_v62 = vsub.f32 %v1470_v17, %v4698_v43  ;;  %v1495_v7 = vmul.f32 %v1447_v59, %v1447_v59 }
 0x148   :  { %v1474_v10 = vld [vmem:[#allocation6 + $0x3d8] sm:$0xff]  ;;  %v1475_v2 = vld [vmem:[#allocation6 + $0x3e0] sm:$0xff]  ;;  %v1476_v60 = vld [vmem:[#allocation6 + $0x3e8] sm:$0xff]  ;;  %v1487_v31 = vsub.f32 %v1471_v42, %v4700_v23  ;;  %v1488_v5 = vsub.f32 %v1472_v30, %v4714_v32  ;;  %v1489_v55 = vsub.f32 %v1473_v13, %v4716_v1  ;;  %v1496_v45 = vmul.f32 %v1448_v3, %v1448_v3 }
 0x149   :  { %v1477_v22 = vld [vmem:[#allocation6 + $0x3f0] sm:$0xff]  ;;  %v1478_v4 = vld [vmem:[#allocation6 + $0x3f8] sm:$0xff]  ;;  %v1490_v49 = vsub.f32 %v1474_v10, %v4718_v36  ;;  %v1491_v54 = vsub.f32 %v1475_v2, %v4720_v52  ;;  %v1492_v29 = vsub.f32 %v1476_v60, %v1428_v63  ;;  %v1497_v28 = vmul.f32 %v1449_v6, %v1449_v6 }
 0x14a   :  { %v1493_v11 = vsub.f32 %v1477_v22, %v1429_v15  ;;  %v1494_v58 = vsub.f32 %v1478_v4, %v1430_v25  ;;  %v1498_v26 = vmul.f32 %v1450_v51, %v1450_v51  ;;  %v1499_v0 = vmul.f32 %v1451_v19, %v1451_v19 }
 0x14b   :  { %v1500_v38 = vmul.f32 %v1452_v16, %v1452_v16  ;;  %v1501_v43 = vmul.f32 %v1453_v39, %v1453_v39  ;;  %v1502_v12 = vmul.f32 %v1454_v46, %v1454_v46  ;;  %v1503_v23 = vmul.f32 %v1455_v35, %v1455_v35 }
 0x14c   :  { %v1504_v42 = vmul.f32 %v1456_v14, %v1456_v14  ;;  %v1505_v32 = vmul.f32 %v1457_v24, %v1457_v24  ;;  %v1506_v17 = vmul.f32 %v1458_v37, %v1458_v37  ;;  %v1507_v1 = vmul.f32 %v1459_v34, %v1459_v34 }
 0x14d   :  { %v1508_v30 = vmul.f32 %v1460_v48, %v1460_v48  ;;  %v1509_v36 = vmul.f32 %v1461_v56, %v1461_v56  ;;  %v1510_v10 = vmul.f32 %v1462_v47, %v1462_v47  ;;  %v1511_v52 = vmul.f32 %v1479_v8, %v1479_v8 }
 0x14e   :  { %v1512_v60 = vmul.f32 %v1480_v18, %v1480_v18  ;;  %v1513_v22 = vmul.f32 %v1481_v40, %v1481_v40  ;;  %v1514_v63 = vmul.f32 %v1482_v57, %v1482_v57  ;;  %v1515_v15 = vmul.f32 %v1483_v33, %v1483_v33  ;;  %v4769_v40 = vld [vmem:[#allocation8 + $0x400] sm:$0xff] }
 0x14f   :  { %v1516_v25 = vmul.f32 %v1484_v20, %v1484_v20  ;;  %v1517_v59 = vmul.f32 %v1485_v27, %v1485_v27  ;;  %v1518_v3 = vmul.f32 %v1486_v62, %v1486_v62  ;;  %v1519_v6 = vmul.f32 %v1487_v31, %v1487_v31  ;;  %v1575_v57 = vld [vmem:[#allocation3 + $0x400] sm:$0xff] }
 0x150   :  { %v1520_v51 = vmul.f32 %v1488_v5, %v1488_v5  ;;  %v1521_v19 = vmul.f32 %v1489_v55, %v1489_v55  ;;  %v1522_v16 = vmul.f32 %v1490_v49, %v1490_v49  ;;  %v1523_v39 = vmul.f32 %v1491_v54, %v1491_v54  ;;  %v4774_v55 = vld [vmem:[#allocation8 + $0x408] sm:$0xff]  ;;  %v4776_v49 = vld [vmem:[#allocation8 + $0x410] sm:$0xff]  ;;  %v4778_v54 = vld [vmem:[#allocation8 + $0x418] sm:$0xff] }
 0x151   :  { %v1524_v46 = vmul.f32 %v1492_v29, %v1492_v29  ;;  %v1525_v35 = vmul.f32 %v1493_v11, %v1493_v11  ;;  %v1526_v14 = vmul.f32 %v1494_v58, %v1494_v58  ;;  %v1527_v24 = vadd.f32 %v1511_v52, %v1495_v7  ;;  %v4780_v29 = vld [vmem:[#allocation8 + $0x420] sm:$0xff]  ;;  %v1576_v11 = vld [vmem:[#allocation3 + $0x408] sm:$0xff]  ;;  %v1577_v58 = vld [vmem:[#allocation3 + $0x410] sm:$0xff] }
 0x152   :  { %v1528_v48 = vadd.f32 %v1512_v60, %v1496_v45  ;;  %v1529_v37 = vadd.f32 %v1513_v22, %v1497_v28  ;;  %v1530_v47 = vadd.f32 %v1514_v63, %v1498_v26  ;;  %v1531_v8 = vadd.f32 %v1515_v15, %v1499_v0  ;;  %v1578_v7 = vld [vmem:[#allocation3 + $0x418] sm:$0xff]  ;;  %v1579_v45 = vld [vmem:[#allocation3 + $0x420] sm:$0xff]  ;;  %v1585_v63 = vld [vmem:[#allocation3 + $0x450] sm:$0xff] }
 0x153   :  { %v1532_v34 = vadd.f32 %v1516_v25, %v1500_v38  ;;  %v1533_v56 = vadd.f32 %v1517_v59, %v1501_v43  ;;  %v1534_v13 = vadd.f32 %v1518_v3, %v1502_v12  ;;  %v1535_v33 = vadd.f32 %v1519_v6, %v1503_v23  ;;  %v4794_v38 = vld [vmem:[#allocation8 + $0x428] sm:$0xff]  ;;  %v4796_v43 = vld [vmem:[#allocation8 + $0x430] sm:$0xff]  ;;  %v4798_v12 = vld [vmem:[#allocation8 + $0x438] sm:$0xff] }
 0x154   :  { %v1536_v2 = vadd.f32 %v1520_v51, %v1504_v42  ;;  %v1537_v4 = vadd.f32 %v1521_v19, %v1505_v32  ;;  %v1538_v18 = vadd.f32 %v1522_v16, %v1506_v17  ;;  %v1539_v31 = vadd.f32 %v1523_v39, %v1507_v1  ;;  %v4800_v23 = vld [vmem:[#allocation8 + $0x440] sm:$0xff]  ;;  %v1580_v42 = vld [vmem:[#allocation3 + $0x428] sm:$0xff]  ;;  %v1582_v32 = vld [vmem:[#allocation3 + $0x438] sm:$0xff] }
 0x155   :  { %v1540_v20 = vadd.f32 %v1524_v46, %v1508_v30  ;;  %v1541_v27 = vadd.f32 %v1525_v35, %v1509_v36  ;;  %v1542_v62 = vadd.f32 %v1526_v14, %v1510_v10  ;;  %v4772_v5 = vadd.f32 %v1527_v24, %v4672_v41  ;;  %v6110_v17 = vld [vmem:[#allocation29_spill] sm:$0xff]  ;;  %v6112_v1 = vld [vmem:[#allocation18_spill] sm:$0xff]  ;;  %v4818_v52 = vld [vmem:[#allocation8 + $0x458] sm:$0xff] }
 0x156   :  { %v4783_v28 = vadd.f32 %v1528_v48, %v4683_v21  ;;  %v4786_v26 = vadd.f32 %v1529_v37, %v4686_v50  ;;  %v4789_v41 = vadd.f32 %v1530_v47, %v4689_v44  ;;  %v4792_v0 = vadd.f32 %v1531_v8, %v4692_v53  ;;  %v1581_v21 = vld [vmem:[#allocation3 + $0x430] sm:$0xff]  ;;  %v4814_v36 = vld [vmem:[#allocation8 + $0x448] sm:$0xff]  ;;  %v4820_v60 = vld [vmem:[#allocation8 + $0x460] sm:$0xff] }
 0x157   :  { %v4803_v50 = vadd.f32 %v1532_v34, %v4703_v9  ;;  %v4806_v44 = vadd.f32 %v1533_v56, %v4706_v61  ;;  %v4809_v53 = vadd.f32 %v1534_v13, %v6110_v17  ;;  %v4812_v30 = vadd.f32 %v1535_v33, %v6112_v1  ;;  %v4816_v10 = vld [vmem:[#allocation8 + $0x450] sm:$0xff]  ;;  %v1583_v22 = vld [vmem:[#allocation3 + $0x440] sm:$0xff]  ;;  %v1584_v9 = vld [vmem:[#allocation3 + $0x448] sm:$0xff] }
 0x158   :  { %v6114_v15 = vld [vmem:[#allocation24_spill] sm:$0xff]  ;;  %v6116_v25 = vld [vmem:[#allocation25_spill] sm:$0xff]  ;;  %v6118_v3 = vld [vmem:[#allocation19_spill] sm:$0xff]  ;;  %v1594_v17 = vsub.f32 %v1578_v7, %v4778_v54  ;;  %v1601_v7 = vsub.f32 %v1585_v63, %v4816_v10 }
 0x159   :  { %6111 = vst [vmem:[#allocation26_spill] sm:$0xff] %v4809_v53  ;;  %6113 = vst [vmem:[#allocation23_spill] sm:$0xff] %v4812_v30  ;;  %v4823_v61 = vadd.f32 %v1536_v2, %v6114_v15  ;;  %v4826_v59 = vadd.f32 %v1537_v4, %v6116_v25  ;;  %v4829_v6 = vadd.f32 %v1538_v18, %v6118_v3  ;;  %v6120_v51 = vld [vmem:[#allocation20_spill] sm:$0xff]  ;;  %v1572_v16 = vld [vmem:[#allocation8 + $0x468] sm:$0xff] }
 0x15a   :  { %v4832_v19 = vadd.f32 %v1539_v31, %v6120_v51  ;;  %v1573_v39 = vld [vmem:[#allocation8 + $0x470] sm:$0xff]  ;;  %v1574_v46 = vld [vmem:[#allocation8 + $0x478] sm:$0xff]  ;;  %v1587_v14 = vld [vmem:[#allocation3 + $0x460] sm:$0xff]  ;;  %v1591_v2 = vsub.f32 %v1575_v57, %v4769_v40  ;;  %v1592_v18 = vsub.f32 %v1576_v11, %v4774_v55  ;;  %v1593_v31 = vsub.f32 %v1577_v58, %v4776_v49 }
 0x15b   :  { %6115 = vst [vmem:[#allocation31_spill] sm:$0xff] %v4823_v61  ;;  %6117 = vst [vmem:[#allocation32_spill] sm:$0xff] %v4826_v59  ;;  %v1586_v35 = vld [vmem:[#allocation3 + $0x458] sm:$0xff]  ;;  %v1588_v24 = vld [vmem:[#allocation3 + $0x468] sm:$0xff]  ;;  %v1596_v25 = vsub.f32 %v1580_v42, %v4794_v38  ;;  %v1598_v3 = vsub.f32 %v1582_v32, %v4798_v12  ;;  %v1599_v57 = vsub.f32 %v1583_v22, %v4800_v23 }
 0x15c   :  { %6119 = vst [vmem:[#allocation33_spill] sm:$0xff] %v4829_v6  ;;  %6121 = vst [vmem:[#allocation34_spill] sm:$0xff] %v4832_v19  ;;  %v6122_v48 = vld [vmem:[#allocation21_spill] sm:$0xff]  ;;  %v6124_v47 = vld [vmem:[#allocation22_spill] sm:$0xff]  ;;  %v1600_v58 = vsub.f32 %v1584_v9, %v4814_v36 }
 0x15d   :  { %v4835_v37 = vadd.f32 %v1540_v20, %v6122_v48  ;;  %v4838_v8 = vadd.f32 %v1541_v27, %v6124_v47  ;;  %v6126_v34 = vld [vmem:[#allocation30_spill] sm:$0xff]  ;;  %v1590_v33 = vld [vmem:[#allocation3 + $0x478] sm:$0xff]  ;;  %v1607_v4 = vld [vmem:[#allocation6 + $0x400] sm:$0xff]  ;;  %v1595_v20 = vsub.f32 %v1579_v45, %v4780_v29  ;;  %v1602_v45 = vsub.f32 %v1586_v35, %v4818_v52 }
 0x15e   :  { %v4841_v56 = vadd.f32 %v1542_v62, %v6126_v34  ;;  %v1589_v13 = vld [vmem:[#allocation3 + $0x470] sm:$0xff]  ;;  %v1608_v1 = vld [vmem:[#allocation6 + $0x408] sm:$0xff]  ;;  %v1610_v27 = vld [vmem:[#allocation6 + $0x418] sm:$0xff]  ;;  %v1597_v62 = vsub.f32 %v1581_v21, %v4796_v43  ;;  %v1603_v47 = vsub.f32 %v1587_v14, %v4820_v60  ;;  %v1623_v6 = vsub.f32 %v1607_v4, %v4769_v40 }
 0x15f   :  { %6123 = vst [vmem:[#allocation35_spill] sm:$0xff] %v4835_v37  ;;  %6125 = vst [vmem:[#allocation36_spill] sm:$0xff] %v4838_v8  ;;  %v1609_v15 = vld [vmem:[#allocation6 + $0x410] sm:$0xff]  ;;  %v1611_v51 = vld [vmem:[#allocation6 + $0x420] sm:$0xff]  ;;  %v1604_v8 = vsub.f32 %v1588_v24, %v1572_v16  ;;  %v1605_v21 = vsub.f32 %v1589_v13, %v1573_v39  ;;  %v1606_v37 = vsub.f32 %v1590_v33, %v1574_v46 }
 0x160   :  { %6127 = vst [vmem:[#allocation27_spill] sm:$0xff] %v4841_v56  ;;  %v1612_v48 = vld [vmem:[#allocation6 + $0x428] sm:$0xff]  ;;  %v1613_v11 = vld [vmem:[#allocation6 + $0x430] sm:$0xff]  ;;  %v1614_v34 = vld [vmem:[#allocation6 + $0x438] sm:$0xff]  ;;  %v1624_v63 = vsub.f32 %v1608_v1, %v4774_v55  ;;  %v1625_v35 = vsub.f32 %v1609_v15, %v4776_v49  ;;  %v1626_v14 = vsub.f32 %v1610_v27, %v4778_v54  ;;  %v1627_v30 = vsub.f32 %v1611_v51, %v4780_v29 }
 0x161   :  { %v1615_v56 = vld [vmem:[#allocation6 + $0x440] sm:$0xff]  ;;  %v1616_v42 = vld [vmem:[#allocation6 + $0x448] sm:$0xff]  ;;  %v1617_v32 = vld [vmem:[#allocation6 + $0x450] sm:$0xff]  ;;  %v1628_v24 = vsub.f32 %v1612_v48, %v4794_v38  ;;  %v1629_v13 = vsub.f32 %v1613_v11, %v4796_v43  ;;  %v1630_v33 = vsub.f32 %v1614_v34, %v4798_v12  ;;  %v1639_v29 = vmul.f32 %v1591_v2, %v1591_v2 }
 0x162   :  { %v1618_v19 = vld [vmem:[#allocation6 + $0x458] sm:$0xff]  ;;  %v1619_v22 = vld [vmem:[#allocation6 + $0x460] sm:$0xff]  ;;  %v1620_v59 = vld [vmem:[#allocation6 + $0x468] sm:$0xff]  ;;  %v1631_v53 = vsub.f32 %v1615_v56, %v4800_v23  ;;  %v1632_v40 = vsub.f32 %v1616_v42, %v4814_v36  ;;  %v1633_v4 = vsub.f32 %v1617_v32, %v4816_v10  ;;  %v1640_v27 = vmul.f32 %v1592_v18, %v1592_v18 }
 0x163   :  { %v1621_v61 = vld [vmem:[#allocation6 + $0x470] sm:$0xff]  ;;  %v1622_v9 = vld [vmem:[#allocation6 + $0x478] sm:$0xff]  ;;  %v1634_v55 = vsub.f32 %v1618_v19, %v4818_v52  ;;  %v1635_v49 = vsub.f32 %v1619_v22, %v4820_v60  ;;  %v1636_v1 = vsub.f32 %v1620_v59, %v1572_v16  ;;  %v1641_v38 = vmul.f32 %v1593_v31, %v1593_v31 }
 0x164   :  { %v1637_v54 = vsub.f32 %v1621_v61, %v1573_v39  ;;  %v1638_v15 = vsub.f32 %v1622_v9, %v1574_v46  ;;  %v1642_v51 = vmul.f32 %v1594_v17, %v1594_v17  ;;  %v1643_v43 = vmul.f32 %v1595_v20, %v1595_v20 }
 0x165   :  { %v1644_v48 = vmul.f32 %v1596_v25, %v1596_v25  ;;  %v1645_v12 = vmul.f32 %v1597_v62, %v1597_v62  ;;  %v1646_v11 = vmul.f32 %v1598_v3, %v1598_v3  ;;  %v1647_v23 = vmul.f32 %v1599_v57, %v1599_v57 }
 0x166   :  { %v1648_v56 = vmul.f32 %v1600_v58, %v1600_v58  ;;  %v1649_v36 = vmul.f32 %v1601_v7, %v1601_v7  ;;  %v1650_v34 = vmul.f32 %v1602_v45, %v1602_v45  ;;  %v1651_v10 = vmul.f32 %v1603_v47, %v1603_v47 }
 0x167   :  { %v1652_v42 = vmul.f32 %v1604_v8, %v1604_v8  ;;  %v1653_v52 = vmul.f32 %v1605_v21, %v1605_v21  ;;  %v1654_v19 = vmul.f32 %v1606_v37, %v1606_v37  ;;  %v1655_v60 = vmul.f32 %v1623_v6, %v1623_v6 }
 0x168   :  { %v1656_v59 = vmul.f32 %v1624_v63, %v1624_v63  ;;  %v1657_v61 = vmul.f32 %v1625_v35, %v1625_v35  ;;  %v1658_v16 = vmul.f32 %v1626_v14, %v1626_v14  ;;  %v1659_v39 = vmul.f32 %v1627_v30, %v1627_v30  ;;  %v4869_v35 = vld [vmem:[#allocation8 + $0x480] sm:$0xff] }
 0x169   :  { %v1660_v46 = vmul.f32 %v1628_v24, %v1628_v24  ;;  %v1661_v2 = vmul.f32 %v1629_v13, %v1629_v13  ;;  %v1662_v18 = vmul.f32 %v1630_v33, %v1630_v33  ;;  %v1663_v31 = vmul.f32 %v1631_v53, %v1631_v53  ;;  %v1719_v14 = vld [vmem:[#allocation3 + $0x480] sm:$0xff] }
 0x16a   :  { %v1664_v17 = vmul.f32 %v1632_v40, %v1632_v40  ;;  %v1665_v20 = vmul.f32 %v1633_v4, %v1633_v4  ;;  %v1666_v25 = vmul.f32 %v1634_v55, %v1634_v55  ;;  %v1667_v62 = vmul.f32 %v1635_v49, %v1635_v49  ;;  %v4874_v4 = vld [vmem:[#allocation8 + $0x488] sm:$0xff]  ;;  %v4876_v55 = vld [vmem:[#allocation8 + $0x490] sm:$0xff]  ;;  %v4878_v49 = vld [vmem:[#allocation8 + $0x498] sm:$0xff] }
 0x16b   :  { %v1668_v3 = vmul.f32 %v1636_v1, %v1636_v1  ;;  %v1669_v57 = vmul.f32 %v1637_v54, %v1637_v54  ;;  %v1670_v58 = vmul.f32 %v1638_v15, %v1638_v15  ;;  %v1671_v7 = vadd.f32 %v1655_v60, %v1639_v29  ;;  %v4880_v1 = vld [vmem:[#allocation8 + $0x4a0] sm:$0xff]  ;;  %v1720_v54 = vld [vmem:[#allocation3 + $0x488] sm:$0xff]  ;;  %v1721_v15 = vld [vmem:[#allocation3 + $0x490] sm:$0xff] }
 0x16c   :  { %v1672_v8 = vadd.f32 %v1656_v59, %v1640_v27  ;;  %v1673_v45 = vadd.f32 %v1657_v61, %v1641_v38  ;;  %v1674_v37 = vadd.f32 %v1658_v16, %v1642_v51  ;;  %v1675_v6 = vadd.f32 %v1659_v39, %v1643_v43  ;;  %v1722_v29 = vld [vmem:[#allocation3 + $0x498] sm:$0xff]  ;;  %v1723_v27 = vld [vmem:[#allocation3 + $0x4a0] sm:$0xff]  ;;  %v1729_v16 = vld [vmem:[#allocation3 + $0x4d0] sm:$0xff] }
 0x16d   :  { %v1676_v47 = vadd.f32 %v1660_v46, %v1644_v48  ;;  %v1677_v21 = vadd.f32 %v1661_v2, %v1645_v12  ;;  %v1678_v32 = vadd.f32 %v1662_v18, %v1646_v11  ;;  %v1679_v30 = vadd.f32 %v1663_v31, %v1647_v23  ;;  %v4894_v48 = vld [vmem:[#allocation8 + $0x4a8] sm:$0xff]  ;;  %v4896_v12 = vld [vmem:[#allocation8 + $0x4b0] sm:$0xff]  ;;  %v4898_v11 = vld [vmem:[#allocation8 + $0x4b8] sm:$0xff] }
 0x16e   :  { %v1680_v22 = vadd.f32 %v1664_v17, %v1648_v56  ;;  %v1681_v9 = vadd.f32 %v1665_v20, %v1649_v36  ;;  %v1682_v63 = vadd.f32 %v1666_v25, %v1650_v34  ;;  %v1683_v53 = vadd.f32 %v1667_v62, %v1651_v10  ;;  %v4900_v23 = vld [vmem:[#allocation8 + $0x4c0] sm:$0xff]  ;;  %v1724_v56 = vld [vmem:[#allocation3 + $0x4a8] sm:$0xff]  ;;  %v1726_v36 = vld [vmem:[#allocation3 + $0x4b8] sm:$0xff] }
 0x16f   :  { %v1684_v24 = vadd.f32 %v1668_v3, %v1652_v42  ;;  %v1685_v13 = vadd.f32 %v1669_v57, %v1653_v52  ;;  %v1686_v33 = vadd.f32 %v1670_v58, %v1654_v19  ;;  %v4872_v40 = vadd.f32 %v1671_v7, %v4772_v5  ;;  %v6128_v34 = vld [vmem:[#allocation26_spill] sm:$0xff]  ;;  %v6130_v10 = vld [vmem:[#allocation23_spill] sm:$0xff]  ;;  %v4914_v52 = vld [vmem:[#allocation8 + $0x4c8] sm:$0xff] }
 0x170   :  { %v4883_v38 = vadd.f32 %v1672_v8, %v4783_v28  ;;  %v4886_v51 = vadd.f32 %v1673_v45, %v4786_v26  ;;  %v4889_v5 = vadd.f32 %v1674_v37, %v4789_v41  ;;  %v4892_v43 = vadd.f32 %v1675_v6, %v4792_v0  ;;  %v1725_v28 = vld [vmem:[#allocation3 + $0x4b0] sm:$0xff]  ;;  %v4918_v60 = vld [vmem:[#allocation8 + $0x4d8] sm:$0xff]  ;;  %v4920_v59 = vld [vmem:[#allocation8 + $0x4e0] sm:$0xff] }
 0x171   :  { %v4903_v26 = vadd.f32 %v1676_v47, %v4803_v50  ;;  %v4906_v41 = vadd.f32 %v1677_v21, %v4806_v44  ;;  %v4909_v0 = vadd.f32 %v1678_v32, %v6128_v34  ;;  %v4912_v42 = vadd.f32 %v1679_v30, %v6130_v10  ;;  %v4916_v19 = vld [vmem:[#allocation8 + $0x4d0] sm:$0xff]  ;;  %v1727_v61 = vld [vmem:[#allocation3 + $0x4c0] sm:$0xff]  ;;  %v1728_v50 = vld [vmem:[#allocation3 + $0x4c8] sm:$0xff] }
 0x172   :  { %v6132_v39 = vld [vmem:[#allocation31_spill] sm:$0xff]  ;;  %v6134_v46 = vld [vmem:[#allocation32_spill] sm:$0xff]  ;;  %v6136_v18 = vld [vmem:[#allocation33_spill] sm:$0xff]  ;;  %v1738_v34 = vsub.f32 %v1722_v29, %v4878_v49  ;;  %v1745_v29 = vsub.f32 %v1729_v16, %v4916_v19 }
 0x173   :  { %6129 = vst [vmem:[#allocation37_spill] sm:$0xff] %v4909_v0  ;;  %6131 = vst [vmem:[#allocation38_spill] sm:$0xff] %v4912_v42  ;;  %v4923_v44 = vadd.f32 %v1680_v22, %v6132_v39  ;;  %v4926_v2 = vadd.f32 %v1681_v9, %v6134_v46  ;;  %v4929_v31 = vadd.f32 %v1682_v63, %v6136_v18  ;;  %v6138_v17 = vld [vmem:[#allocation34_spill] sm:$0xff]  ;;  %v1716_v25 = vld [vmem:[#allocation8 + $0x4e8] sm:$0xff] }
 0x174   :  { %v4932_v20 = vadd.f32 %v1683_v53, %v6138_v17  ;;  %v1717_v62 = vld [vmem:[#allocation8 + $0x4f0] sm:$0xff]  ;;  %v1718_v3 = vld [vmem:[#allocation8 + $0x4f8] sm:$0xff]  ;;  %v1731_v58 = vld [vmem:[#allocation3 + $0x4e0] sm:$0xff]  ;;  %v1735_v22 = vsub.f32 %v1719_v14, %v4869_v35  ;;  %v1736_v63 = vsub.f32 %v1720_v54, %v4874_v4  ;;  %v1737_v53 = vsub.f32 %v1721_v15, %v4876_v55 }
 0x175   :  { %6133 = vst [vmem:[#allocation39_spill] sm:$0xff] %v4923_v44  ;;  %6135 = vst [vmem:[#allocation40_spill] sm:$0xff] %v4926_v2  ;;  %v1730_v57 = vld [vmem:[#allocation3 + $0x4d8] sm:$0xff]  ;;  %v1732_v7 = vld [vmem:[#allocation3 + $0x4e8] sm:$0xff]  ;;  %v1740_v46 = vsub.f32 %v1724_v56, %v4894_v48  ;;  %v1742_v18 = vsub.f32 %v1726_v36, %v4898_v11  ;;  %v1743_v14 = vsub.f32 %v1727_v61, %v4900_v23 }
 0x176   :  { %6137 = vst [vmem:[#allocation28_spill] sm:$0xff] %v4929_v31  ;;  %6139 = vst [vmem:[#allocation29_spill] sm:$0xff] %v4932_v20  ;;  %v6140_v8 = vld [vmem:[#allocation35_spill] sm:$0xff]  ;;  %v6142_v37 = vld [vmem:[#allocation36_spill] sm:$0xff]  ;;  %v1744_v15 = vsub.f32 %v1728_v50, %v4914_v52 }
 0x177   :  { %v4935_v45 = vadd.f32 %v1684_v24, %v6140_v8  ;;  %v4938_v6 = vadd.f32 %v1685_v13, %v6142_v37  ;;  %v6144_v47 = vld [vmem:[#allocation27_spill] sm:$0xff]  ;;  %v1733_v32 = vld [vmem:[#allocation3 + $0x4f0] sm:$0xff]  ;;  %v1751_v9 = vld [vmem:[#allocation6 + $0x480] sm:$0xff]  ;;  %v1739_v24 = vsub.f32 %v1723_v27, %v4880_v1  ;;  %v1746_v27 = vsub.f32 %v1730_v57, %v4918_v60 }
 0x178   :  { %v4941_v21 = vadd.f32 %v1686_v33, %v6144_v47  ;;  %v1734_v30 = vld [vmem:[#allocation3 + $0x4f8] sm:$0xff]  ;;  %v1752_v10 = vld [vmem:[#allocation6 + $0x488] sm:$0xff]  ;;  %v1753_v39 = vld [vmem:[#allocation6 + $0x490] sm:$0xff]  ;;  %v1741_v33 = vsub.f32 %v1725_v28, %v4896_v12  ;;  %v1747_v37 = vsub.f32 %v1731_v58, %v4920_v59  ;;  %v1749_v28 = vsub.f32 %v1733_v32, %v1717_v62 }
 0x179   :  { %6141 = vst [vmem:[#allocation18_spill] sm:$0xff] %v4935_v45  ;;  %6143 = vst [vmem:[#allocation24_spill] sm:$0xff] %v4938_v6  ;;  %v1754_v13 = vld [vmem:[#allocation6 + $0x498] sm:$0xff]  ;;  %v1755_v17 = vld [vmem:[#allocation6 + $0x4a0] sm:$0xff]  ;;  %v1748_v6 = vsub.f32 %v1732_v7, %v1716_v25  ;;  %v1750_v45 = vsub.f32 %v1734_v30, %v1718_v3  ;;  %v1767_v31 = vsub.f32 %v1751_v9, %v4869_v35 }
 0x17a   :  { %6145 = vst [vmem:[#allocation25_spill] sm:$0xff] %v4941_v21  ;;  %v1756_v8 = vld [vmem:[#allocation6 + $0x4a8] sm:$0xff]  ;;  %v1757_v54 = vld [vmem:[#allocation6 + $0x4b0] sm:$0xff]  ;;  %v1758_v47 = vld [vmem:[#allocation6 + $0x4b8] sm:$0xff]  ;;  %v1768_v16 = vsub.f32 %v1752_v10, %v4874_v4  ;;  %v1769_v57 = vsub.f32 %v1753_v39, %v4876_v55  ;;  %v1770_v58 = vsub.f32 %v1754_v13, %v4878_v49  ;;  %v1771_v42 = vsub.f32 %v1755_v17, %v4880_v1 }
 0x17b   :  { %v1759_v21 = vld [vmem:[#allocation6 + $0x4c0] sm:$0xff]  ;;  %v1760_v56 = vld [vmem:[#allocation6 + $0x4c8] sm:$0xff]  ;;  %v1761_v36 = vld [vmem:[#allocation6 + $0x4d0] sm:$0xff]  ;;  %v1772_v7 = vsub.f32 %v1756_v8, %v4894_v48  ;;  %v1773_v32 = vsub.f32 %v1757_v54, %v4896_v12  ;;  %v1774_v30 = vsub.f32 %v1758_v47, %v4898_v11  ;;  %v1783_v1 = vmul.f32 %v1735_v22, %v1735_v22 }
 0x17c   :  { %v1762_v20 = vld [vmem:[#allocation6 + $0x4d8] sm:$0xff]  ;;  %v1763_v61 = vld [vmem:[#allocation6 + $0x4e0] sm:$0xff]  ;;  %v1764_v2 = vld [vmem:[#allocation6 + $0x4e8] sm:$0xff]  ;;  %v1775_v0 = vsub.f32 %v1759_v21, %v4900_v23  ;;  %v1776_v35 = vsub.f32 %v1760_v56, %v4914_v52  ;;  %v1777_v9 = vsub.f32 %v1761_v36, %v4916_v19  ;;  %v1784_v13 = vmul.f32 %v1736_v63, %v1736_v63 }
 0x17d   :  { %v1765_v44 = vld [vmem:[#allocation6 + $0x4f0] sm:$0xff]  ;;  %v1766_v50 = vld [vmem:[#allocation6 + $0x4f8] sm:$0xff]  ;;  %v1778_v4 = vsub.f32 %v1762_v20, %v4918_v60  ;;  %v1779_v55 = vsub.f32 %v1763_v61, %v4920_v59  ;;  %v1780_v10 = vsub.f32 %v1764_v2, %v1716_v25  ;;  %v1785_v48 = vmul.f32 %v1737_v53, %v1737_v53 }
 0x17e   :  { %v1781_v49 = vsub.f32 %v1765_v44, %v1717_v62  ;;  %v1782_v39 = vsub.f32 %v1766_v50, %v1718_v3  ;;  %v1786_v17 = vmul.f32 %v1738_v34, %v1738_v34  ;;  %v1787_v12 = vmul.f32 %v1739_v24, %v1739_v24 }
 0x17f   :  { %v1788_v8 = vmul.f32 %v1740_v46, %v1740_v46  ;;  %v1789_v11 = vmul.f32 %v1741_v33, %v1741_v33  ;;  %v1790_v54 = vmul.f32 %v1742_v18, %v1742_v18  ;;  %v1791_v23 = vmul.f32 %v1743_v14, %v1743_v14 }
 0x180   :  { %v1792_v21 = vmul.f32 %v1744_v15, %v1744_v15  ;;  %v1793_v52 = vmul.f32 %v1745_v29, %v1745_v29  ;;  %v1794_v47 = vmul.f32 %v1746_v27, %v1746_v27  ;;  %v1795_v19 = vmul.f32 %v1747_v37, %v1747_v37 }
 0x181   :  { %v1796_v56 = vmul.f32 %v1748_v6, %v1748_v6  ;;  %v1797_v60 = vmul.f32 %v1749_v28, %v1749_v28  ;;  %v1798_v20 = vmul.f32 %v1750_v45, %v1750_v45  ;;  %v1799_v59 = vmul.f32 %v1767_v31, %v1767_v31 }
 0x182   :  { %v1800_v2 = vmul.f32 %v1768_v16, %v1768_v16  ;;  %v1801_v44 = vmul.f32 %v1769_v57, %v1769_v57  ;;  %v1802_v25 = vmul.f32 %v1770_v58, %v1770_v58  ;;  %v1803_v62 = vmul.f32 %v1771_v42, %v1771_v42  ;;  %v4969_v57 = vld [vmem:[#allocation8 + $0x500] sm:$0xff] }
 0x183   :  { %v1804_v3 = vmul.f32 %v1772_v7, %v1772_v7  ;;  %v1805_v22 = vmul.f32 %v1773_v32, %v1773_v32  ;;  %v1806_v63 = vmul.f32 %v1774_v30, %v1774_v30  ;;  %v1807_v53 = vmul.f32 %v1775_v0, %v1775_v0  ;;  %v1863_v58 = vld [vmem:[#allocation3 + $0x500] sm:$0xff] }
 0x184   :  { %v1808_v34 = vmul.f32 %v1776_v35, %v1776_v35  ;;  %v1809_v24 = vmul.f32 %v1777_v9, %v1777_v9  ;;  %v1810_v46 = vmul.f32 %v1778_v4, %v1778_v4  ;;  %v1811_v33 = vmul.f32 %v1779_v55, %v1779_v55  ;;  %v4974_v9 = vld [vmem:[#allocation8 + $0x508] sm:$0xff]  ;;  %v4976_v4 = vld [vmem:[#allocation8 + $0x510] sm:$0xff]  ;;  %v4978_v55 = vld [vmem:[#allocation8 + $0x518] sm:$0xff] }
 0x185   :  { %v1812_v18 = vmul.f32 %v1780_v10, %v1780_v10  ;;  %v1813_v14 = vmul.f32 %v1781_v49, %v1781_v49  ;;  %v1814_v15 = vmul.f32 %v1782_v39, %v1782_v39  ;;  %v1815_v29 = vadd.f32 %v1799_v59, %v1783_v1  ;;  %v4980_v10 = vld [vmem:[#allocation8 + $0x520] sm:$0xff]  ;;  %v1864_v49 = vld [vmem:[#allocation3 + $0x508] sm:$0xff]  ;;  %v1865_v39 = vld [vmem:[#allocation3 + $0x510] sm:$0xff] }
 0x186   :  { %v1816_v6 = vadd.f32 %v1800_v2, %v1784_v13  ;;  %v1817_v27 = vadd.f32 %v1801_v44, %v1785_v48  ;;  %v1818_v45 = vadd.f32 %v1802_v25, %v1786_v17  ;;  %v1819_v31 = vadd.f32 %v1803_v62, %v1787_v12  ;;  %v1866_v1 = vld [vmem:[#allocation3 + $0x518] sm:$0xff]  ;;  %v1867_v13 = vld [vmem:[#allocation3 + $0x520] sm:$0xff]  ;;  %v1873_v25 = vld [vmem:[#allocation3 + $0x550] sm:$0xff] }
 0x187   :  { %v1820_v37 = vadd.f32 %v1804_v3, %v1788_v8  ;;  %v1821_v28 = vadd.f32 %v1805_v22, %v1789_v11  ;;  %v1822_v36 = vadd.f32 %v1806_v63, %v1790_v54  ;;  %v1823_v42 = vadd.f32 %v1807_v53, %v1791_v23  ;;  %v4994_v8 = vld [vmem:[#allocation8 + $0x528] sm:$0xff]  ;;  %v4996_v11 = vld [vmem:[#allocation8 + $0x530] sm:$0xff]  ;;  %v4998_v54 = vld [vmem:[#allocation8 + $0x538] sm:$0xff] }
 0x188   :  { %v1824_v61 = vadd.f32 %v1808_v34, %v1792_v21  ;;  %v1825_v50 = vadd.f32 %v1809_v24, %v1793_v52  ;;  %v1826_v16 = vadd.f32 %v1810_v46, %v1794_v47  ;;  %v1827_v0 = vadd.f32 %v1811_v33, %v1795_v19  ;;  %v5000_v23 = vld [vmem:[#allocation8 + $0x540] sm:$0xff]  ;;  %v1868_v21 = vld [vmem:[#allocation3 + $0x528] sm:$0xff]  ;;  %v1870_v52 = vld [vmem:[#allocation3 + $0x538] sm:$0xff] }
 0x189   :  { %v1828_v7 = vadd.f32 %v1812_v18, %v1796_v56  ;;  %v1829_v32 = vadd.f32 %v1813_v14, %v1797_v60  ;;  %v1830_v30 = vadd.f32 %v1814_v15, %v1798_v20  ;;  %v4972_v35 = vadd.f32 %v1815_v29, %v4872_v40  ;;  %v6146_v47 = vld [vmem:[#allocation37_spill] sm:$0xff]  ;;  %v6148_v19 = vld [vmem:[#allocation38_spill] sm:$0xff]  ;;  %v5018_v59 = vld [vmem:[#allocation8 + $0x558] sm:$0xff] }
 0x18a   :  { %v4983_v48 = vadd.f32 %v1816_v6, %v4883_v38  ;;  %v4986_v17 = vadd.f32 %v1817_v27, %v4886_v51  ;;  %v4989_v40 = vadd.f32 %v1818_v45, %v4889_v5  ;;  %v4992_v12 = vadd.f32 %v1819_v31, %v4892_v43  ;;  %v1869_v38 = vld [vmem:[#allocation3 + $0x530] sm:$0xff]  ;;  %v5014_v60 = vld [vmem:[#allocation8 + $0x548] sm:$0xff]  ;;  %v5020_v2 = vld [vmem:[#allocation8 + $0x560] sm:$0xff] }
 0x18b   :  { %v5003_v51 = vadd.f32 %v1820_v37, %v4903_v26  ;;  %v5006_v5 = vadd.f32 %v1821_v28, %v4906_v41  ;;  %v5009_v43 = vadd.f32 %v1822_v36, %v6146_v47  ;;  %v5012_v56 = vadd.f32 %v1823_v42, %v6148_v19  ;;  %v5016_v20 = vld [vmem:[#allocation8 + $0x550] sm:$0xff]  ;;  %v1871_v44 = vld [vmem:[#allocation3 + $0x540] sm:$0xff]  ;;  %v1872_v26 = vld [vmem:[#allocation3 + $0x548] sm:$0xff] }
 0x18c   :  { %v6150_v62 = vld [vmem:[#allocation39_spill] sm:$0xff]  ;;  %v6152_v3 = vld [vmem:[#allocation40_spill] sm:$0xff]  ;;  %v6156_v34 = vld [vmem:[#allocation29_spill] sm:$0xff]  ;;  %v1882_v47 = vsub.f32 %v1866_v1, %v4978_v55  ;;  %v1889_v1 = vsub.f32 %v1873_v25, %v5016_v20 }
 0x18d   :  { %6147 = vst [vmem:[#allocation19_spill] sm:$0xff] %v5009_v43  ;;  %6149 = vst [vmem:[#allocation20_spill] sm:$0xff] %v5012_v56  ;;  %v5023_v41 = vadd.f32 %v1824_v61, %v6150_v62  ;;  %v5026_v22 = vadd.f32 %v1825_v50, %v6152_v3  ;;  %v6154_v63 = vld [vmem:[#allocation28_spill] sm:$0xff]  ;;  %v5032_v24 = vadd.f32 %v1827_v0, %v6156_v34  ;;  %v1860_v46 = vld [vmem:[#allocation8 + $0x568] sm:$0xff] }
 0x18e   :  { %v5029_v53 = vadd.f32 %v1826_v16, %v6154_v63  ;;  %v1861_v33 = vld [vmem:[#allocation8 + $0x570] sm:$0xff]  ;;  %v1862_v18 = vld [vmem:[#allocation8 + $0x578] sm:$0xff]  ;;  %v1875_v15 = vld [vmem:[#allocation3 + $0x560] sm:$0xff]  ;;  %v1879_v61 = vsub.f32 %v1863_v58, %v4969_v57  ;;  %v1880_v16 = vsub.f32 %v1864_v49, %v4974_v9  ;;  %v1881_v0 = vsub.f32 %v1865_v39, %v4976_v4 }
 0x18f   :  { %6151 = vst [vmem:[#allocation21_spill] sm:$0xff] %v5023_v41  ;;  %6153 = vst [vmem:[#allocation22_spill] sm:$0xff] %v5026_v22  ;;  %v1874_v14 = vld [vmem:[#allocation3 + $0x558] sm:$0xff]  ;;  %v1876_v29 = vld [vmem:[#allocation3 + $0x568] sm:$0xff]  ;;  %v1884_v3 = vsub.f32 %v1868_v21, %v4994_v8  ;;  %v1886_v63 = vsub.f32 %v1870_v52, %v4998_v54  ;;  %v1887_v58 = vsub.f32 %v1871_v44, %v5000_v23 }
 0x190   :  { %6155 = vst [vmem:[#allocation30_spill] sm:$0xff] %v5029_v53  ;;  %6157 = vst [vmem:[#allocation26_spill] sm:$0xff] %v5032_v24  ;;  %v6158_v6 = vld [vmem:[#allocation18_spill] sm:$0xff]  ;;  %v6160_v45 = vld [vmem:[#allocation24_spill] sm:$0xff]  ;;  %v1888_v39 = vsub.f32 %v1872_v26, %v5014_v60 }
 0x191   :  { %v5035_v27 = vadd.f32 %v1828_v7, %v6158_v6  ;;  %v5038_v31 = vadd.f32 %v1829_v32, %v6160_v45  ;;  %v6162_v37 = vld [vmem:[#allocation25_spill] sm:$0xff]  ;;  %v1877_v36 = vld [vmem:[#allocation3 + $0x570] sm:$0xff]  ;;  %v1878_v42 = vld [vmem:[#allocation3 + $0x578] sm:$0xff]  ;;  %v1883_v7 = vsub.f32 %v1867_v13, %v4980_v10  ;;  %v1890_v13 = vsub.f32 %v1874_v14, %v5018_v59 }
 0x192   :  { %v5041_v28 = vadd.f32 %v1830_v30, %v6162_v37  ;;  %v1895_v50 = vld [vmem:[#allocation6 + $0x500] sm:$0xff]  ;;  %v1896_v19 = vld [vmem:[#allocation6 + $0x508] sm:$0xff]  ;;  %v1897_v62 = vld [vmem:[#allocation6 + $0x510] sm:$0xff]  ;;  %v1885_v30 = vsub.f32 %v1869_v38, %v4996_v11  ;;  %v1891_v45 = vsub.f32 %v1875_v15, %v5020_v2  ;;  %v1893_v38 = vsub.f32 %v1877_v36, %v1861_v33 }
 0x193   :  { %6159 = vst [vmem:[#allocation23_spill] sm:$0xff] %v5035_v27  ;;  %6161 = vst [vmem:[#allocation31_spill] sm:$0xff] %v5038_v31  ;;  %v1898_v32 = vld [vmem:[#allocation6 + $0x518] sm:$0xff]  ;;  %v1899_v34 = vld [vmem:[#allocation6 + $0x520] sm:$0xff]  ;;  %v1892_v31 = vsub.f32 %v1876_v29, %v1860_v46  ;;  %v1894_v27 = vsub.f32 %v1878_v42, %v1862_v18  ;;  %v1911_v53 = vsub.f32 %v1895_v50, %v4969_v57 }
 0x194   :  { %6163 = vst [vmem:[#allocation32_spill] sm:$0xff] %v5041_v28  ;;  %v1900_v6 = vld [vmem:[#allocation6 + $0x528] sm:$0xff]  ;;  %v1901_v49 = vld [vmem:[#allocation6 + $0x530] sm:$0xff]  ;;  %v1902_v37 = vld [vmem:[#allocation6 + $0x538] sm:$0xff]  ;;  %v1912_v25 = vsub.f32 %v1896_v19, %v4974_v9  ;;  %v1913_v14 = vsub.f32 %v1897_v62, %v4976_v4  ;;  %v1914_v15 = vsub.f32 %v1898_v32, %v4978_v55  ;;  %v1915_v56 = vsub.f32 %v1899_v34, %v4980_v10 }
 0x195   :  { %v1903_v28 = vld [vmem:[#allocation6 + $0x540] sm:$0xff]  ;;  %v1904_v21 = vld [vmem:[#allocation6 + $0x548] sm:$0xff]  ;;  %v1905_v52 = vld [vmem:[#allocation6 + $0x550] sm:$0xff]  ;;  %v1916_v29 = vsub.f32 %v1900_v6, %v4994_v8  ;;  %v1917_v36 = vsub.f32 %v1901_v49, %v4996_v11  ;;  %v1918_v42 = vsub.f32 %v1902_v37, %v4998_v54  ;;  %v1927_v10 = vmul.f32 %v1879_v61, %v1879_v61 }
 0x196   :  { %v1906_v24 = vld [vmem:[#allocation6 + $0x558] sm:$0xff]  ;;  %v1907_v44 = vld [vmem:[#allocation6 + $0x560] sm:$0xff]  ;;  %v1908_v22 = vld [vmem:[#allocation6 + $0x568] sm:$0xff]  ;;  %v1919_v43 = vsub.f32 %v1903_v28, %v5000_v23  ;;  %v1920_v57 = vsub.f32 %v1904_v21, %v5014_v60  ;;  %v1921_v50 = vsub.f32 %v1905_v52, %v5016_v20  ;;  %v1928_v32 = vmul.f32 %v1880_v16, %v1880_v16 }
 0x197   :  { %v1909_v41 = vld [vmem:[#allocation6 + $0x570] sm:$0xff]  ;;  %v1910_v26 = vld [vmem:[#allocation6 + $0x578] sm:$0xff]  ;;  %v1922_v9 = vsub.f32 %v1906_v24, %v5018_v59  ;;  %v1923_v4 = vsub.f32 %v1907_v44, %v5020_v2  ;;  %v1924_v19 = vsub.f32 %v1908_v22, %v1860_v46  ;;  %v1929_v8 = vmul.f32 %v1881_v0, %v1881_v0 }
 0x198   :  { %v1925_v55 = vsub.f32 %v1909_v41, %v1861_v33  ;;  %v1926_v62 = vsub.f32 %v1910_v26, %v1862_v18  ;;  %v1930_v34 = vmul.f32 %v1882_v47, %v1882_v47  ;;  %v1931_v11 = vmul.f32 %v1883_v7, %v1883_v7 }
 0x199   :  { %v1932_v6 = vmul.f32 %v1884_v3, %v1884_v3  ;;  %v1933_v54 = vmul.f32 %v1885_v30, %v1885_v30  ;;  %v1934_v49 = vmul.f32 %v1886_v63, %v1886_v63  ;;  %v1935_v23 = vmul.f32 %v1887_v58, %v1887_v58 }
 0x19a   :  { %v1936_v28 = vmul.f32 %v1888_v39, %v1888_v39  ;;  %v1937_v60 = vmul.f32 %v1889_v1, %v1889_v1  ;;  %v1938_v37 = vmul.f32 %v1890_v13, %v1890_v13  ;;  %v1939_v20 = vmul.f32 %v1891_v45, %v1891_v45 }
 0x19b   :  { %v1940_v21 = vmul.f32 %v1892_v31, %v1892_v31  ;;  %v1941_v59 = vmul.f32 %v1893_v38, %v1893_v38  ;;  %v1942_v24 = vmul.f32 %v1894_v27, %v1894_v27  ;;  %v1943_v2 = vmul.f32 %v1911_v53, %v1911_v53 }
 0x19c   :  { %v1944_v22 = vmul.f32 %v1912_v25, %v1912_v25  ;;  %v1945_v41 = vmul.f32 %v1913_v14, %v1913_v14  ;;  %v1946_v46 = vmul.f32 %v1914_v15, %v1914_v15  ;;  %v1947_v33 = vmul.f32 %v1915_v56, %v1915_v56  ;;  %v5069_v14 = vld [vmem:[#allocation8 + $0x580] sm:$0xff] }
 0x19d   :  { %v1948_v18 = vmul.f32 %v1916_v29, %v1916_v29  ;;  %v1949_v61 = vmul.f32 %v1917_v36, %v1917_v36  ;;  %v1950_v16 = vmul.f32 %v1918_v42, %v1918_v42  ;;  %v1951_v0 = vmul.f32 %v1919_v43, %v1919_v43  ;;  %v2007_v15 = vld [vmem:[#allocation3 + $0x580] sm:$0xff] }
 0x19e   :  { %v1952_v47 = vmul.f32 %v1920_v57, %v1920_v57  ;;  %v1953_v7 = vmul.f32 %v1921_v50, %v1921_v50  ;;  %v1954_v3 = vmul.f32 %v1922_v9, %v1922_v9  ;;  %v1955_v30 = vmul.f32 %v1923_v4, %v1923_v4  ;;  %v5074_v50 = vld [vmem:[#allocation8 + $0x588] sm:$0xff]  ;;  %v5076_v9 = vld [vmem:[#allocation8 + $0x590] sm:$0xff]  ;;  %v5078_v4 = vld [vmem:[#allocation8 + $0x598] sm:$0xff] }
 0x19f   :  { %v1956_v63 = vmul.f32 %v1924_v19, %v1924_v19  ;;  %v1957_v58 = vmul.f32 %v1925_v55, %v1925_v55  ;;  %v1958_v39 = vmul.f32 %v1926_v62, %v1926_v62  ;;  %v1959_v1 = vadd.f32 %v1943_v2, %v1927_v10  ;;  %v5080_v19 = vld [vmem:[#allocation8 + $0x5a0] sm:$0xff]  ;;  %v2008_v55 = vld [vmem:[#allocation3 + $0x588] sm:$0xff]  ;;  %v2009_v62 = vld [vmem:[#allocation3 + $0x590] sm:$0xff] }
 0x1a0   :  { %v1960_v31 = vadd.f32 %v1944_v22, %v1928_v32  ;;  %v1961_v13 = vadd.f32 %v1945_v41, %v1929_v8  ;;  %v1962_v27 = vadd.f32 %v1946_v46, %v1930_v34  ;;  %v1963_v53 = vadd.f32 %v1947_v33, %v1931_v11  ;;  %v2010_v10 = vld [vmem:[#allocation3 + $0x598] sm:$0xff]  ;;  %v2011_v32 = vld [vmem:[#allocation3 + $0x5a0] sm:$0xff]  ;;  %v2017_v46 = vld [vmem:[#allocation3 + $0x5d0] sm:$0xff] }
 0x1a1   :  { %v1964_v45 = vadd.f32 %v1948_v18, %v1932_v6  ;;  %v1965_v38 = vadd.f32 %v1949_v61, %v1933_v54  ;;  %v1966_v52 = vadd.f32 %v1950_v16, %v1934_v49  ;;  %v1967_v56 = vadd.f32 %v1951_v0, %v1935_v23  ;;  %v5094_v6 = vld [vmem:[#allocation8 + $0x5a8] sm:$0xff]  ;;  %v5096_v54 = vld [vmem:[#allocation8 + $0x5b0] sm:$0xff]  ;;  %v5098_v49 = vld [vmem:[#allocation8 + $0x5b8] sm:$0xff] }
 0x1a2   :  { %v1968_v44 = vadd.f32 %v1952_v47, %v1936_v28  ;;  %v1969_v26 = vadd.f32 %v1953_v7, %v1937_v60  ;;  %v1970_v25 = vadd.f32 %v1954_v3, %v1938_v37  ;;  %v1971_v43 = vadd.f32 %v1955_v30, %v1939_v20  ;;  %v5100_v23 = vld [vmem:[#allocation8 + $0x5c0] sm:$0xff]  ;;  %v2012_v28 = vld [vmem:[#allocation3 + $0x5a8] sm:$0xff]  ;;  %v2014_v60 = vld [vmem:[#allocation3 + $0x5b8] sm:$0xff] }
 0x1a3   :  { %v1972_v29 = vadd.f32 %v1956_v63, %v1940_v21  ;;  %v1973_v36 = vadd.f32 %v1957_v58, %v1941_v59  ;;  %v1974_v42 = vadd.f32 %v1958_v39, %v1942_v24  ;;  %v5072_v57 = vadd.f32 %v1959_v1, %v4972_v35  ;;  %v6164_v37 = vld [vmem:[#allocation19_spill] sm:$0xff]  ;;  %v6166_v20 = vld [vmem:[#allocation20_spill] sm:$0xff]  ;;  %v5114_v59 = vld [vmem:[#allocation8 + $0x5c8] sm:$0xff] }
 0x1a4   :  { %v5083_v8 = vadd.f32 %v1960_v31, %v4983_v48  ;;  %v5086_v34 = vadd.f32 %v1961_v13, %v4986_v17  ;;  %v5089_v35 = vadd.f32 %v1962_v27, %v4989_v40  ;;  %v5092_v11 = vadd.f32 %v1963_v53, %v4992_v12  ;;  %v2013_v48 = vld [vmem:[#allocation3 + $0x5b0] sm:$0xff]  ;;  %v5118_v2 = vld [vmem:[#allocation8 + $0x5d8] sm:$0xff]  ;;  %v5120_v22 = vld [vmem:[#allocation8 + $0x5e0] sm:$0xff] }
 0x1a5   :  { %v5103_v17 = vadd.f32 %v1964_v45, %v5003_v51  ;;  %v5106_v40 = vadd.f32 %v1965_v38, %v5006_v5  ;;  %v5109_v12 = vadd.f32 %v1966_v52, %v6164_v37  ;;  %v5112_v21 = vadd.f32 %v1967_v56, %v6166_v20  ;;  %v5116_v24 = vld [vmem:[#allocation8 + $0x5d0] sm:$0xff]  ;;  %v2015_v41 = vld [vmem:[#allocation3 + $0x5c0] sm:$0xff]  ;;  %v2016_v51 = vld [vmem:[#allocation3 + $0x5c8] sm:$0xff] }
 0x1a6   :  { %v6168_v33 = vld [vmem:[#allocation21_spill] sm:$0xff]  ;;  %v6170_v18 = vld [vmem:[#allocation22_spill] sm:$0xff]  ;;  %v2006_v63 = vld [vmem:[#allocation8 + $0x5f8] sm:$0xff]  ;;  %v2026_v37 = vsub.f32 %v2010_v10, %v5078_v4  ;;  %v2033_v10 = vsub.f32 %v2017_v46, %v5116_v24 }
 0x1a7   :  { %6165 = vst [vmem:[#allocation33_spill] sm:$0xff] %v5109_v12  ;;  %6167 = vst [vmem:[#allocation34_spill] sm:$0xff] %v5112_v21  ;;  %v5123_v5 = vadd.f32 %v1968_v44, %v6168_v33  ;;  %v5126_v61 = vadd.f32 %v1969_v26, %v6170_v18  ;;  %v6172_v16 = vld [vmem:[#allocation30_spill] sm:$0xff]  ;;  %v2004_v3 = vld [vmem:[#allocation8 + $0x5e8] sm:$0xff]  ;;  %v2023_v44 = vsub.f32 %v2007_v15, %v5069_v14 }
 0x1a8   :  { %v5129_v0 = vadd.f32 %v1970_v25, %v6172_v16  ;;  %v6174_v47 = vld [vmem:[#allocation26_spill] sm:$0xff]  ;;  %v2018_v58 = vld [vmem:[#allocation3 + $0x5d8] sm:$0xff]  ;;  %v2019_v39 = vld [vmem:[#allocation3 + $0x5e0] sm:$0xff]  ;;  %v2024_v25 = vsub.f32 %v2008_v55, %v5074_v50  ;;  %v2028_v18 = vsub.f32 %v2012_v28, %v5094_v6  ;;  %v2030_v16 = vsub.f32 %v2014_v60, %v5098_v49 }
 0x1a9   :  { %6169 = vst [vmem:[#allocation35_spill] sm:$0xff] %v5123_v5  ;;  %6171 = vst [vmem:[#allocation36_spill] sm:$0xff] %v5126_v61  ;;  %v5132_v7 = vadd.f32 %v1971_v43, %v6174_v47  ;;  %v2005_v30 = vld [vmem:[#allocation8 + $0x5f0] sm:$0xff]  ;;  %v2020_v1 = vld [vmem:[#allocation3 + $0x5e8] sm:$0xff]  ;;  %v2025_v43 = vsub.f32 %v2009_v62, %v5076_v9  ;;  %v2031_v15 = vsub.f32 %v2015_v41, %v5100_v23 }
 0x1aa   :  { %6173 = vst [vmem:[#allocation27_spill] sm:$0xff] %v5129_v0  ;;  %v6176_v31 = vld [vmem:[#allocation23_spill] sm:$0xff]  ;;  %v6180_v45 = vld [vmem:[#allocation32_spill] sm:$0xff]  ;;  %v2021_v52 = vld [vmem:[#allocation3 + $0x5f0] sm:$0xff]  ;;  %v2032_v62 = vsub.f32 %v2016_v51, %v5114_v59 }
 0x1ab   :  { %6175 = vst [vmem:[#allocation37_spill] sm:$0xff] %v5132_v7  ;;  %v5135_v13 = vadd.f32 %v1972_v29, %v6176_v31  ;;  %v6178_v27 = vld [vmem:[#allocation31_spill] sm:$0xff]  ;;  %v5141_v38 = vadd.f32 %v1974_v42, %v6180_v45  ;;  %v2039_v26 = vld [vmem:[#allocation6 + $0x580] sm:$0xff]  ;;  %v2027_v29 = vsub.f32 %v2011_v32, %v5080_v19  ;;  %v2040_v20 = vld [vmem:[#allocation6 + $0x588] sm:$0xff]  ;;  %v2029_v42 = vsub.f32 %v2013_v48, %v5096_v54 }
 0x1ac   :  { %v5138_v53 = vadd.f32 %v1973_v36, %v6178_v27  ;;  %v2022_v56 = vld [vmem:[#allocation3 + $0x5f8] sm:$0xff]  ;;  %v2041_v33 = vld [vmem:[#allocation6 + $0x590] sm:$0xff]  ;;  %v2043_v47 = vld [vmem:[#allocation6 + $0x5a0] sm:$0xff]  ;;  %v2034_v32 = vsub.f32 %v2018_v58, %v5118_v2  ;;  %v2035_v27 = vsub.f32 %v2019_v39, %v5120_v22  ;;  %v2037_v48 = vsub.f32 %v2021_v52, %v2005_v30 }
 0x1ad   :  { %6177 = vst [vmem:[#allocation38_spill] sm:$0xff] %v5135_v13  ;;  %6181 = vst [vmem:[#allocation40_spill] sm:$0xff] %v5141_v38  ;;  %v2042_v36 = vld [vmem:[#allocation6 + $0x598] sm:$0xff]  ;;  %v2044_v31 = vld [vmem:[#allocation6 + $0x5a8] sm:$0xff]  ;;  %v2038_v13 = vsub.f32 %v2022_v56, %v2006_v63  ;;  %v2055_v0 = vsub.f32 %v2039_v26, %v5069_v14  ;;  %v2056_v46 = vsub.f32 %v2040_v20, %v5074_v50 }
 0x1ae   :  { %6179 = vst [vmem:[#allocation39_spill] sm:$0xff] %v5138_v53  ;;  %v2045_v55 = vld [vmem:[#allocation6 + $0x5b0] sm:$0xff]  ;;  %v2046_v45 = vld [vmem:[#allocation6 + $0x5b8] sm:$0xff]  ;;  %v2047_v38 = vld [vmem:[#allocation6 + $0x5c0] sm:$0xff]  ;;  %v2036_v53 = vsub.f32 %v2020_v1, %v2004_v3  ;;  %v2057_v58 = vsub.f32 %v2041_v33, %v5076_v9  ;;  %v2058_v39 = vsub.f32 %v2042_v36, %v5078_v4  ;;  %v2059_v21 = vsub.f32 %v2043_v47, %v5080_v19 }
 0x1af   :  { %v2048_v28 = vld [vmem:[#allocation6 + $0x5c8] sm:$0xff]  ;;  %v2049_v60 = vld [vmem:[#allocation6 + $0x5d0] sm:$0xff]  ;;  %v2050_v7 = vld [vmem:[#allocation6 + $0x5d8] sm:$0xff]  ;;  %v2060_v1 = vsub.f32 %v2044_v31, %v5094_v6  ;;  %v2061_v52 = vsub.f32 %v2045_v55, %v5096_v54  ;;  %v2062_v56 = vsub.f32 %v2046_v45, %v5098_v49  ;;  %v2063_v12 = vsub.f32 %v2047_v38, %v5100_v23 }
 0x1b0   :  { %v2051_v41 = vld [vmem:[#allocation6 + $0x5e0] sm:$0xff]  ;;  %v2052_v61 = vld [vmem:[#allocation6 + $0x5e8] sm:$0xff]  ;;  %v2053_v5 = vld [vmem:[#allocation6 + $0x5f0] sm:$0xff]  ;;  %v2064_v14 = vsub.f32 %v2048_v28, %v5114_v59  ;;  %v2065_v26 = vsub.f32 %v2049_v60, %v5116_v24  ;;  %v2066_v50 = vsub.f32 %v2050_v7, %v5118_v2  ;;  %v2071_v19 = vmul.f32 %v2023_v44, %v2023_v44 }
 0x1b1   :  { %v2054_v51 = vld [vmem:[#allocation6 + $0x5f8] sm:$0xff]  ;;  %v2067_v9 = vsub.f32 %v2051_v41, %v5120_v22  ;;  %v2068_v20 = vsub.f32 %v2052_v61, %v2004_v3  ;;  %v2069_v4 = vsub.f32 %v2053_v5, %v2005_v30  ;;  %v2072_v36 = vmul.f32 %v2024_v25, %v2024_v25 }
 0x1b2   :  { %v2070_v33 = vsub.f32 %v2054_v51, %v2006_v63  ;;  %v2073_v6 = vmul.f32 %v2025_v43, %v2025_v43  ;;  %v2074_v47 = vmul.f32 %v2026_v37, %v2026_v37  ;;  %v2075_v54 = vmul.f32 %v2027_v29, %v2027_v29 }
 0x1b3   :  { %v2076_v31 = vmul.f32 %v2028_v18, %v2028_v18  ;;  %v2077_v49 = vmul.f32 %v2029_v42, %v2029_v42  ;;  %v2078_v55 = vmul.f32 %v2030_v16, %v2030_v16  ;;  %v2079_v23 = vmul.f32 %v2031_v15, %v2031_v15 }
 0x1b4   :  { %v2080_v38 = vmul.f32 %v2032_v62, %v2032_v62  ;;  %v2081_v59 = vmul.f32 %v2033_v10, %v2033_v10  ;;  %v2082_v45 = vmul.f32 %v2034_v32, %v2034_v32  ;;  %v2083_v24 = vmul.f32 %v2035_v27, %v2035_v27 }
 0x1b5   :  { %v2084_v28 = vmul.f32 %v2036_v53, %v2036_v53  ;;  %v2085_v2 = vmul.f32 %v2037_v48, %v2037_v48  ;;  %v2086_v7 = vmul.f32 %v2038_v13, %v2038_v13  ;;  %v2087_v22 = vmul.f32 %v2055_v0, %v2055_v0 }
 0x1b6   :  { %v2088_v61 = vmul.f32 %v2056_v46, %v2056_v46  ;;  %v2089_v5 = vmul.f32 %v2057_v58, %v2057_v58  ;;  %v2090_v3 = vmul.f32 %v2058_v39, %v2058_v39  ;;  %v2091_v30 = vmul.f32 %v2059_v21, %v2059_v21  ;;  %v5169_v58 = vld [vmem:[#allocation8 + $0x600] sm:$0xff] }
 0x1b7   :  { %v2092_v63 = vmul.f32 %v2060_v1, %v2060_v1  ;;  %v2093_v44 = vmul.f32 %v2061_v52, %v2061_v52  ;;  %v2094_v25 = vmul.f32 %v2062_v56, %v2062_v56  ;;  %v2095_v43 = vmul.f32 %v2063_v12, %v2063_v12  ;;  %v2151_v39 = vld [vmem:[#allocation3 + $0x600] sm:$0xff] }
 0x1b8   :  { %v2096_v37 = vmul.f32 %v2064_v14, %v2064_v14  ;;  %v2097_v29 = vmul.f32 %v2065_v26, %v2065_v26  ;;  %v2098_v18 = vmul.f32 %v2066_v50, %v2066_v50  ;;  %v2099_v42 = vmul.f32 %v2067_v9, %v2067_v9  ;;  %v5174_v26 = vld [vmem:[#allocation8 + $0x608] sm:$0xff]  ;;  %v5176_v50 = vld [vmem:[#allocation8 + $0x610] sm:$0xff]  ;;  %v5178_v9 = vld [vmem:[#allocation8 + $0x618] sm:$0xff] }
 0x1b9   :  { %v2100_v16 = vmul.f32 %v2068_v20, %v2068_v20  ;;  %v2101_v15 = vmul.f32 %v2069_v4, %v2069_v4  ;;  %v2102_v62 = vmul.f32 %v2070_v33, %v2070_v33  ;;  %v2103_v10 = vadd.f32 %v2087_v22, %v2071_v19  ;;  %v5180_v20 = vld [vmem:[#allocation8 + $0x620] sm:$0xff]  ;;  %v2152_v4 = vld [vmem:[#allocation3 + $0x608] sm:$0xff]  ;;  %v2153_v33 = vld [vmem:[#allocation3 + $0x610] sm:$0xff] }
 0x1ba   :  { %v2104_v53 = vadd.f32 %v2088_v61, %v2072_v36  ;;  %v2105_v32 = vadd.f32 %v2089_v5, %v2073_v6  ;;  %v2106_v13 = vadd.f32 %v2090_v3, %v2074_v47  ;;  %v2107_v0 = vadd.f32 %v2091_v30, %v2075_v54  ;;  %v2154_v19 = vld [vmem:[#allocation3 + $0x618] sm:$0xff]  ;;  %v2155_v36 = vld [vmem:[#allocation3 + $0x620] sm:$0xff]  ;;  %v2161_v3 = vld [vmem:[#allocation3 + $0x650] sm:$0xff] }
 0x1bb   :  { %v2108_v27 = vadd.f32 %v2092_v63, %v2076_v31  ;;  %v2109_v48 = vadd.f32 %v2093_v44, %v2077_v49  ;;  %v2110_v60 = vadd.f32 %v2094_v25, %v2078_v55  ;;  %v2111_v21 = vadd.f32 %v2095_v43, %v2079_v23  ;;  %v5194_v31 = vld [vmem:[#allocation8 + $0x628] sm:$0xff]  ;;  %v5196_v49 = vld [vmem:[#allocation8 + $0x630] sm:$0xff]  ;;  %v5198_v55 = vld [vmem:[#allocation8 + $0x638] sm:$0xff] }
 0x1bc   :  { %v2112_v41 = vadd.f32 %v2096_v37, %v2080_v38  ;;  %v2113_v51 = vadd.f32 %v2097_v29, %v2081_v59  ;;  %v2114_v46 = vadd.f32 %v2098_v18, %v2082_v45  ;;  %v2115_v12 = vadd.f32 %v2099_v42, %v2083_v24  ;;  %v5200_v23 = vld [vmem:[#allocation8 + $0x640] sm:$0xff]  ;;  %v2156_v38 = vld [vmem:[#allocation3 + $0x628] sm:$0xff]  ;;  %v2158_v59 = vld [vmem:[#allocation3 + $0x638] sm:$0xff] }
 0x1bd   :  { %v2116_v1 = vadd.f32 %v2100_v16, %v2084_v28  ;;  %v2117_v52 = vadd.f32 %v2101_v15, %v2085_v2  ;;  %v2118_v56 = vadd.f32 %v2102_v62, %v2086_v7  ;;  %v5172_v14 = vadd.f32 %v2103_v10, %v5072_v57  ;;  %v6182_v45 = vld [vmem:[#allocation33_spill] sm:$0xff]  ;;  %v6184_v24 = vld [vmem:[#allocation34_spill] sm:$0xff]  ;;  %v5218_v22 = vld [vmem:[#allocation8 + $0x658] sm:$0xff] }
 0x1be   :  { %v5183_v6 = vadd.f32 %v2104_v53, %v5083_v8  ;;  %v5186_v47 = vadd.f32 %v2105_v32, %v5086_v34  ;;  %v5189_v57 = vadd.f32 %v2106_v13, %v5089_v35  ;;  %v5192_v54 = vadd.f32 %v2107_v0, %v5092_v11  ;;  %v2157_v8 = vld [vmem:[#allocation3 + $0x630] sm:$0xff]  ;;  %v5214_v2 = vld [vmem:[#allocation8 + $0x648] sm:$0xff]  ;;  %v5220_v61 = vld [vmem:[#allocation8 + $0x660] sm:$0xff] }
 0x1bf   :  { %v5203_v34 = vadd.f32 %v2108_v27, %v5103_v17  ;;  %v5206_v35 = vadd.f32 %v2109_v48, %v5106_v40  ;;  %v5209_v11 = vadd.f32 %v2110_v60, %v6182_v45  ;;  %v5212_v28 = vadd.f32 %v2111_v21, %v6184_v24  ;;  %v5216_v7 = vld [vmem:[#allocation8 + $0x650] sm:$0xff]  ;;  %v2159_v5 = vld [vmem:[#allocation3 + $0x640] sm:$0xff]  ;;  %v2160_v17 = vld [vmem:[#allocation3 + $0x648] sm:$0xff] }
 0x1c0   :  { %v6186_v30 = vld [vmem:[#allocation35_spill] sm:$0xff]  ;;  %v6188_v63 = vld [vmem:[#allocation36_spill] sm:$0xff]  ;;  %v6192_v37 = vld [vmem:[#allocation37_spill] sm:$0xff]  ;;  %v2170_v45 = vsub.f32 %v2154_v19, %v5178_v9  ;;  %v2177_v19 = vsub.f32 %v2161_v3, %v5216_v7 }
 0x1c1   :  { %6183 = vst [vmem:[#allocation28_spill] sm:$0xff] %v5209_v11  ;;  %6185 = vst [vmem:[#allocation29_spill] sm:$0xff] %v5212_v28  ;;  %v5223_v40 = vadd.f32 %v2112_v41, %v6186_v30  ;;  %v5226_v44 = vadd.f32 %v2113_v51, %v6188_v63  ;;  %v6190_v25 = vld [vmem:[#allocation27_spill] sm:$0xff]  ;;  %v5232_v29 = vadd.f32 %v2115_v12, %v6192_v37  ;;  %v2148_v18 = vld [vmem:[#allocation8 + $0x668] sm:$0xff] }
 0x1c2   :  { %v5229_v43 = vadd.f32 %v2114_v46, %v6190_v25  ;;  %v2149_v42 = vld [vmem:[#allocation8 + $0x670] sm:$0xff]  ;;  %v2150_v16 = vld [vmem:[#allocation8 + $0x678] sm:$0xff]  ;;  %v2163_v62 = vld [vmem:[#allocation3 + $0x660] sm:$0xff]  ;;  %v2167_v41 = vsub.f32 %v2151_v39, %v5169_v58  ;;  %v2168_v46 = vsub.f32 %v2152_v4, %v5174_v26  ;;  %v2169_v12 = vsub.f32 %v2153_v33, %v5176_v50 }
 0x1c3   :  { %6187 = vst [vmem:[#allocation18_spill] sm:$0xff] %v5223_v40  ;;  %6189 = vst [vmem:[#allocation24_spill] sm:$0xff] %v5226_v44  ;;  %v2162_v15 = vld [vmem:[#allocation3 + $0x658] sm:$0xff]  ;;  %v2164_v10 = vld [vmem:[#allocation3 + $0x668] sm:$0xff]  ;;  %v2172_v63 = vsub.f32 %v2156_v38, %v5194_v31  ;;  %v2174_v25 = vsub.f32 %v2158_v59, %v5198_v55  ;;  %v2175_v39 = vsub.f32 %v2159_v5, %v5200_v23 }
 0x1c4   :  { %6191 = vst [vmem:[#allocation25_spill] sm:$0xff] %v5229_v43  ;;  %6193 = vst [vmem:[#allocation19_spill] sm:$0xff] %v5232_v29  ;;  %v6194_v53 = vld [vmem:[#allocation38_spill] sm:$0xff]  ;;  %v6196_v13 = vld [vmem:[#allocation39_spill] sm:$0xff]  ;;  %v2176_v33 = vsub.f32 %v2160_v17, %v5214_v2 }
 0x1c5   :  { %v5235_v32 = vadd.f32 %v2116_v1, %v6194_v53  ;;  %v5238_v0 = vadd.f32 %v2117_v52, %v6196_v13  ;;  %v6198_v27 = vld [vmem:[#allocation40_spill] sm:$0xff]  ;;  %v2165_v60 = vld [vmem:[#allocation3 + $0x670] sm:$0xff]  ;;  %v2166_v21 = vld [vmem:[#allocation3 + $0x678] sm:$0xff]  ;;  %v2171_v1 = vsub.f32 %v2155_v36, %v5180_v20  ;;  %v2178_v36 = vsub.f32 %v2162_v15, %v5218_v22 }
 0x1c6   :  { %v5241_v48 = vadd.f32 %v2118_v56, %v6198_v27  ;;  %v2183_v51 = vld [vmem:[#allocation6 + $0x600] sm:$0xff]  ;;  %v2184_v24 = vld [vmem:[#allocation6 + $0x608] sm:$0xff]  ;;  %v2185_v30 = vld [vmem:[#allocation6 + $0x610] sm:$0xff]  ;;  %v2173_v56 = vsub.f32 %v2157_v8, %v5196_v49  ;;  %v2179_v13 = vsub.f32 %v2163_v62, %v5220_v61  ;;  %v2181_v8 = vsub.f32 %v2165_v60, %v2149_v42 }
 0x1c7   :  { %6195 = vst [vmem:[#allocation20_spill] sm:$0xff] %v5235_v32  ;;  %6197 = vst [vmem:[#allocation21_spill] sm:$0xff] %v5238_v0  ;;  %v2186_v52 = vld [vmem:[#allocation6 + $0x618] sm:$0xff]  ;;  %v2187_v37 = vld [vmem:[#allocation6 + $0x620] sm:$0xff]  ;;  %v2180_v0 = vsub.f32 %v2164_v10, %v2148_v18  ;;  %v2182_v32 = vsub.f32 %v2166_v21, %v2150_v16  ;;  %v2199_v43 = vsub.f32 %v2183_v51, %v5169_v58 }
 0x1c8   :  { %6199 = vst [vmem:[#allocation22_spill] sm:$0xff] %v5241_v48  ;;  %v2188_v53 = vld [vmem:[#allocation6 + $0x628] sm:$0xff]  ;;  %v2189_v4 = vld [vmem:[#allocation6 + $0x630] sm:$0xff]  ;;  %v2190_v27 = vld [vmem:[#allocation6 + $0x638] sm:$0xff]  ;;  %v2200_v3 = vsub.f32 %v2184_v24, %v5174_v26  ;;  %v2201_v15 = vsub.f32 %v2185_v30, %v5176_v50  ;;  %v2202_v62 = vsub.f32 %v2186_v52, %v5178_v9  ;;  %v2203_v28 = vsub.f32 %v2187_v37, %v5180_v20 }
 0x1c9   :  { %v2191_v48 = vld [vmem:[#allocation6 + $0x640] sm:$0xff]  ;;  %v2192_v38 = vld [vmem:[#allocation6 + $0x648] sm:$0xff]  ;;  %v2193_v59 = vld [vmem:[#allocation6 + $0x650] sm:$0xff]  ;;  %v2204_v10 = vsub.f32 %v2188_v53, %v5194_v31  ;;  %v2205_v60 = vsub.f32 %v2189_v4, %v5196_v49  ;;  %v2206_v21 = vsub.f32 %v2190_v27, %v5198_v55  ;;  %v2215_v20 = vmul.f32 %v2167_v41, %v2167_v41 }
 0x1ca   :  { %v2194_v29 = vld [vmem:[#allocation6 + $0x658] sm:$0xff]  ;;  %v2195_v5 = vld [vmem:[#allocation6 + $0x660] sm:$0xff]  ;;  %v2196_v44 = vld [vmem:[#allocation6 + $0x668] sm:$0xff]  ;;  %v2207_v11 = vsub.f32 %v2191_v48, %v5200_v23  ;;  %v2208_v58 = vsub.f32 %v2192_v38, %v5214_v2  ;;  %v2209_v51 = vsub.f32 %v2193_v59, %v5216_v7  ;;  %v2216_v52 = vmul.f32 %v2168_v46, %v2168_v46 }
 0x1cb   :  { %v2197_v40 = vld [vmem:[#allocation6 + $0x670] sm:$0xff]  ;;  %v2198_v17 = vld [vmem:[#allocation6 + $0x678] sm:$0xff]  ;;  %v2210_v26 = vsub.f32 %v2194_v29, %v5218_v22  ;;  %v2211_v50 = vsub.f32 %v2195_v5, %v5220_v61  ;;  %v2212_v24 = vsub.f32 %v2196_v44, %v2148_v18  ;;  %v2217_v31 = vmul.f32 %v2169_v12, %v2169_v12 }
 0x1cc   :  { %v2213_v9 = vsub.f32 %v2197_v40, %v2149_v42  ;;  %v2214_v30 = vsub.f32 %v2198_v17, %v2150_v16  ;;  %v2218_v37 = vmul.f32 %v2170_v45, %v2170_v45  ;;  %v2219_v49 = vmul.f32 %v2171_v1, %v2171_v1 }
 0x1cd   :  { %v2220_v53 = vmul.f32 %v2172_v63, %v2172_v63  ;;  %v2221_v55 = vmul.f32 %v2173_v56, %v2173_v56  ;;  %v2222_v4 = vmul.f32 %v2174_v25, %v2174_v25  ;;  %v2223_v23 = vmul.f32 %v2175_v39, %v2175_v39 }
 0x1ce   :  { %v2224_v48 = vmul.f32 %v2176_v33, %v2176_v33  ;;  %v2225_v2 = vmul.f32 %v2177_v19, %v2177_v19  ;;  %v2226_v27 = vmul.f32 %v2178_v36, %v2178_v36  ;;  %v2227_v7 = vmul.f32 %v2179_v13, %v2179_v13 }
 0x1cf   :  { %v2228_v38 = vmul.f32 %v2180_v0, %v2180_v0  ;;  %v2229_v22 = vmul.f32 %v2181_v8, %v2181_v8  ;;  %v2230_v29 = vmul.f32 %v2182_v32, %v2182_v32  ;;  %v2231_v61 = vmul.f32 %v2199_v43, %v2199_v43 }
 0x1d0   :  { %v2232_v44 = vmul.f32 %v2200_v3, %v2200_v3  ;;  %v2233_v40 = vmul.f32 %v2201_v15, %v2201_v15  ;;  %v2234_v18 = vmul.f32 %v2202_v62, %v2202_v62  ;;  %v2235_v42 = vmul.f32 %v2203_v28, %v2203_v28  ;;  %v5269_v15 = vld [vmem:[#allocation8 + $0x680] sm:$0xff] }
 0x1d1   :  { %v2236_v16 = vmul.f32 %v2204_v10, %v2204_v10  ;;  %v2237_v41 = vmul.f32 %v2205_v60, %v2205_v60  ;;  %v2238_v46 = vmul.f32 %v2206_v21, %v2206_v21  ;;  %v2239_v12 = vmul.f32 %v2207_v11, %v2207_v11  ;;  %v2295_v62 = vld [vmem:[#allocation3 + $0x680] sm:$0xff] }
 0x1d2   :  { %v2240_v45 = vmul.f32 %v2208_v58, %v2208_v58  ;;  %v2241_v1 = vmul.f32 %v2209_v51, %v2209_v51  ;;  %v2242_v63 = vmul.f32 %v2210_v26, %v2210_v26  ;;  %v2243_v56 = vmul.f32 %v2211_v50, %v2211_v50  ;;  %v5274_v51 = vld [vmem:[#allocation8 + $0x688] sm:$0xff]  ;;  %v5276_v26 = vld [vmem:[#allocation8 + $0x690] sm:$0xff]  ;;  %v5278_v50 = vld [vmem:[#allocation8 + $0x698] sm:$0xff] }
 0x1d3   :  { %v2244_v25 = vmul.f32 %v2212_v24, %v2212_v24  ;;  %v2245_v39 = vmul.f32 %v2213_v9, %v2213_v9  ;;  %v2246_v33 = vmul.f32 %v2214_v30, %v2214_v30  ;;  %v2247_v19 = vadd.f32 %v2231_v61, %v2215_v20  ;;  %v5280_v24 = vld [vmem:[#allocation8 + $0x6a0] sm:$0xff]  ;;  %v2296_v9 = vld [vmem:[#allocation3 + $0x688] sm:$0xff]  ;;  %v2297_v30 = vld [vmem:[#allocation3 + $0x690] sm:$0xff] }
 0x1d4   :  { %v2248_v0 = vadd.f32 %v2232_v44, %v2216_v52  ;;  %v2249_v36 = vadd.f32 %v2233_v40, %v2217_v31  ;;  %v2250_v32 = vadd.f32 %v2234_v18, %v2218_v37  ;;  %v2251_v43 = vadd.f32 %v2235_v42, %v2219_v49  ;;  %v2298_v20 = vld [vmem:[#allocation3 + $0x698] sm:$0xff]  ;;  %v2299_v52 = vld [vmem:[#allocation3 + $0x6a0] sm:$0xff]  ;;  %v2304_v40 = vld [vmem:[#allocation3 + $0x6c8] sm:$0xff] }
 0x1d5   :  { %v2252_v13 = vadd.f32 %v2236_v16, %v2220_v53  ;;  %v2253_v8 = vadd.f32 %v2237_v41, %v2221_v55  ;;  %v2254_v59 = vadd.f32 %v2238_v46, %v2222_v4  ;;  %v2255_v28 = vadd.f32 %v2239_v12, %v2223_v23  ;;  %v5294_v53 = vld [vmem:[#allocation8 + $0x6a8] sm:$0xff]  ;;  %v5296_v55 = vld [vmem:[#allocation8 + $0x6b0] sm:$0xff]  ;;  %v5298_v4 = vld [vmem:[#allocation8 + $0x6b8] sm:$0xff] }
 0x1d6   :  { %v2256_v5 = vadd.f32 %v2240_v45, %v2224_v48  ;;  %v2257_v17 = vadd.f32 %v2241_v1, %v2225_v2  ;;  %v2258_v3 = vadd.f32 %v2242_v63, %v2226_v27  ;;  %v2259_v11 = vadd.f32 %v2243_v56, %v2227_v7  ;;  %v5300_v23 = vld [vmem:[#allocation8 + $0x6c0] sm:$0xff]  ;;  %v2300_v48 = vld [vmem:[#allocation3 + $0x6a8] sm:$0xff]  ;;  %v2302_v44 = vld [vmem:[#allocation3 + $0x6b8] sm:$0xff] }
 0x1d7   :  { %v2260_v10 = vadd.f32 %v2244_v25, %v2228_v38  ;;  %v2261_v60 = vadd.f32 %v2245_v39, %v2229_v22  ;;  %v2262_v21 = vadd.f32 %v2246_v33, %v2230_v29  ;;  %v5272_v58 = vadd.f32 %v2247_v19, %v5172_v14  ;;  %v5314_v38 = vld [vmem:[#allocation8 + $0x6c8] sm:$0xff]  ;;  %v5316_v22 = vld [vmem:[#allocation8 + $0x6d0] sm:$0xff]  ;;  %v5318_v29 = vld [vmem:[#allocation8 + $0x6d8] sm:$0xff] }
 0x1d8   :  { %v5283_v31 = vadd.f32 %v2248_v0, %v5183_v6  ;;  %v5286_v37 = vadd.f32 %v2249_v36, %v5186_v47  ;;  %v5289_v14 = vadd.f32 %v2250_v32, %v5189_v57  ;;  %v5292_v49 = vadd.f32 %v2251_v43, %v5192_v54  ;;  %v2301_v6 = vld [vmem:[#allocation3 + $0x6b0] sm:$0xff]  ;;  %v6200_v57 = vld [vmem:[#allocation28_spill] sm:$0xff]  ;;  %v6202_v54 = vld [vmem:[#allocation29_spill] sm:$0xff] }
 0x1d9   :  { %v5303_v2 = vadd.f32 %v2252_v13, %v5203_v34  ;;  %v5306_v47 = vadd.f32 %v2253_v8, %v5206_v35  ;;  %v5309_v27 = vadd.f32 %v2254_v59, %v6200_v57  ;;  %v5312_v7 = vadd.f32 %v2255_v28, %v6202_v54  ;;  %v5320_v61 = vld [vmem:[#allocation8 + $0x6e0] sm:$0xff]  ;;  %v6204_v18 = vld [vmem:[#allocation18_spill] sm:$0xff]  ;;  %v6208_v41 = vld [vmem:[#allocation25_spill] sm:$0xff] }
 0x1da   :  { %v2303_v34 = vld [vmem:[#allocation3 + $0x6c0] sm:$0xff]  ;;  %v5323_v35 = vadd.f32 %v2256_v5, %v6204_v18  ;;  %v5329_v46 = vadd.f32 %v2258_v3, %v6208_v41  ;;  %v6210_v12 = vld [vmem:[#allocation19_spill] sm:$0xff]  ;;  %v2292_v1 = vld [vmem:[#allocation8 + $0x6e8] sm:$0xff]  ;;  %v2312_v3 = vsub.f32 %v2296_v9, %v5274_v51  ;;  %v2314_v57 = vsub.f32 %v2298_v20, %v5278_v50 }
 0x1db   :  { %6201 = vst [vmem:[#allocation30_spill] sm:$0xff] %v5309_v27  ;;  %6203 = vst [vmem:[#allocation26_spill] sm:$0xff] %v5312_v7  ;;  %v6206_v42 = vld [vmem:[#allocation24_spill] sm:$0xff]  ;;  %v5332_v45 = vadd.f32 %v2259_v11, %v6210_v12  ;;  %v2293_v63 = vld [vmem:[#allocation8 + $0x6f0] sm:$0xff]  ;;  %v2313_v11 = vsub.f32 %v2297_v30, %v5276_v26  ;;  %v2318_v41 = vsub.f32 %v2302_v44, %v5298_v4 }
 0x1dc   :  { %6205 = vst [vmem:[#allocation23_spill] sm:$0xff] %v5323_v35  ;;  %v5326_v16 = vadd.f32 %v2257_v17, %v6206_v42  ;;  %6209 = vst [vmem:[#allocation32_spill] sm:$0xff] %v5329_v46  ;;  %v2294_v56 = vld [vmem:[#allocation8 + $0x6f8] sm:$0xff]  ;;  %v2305_v25 = vld [vmem:[#allocation3 + $0x6d0] sm:$0xff]  ;;  %v2311_v17 = vsub.f32 %v2295_v62, %v5269_v15  ;;  %v2316_v42 = vsub.f32 %v2300_v48, %v5294_v53 }
 0x1dd   :  { %6211 = vst [vmem:[#allocation33_spill] sm:$0xff] %v5332_v45  ;;  %v2306_v39 = vld [vmem:[#allocation3 + $0x6d8] sm:$0xff]  ;;  %v2307_v33 = vld [vmem:[#allocation3 + $0x6e0] sm:$0xff]  ;;  %v6214_v32 = vld [vmem:[#allocation21_spill] sm:$0xff]  ;;  %v2319_v12 = vsub.f32 %v2303_v34, %v5300_v23  ;;  %v2320_v30 = vsub.f32 %v2304_v40, %v5314_v38  ;;  %v2321_v20 = vsub.f32 %v2305_v25, %v5316_v22 }
 0x1de   :  { %6207 = vst [vmem:[#allocation31_spill] sm:$0xff] %v5326_v16  ;;  %v2327_v19 = vld [vmem:[#allocation6 + $0x680] sm:$0xff]  ;;  %v5338_v43 = vadd.f32 %v2261_v60, %v6214_v32  ;;  %v6216_v13 = vld [vmem:[#allocation22_spill] sm:$0xff]  ;;  %v2308_v59 = vld [vmem:[#allocation3 + $0x6e8] sm:$0xff]  ;;  %v2323_v32 = vsub.f32 %v2307_v33, %v5320_v61 }
 0x1df   :  { %v6212_v0 = vld [vmem:[#allocation20_spill] sm:$0xff]  ;;  %v5341_v8 = vadd.f32 %v2262_v21, %v6216_v13  ;;  %v2309_v28 = vld [vmem:[#allocation3 + $0x6f0] sm:$0xff]  ;;  %v2310_v5 = vld [vmem:[#allocation3 + $0x6f8] sm:$0xff]  ;;  %v2317_v21 = vsub.f32 %v2301_v6, %v5296_v55  ;;  %v2343_v46 = vsub.f32 %v2327_v19, %v5269_v15 }
 0x1e0   :  { %v5335_v36 = vadd.f32 %v2260_v10, %v6212_v0  ;;  %6215 = vst [vmem:[#allocation35_spill] sm:$0xff] %v5338_v43  ;;  %v2315_v10 = vsub.f32 %v2299_v52, %v5280_v24  ;;  %v2328_v54 = vld [vmem:[#allocation6 + $0x688] sm:$0xff]  ;;  %v2329_v18 = vld [vmem:[#allocation6 + $0x690] sm:$0xff]  ;;  %v2330_v60 = vld [vmem:[#allocation6 + $0x698] sm:$0xff]  ;;  %v2322_v52 = vsub.f32 %v2306_v39, %v5318_v29  ;;  %v2324_v43 = vsub.f32 %v2308_v59, %v2292_v1 }
 0x1e1   :  { %6217 = vst [vmem:[#allocation36_spill] sm:$0xff] %v5341_v8  ;;  %v2331_v62 = vld [vmem:[#allocation6 + $0x6a0] sm:$0xff]  ;;  %v2332_v0 = vld [vmem:[#allocation6 + $0x6a8] sm:$0xff]  ;;  %v2333_v9 = vld [vmem:[#allocation6 + $0x6b0] sm:$0xff]  ;;  %v2325_v6 = vsub.f32 %v2309_v28, %v2293_v63  ;;  %v2344_v25 = vsub.f32 %v2328_v54, %v5274_v51  ;;  %v2345_v39 = vsub.f32 %v2329_v18, %v5276_v26  ;;  %v2346_v33 = vsub.f32 %v2330_v60, %v5278_v50 }
 0x1e2   :  { %6213 = vst [vmem:[#allocation34_spill] sm:$0xff] %v5335_v36  ;;  %v2334_v13 = vld [vmem:[#allocation6 + $0x6b8] sm:$0xff]  ;;  %v2335_v8 = vld [vmem:[#allocation6 + $0x6c0] sm:$0xff]  ;;  %v2336_v48 = vld [vmem:[#allocation6 + $0x6c8] sm:$0xff]  ;;  %v2326_v36 = vsub.f32 %v2310_v5, %v2294_v56  ;;  %v2347_v7 = vsub.f32 %v2331_v62, %v5280_v24  ;;  %v2348_v59 = vsub.f32 %v2332_v0, %v5294_v53  ;;  %v2349_v28 = vsub.f32 %v2333_v9, %v5296_v55 }
 0x1e3   :  { %v2337_v44 = vld [vmem:[#allocation6 + $0x6d0] sm:$0xff]  ;;  %v2338_v45 = vld [vmem:[#allocation6 + $0x6d8] sm:$0xff]  ;;  %v2339_v34 = vld [vmem:[#allocation6 + $0x6e0] sm:$0xff]  ;;  %v2350_v5 = vsub.f32 %v2334_v13, %v5298_v4  ;;  %v2351_v27 = vsub.f32 %v2335_v8, %v5300_v23  ;;  %v2352_v15 = vsub.f32 %v2336_v48, %v5314_v38  ;;  %v2359_v24 = vmul.f32 %v2311_v17, %v2311_v17 }
 0x1e4   :  { %v2340_v16 = vld [vmem:[#allocation6 + $0x6e8] sm:$0xff]  ;;  %v2341_v35 = vld [vmem:[#allocation6 + $0x6f0] sm:$0xff]  ;;  %v2342_v40 = vld [vmem:[#allocation6 + $0x6f8] sm:$0xff]  ;;  %v2353_v19 = vsub.f32 %v2337_v44, %v5316_v22  ;;  %v2354_v51 = vsub.f32 %v2338_v45, %v5318_v29  ;;  %v2355_v26 = vsub.f32 %v2339_v34, %v5320_v61  ;;  %v2360_v60 = vmul.f32 %v2312_v3, %v2312_v3 }
 0x1e5   :  { %v2356_v54 = vsub.f32 %v2340_v16, %v2292_v1  ;;  %v2357_v50 = vsub.f32 %v2341_v35, %v2293_v63  ;;  %v2358_v18 = vsub.f32 %v2342_v40, %v2294_v56  ;;  %v2361_v53 = vmul.f32 %v2313_v11, %v2313_v11 }
 0x1e6   :  { %v2362_v62 = vmul.f32 %v2314_v57, %v2314_v57  ;;  %v2363_v55 = vmul.f32 %v2315_v10, %v2315_v10  ;;  %v2364_v0 = vmul.f32 %v2316_v42, %v2316_v42  ;;  %v2365_v4 = vmul.f32 %v2317_v21, %v2317_v21 }
 0x1e7   :  { %v2366_v9 = vmul.f32 %v2318_v41, %v2318_v41  ;;  %v2367_v23 = vmul.f32 %v2319_v12, %v2319_v12  ;;  %v2368_v8 = vmul.f32 %v2320_v30, %v2320_v30  ;;  %v2369_v38 = vmul.f32 %v2321_v20, %v2321_v20 }
 0x1e8   :  { %v2370_v13 = vmul.f32 %v2322_v52, %v2322_v52  ;;  %v2371_v22 = vmul.f32 %v2323_v32, %v2323_v32  ;;  %v2372_v48 = vmul.f32 %v2324_v43, %v2324_v43  ;;  %v2373_v29 = vmul.f32 %v2325_v6, %v2325_v6 }
 0x1e9   :  { %v2374_v45 = vmul.f32 %v2326_v36, %v2326_v36  ;;  %v2375_v61 = vmul.f32 %v2343_v46, %v2343_v46  ;;  %v2376_v16 = vmul.f32 %v2344_v25, %v2344_v25  ;;  %v2377_v35 = vmul.f32 %v2345_v39, %v2345_v39  ;;  %v5369_v39 = vld [vmem:[#allocation8 + $0x700] sm:$0xff] }
 0x1ea   :  { %v2378_v1 = vmul.f32 %v2346_v33, %v2346_v33  ;;  %v2379_v63 = vmul.f32 %v2347_v7, %v2347_v7  ;;  %v2380_v56 = vmul.f32 %v2348_v59, %v2348_v59  ;;  %v2381_v17 = vmul.f32 %v2349_v28, %v2349_v28  ;;  %v2439_v33 = vld [vmem:[#allocation3 + $0x700] sm:$0xff] }
 0x1eb   :  { %v2382_v3 = vmul.f32 %v2350_v5, %v2350_v5  ;;  %v2383_v11 = vmul.f32 %v2351_v27, %v2351_v27  ;;  %v2384_v57 = vmul.f32 %v2352_v15, %v2352_v15  ;;  %v2385_v10 = vmul.f32 %v2353_v19, %v2353_v19  ;;  %v5374_v19 = vld [vmem:[#allocation8 + $0x708] sm:$0xff] }
 0x1ec   :  { %v2386_v42 = vmul.f32 %v2354_v51, %v2354_v51  ;;  %v2387_v21 = vmul.f32 %v2355_v26, %v2355_v26  ;;  %v2388_v41 = vmul.f32 %v2356_v54, %v2356_v54  ;;  %v2389_v12 = vmul.f32 %v2357_v50, %v2357_v50  ;;  %v5376_v51 = vld [vmem:[#allocation8 + $0x710] sm:$0xff]  ;;  %v5378_v26 = vld [vmem:[#allocation8 + $0x718] sm:$0xff]  ;;  %v5380_v54 = vld [vmem:[#allocation8 + $0x720] sm:$0xff] }
 0x1ed   :  { %v2390_v30 = vmul.f32 %v2358_v18, %v2358_v18  ;;  %v2391_v20 = vadd.f32 %v2375_v61, %v2359_v24  ;;  %v2392_v43 = vadd.f32 %v2376_v16, %v2360_v60  ;;  %v2393_v52 = vadd.f32 %v2377_v35, %v2361_v53  ;;  %v2440_v50 = vld [vmem:[#allocation3 + $0x708] sm:$0xff]  ;;  %v2441_v18 = vld [vmem:[#allocation3 + $0x710] sm:$0xff]  ;;  %v2442_v24 = vld [vmem:[#allocation3 + $0x718] sm:$0xff] }
 0x1ee   :  { %v2394_v36 = vadd.f32 %v2378_v1, %v2362_v62  ;;  %v2395_v46 = vadd.f32 %v2379_v63, %v2363_v55  ;;  %v2396_v32 = vadd.f32 %v2380_v56, %v2364_v0  ;;  %v2397_v6 = vadd.f32 %v2381_v17, %v2365_v4  ;;  %v2443_v60 = vld [vmem:[#allocation3 + $0x720] sm:$0xff]  ;;  %v5394_v0 = vld [vmem:[#allocation8 + $0x728] sm:$0xff]  ;;  %v5396_v4 = vld [vmem:[#allocation8 + $0x730] sm:$0xff] }
 0x1ef   :  { %v2398_v44 = vadd.f32 %v2382_v3, %v2366_v9  ;;  %v2399_v7 = vadd.f32 %v2383_v11, %v2367_v23  ;;  %v2400_v34 = vadd.f32 %v2384_v57, %v2368_v8  ;;  %v2401_v40 = vadd.f32 %v2385_v10, %v2369_v38  ;;  %v5398_v9 = vld [vmem:[#allocation8 + $0x738] sm:$0xff]  ;;  %v5400_v23 = vld [vmem:[#allocation8 + $0x740] sm:$0xff]  ;;  %v2444_v8 = vld [vmem:[#allocation3 + $0x728] sm:$0xff] }
 0x1f0   :  { %v2402_v25 = vadd.f32 %v2386_v42, %v2370_v13  ;;  %v2403_v27 = vadd.f32 %v2387_v21, %v2371_v22  ;;  %v2404_v59 = vadd.f32 %v2388_v41, %v2372_v48  ;;  %v2405_v28 = vadd.f32 %v2389_v12, %v2373_v29  ;;  %v5414_v48 = vld [vmem:[#allocation8 + $0x748] sm:$0xff]  ;;  %v5416_v29 = vld [vmem:[#allocation8 + $0x750] sm:$0xff]  ;;  %v5420_v61 = vld [vmem:[#allocation8 + $0x760] sm:$0xff] }
 0x1f1   :  { %v2406_v5 = vadd.f32 %v2390_v30, %v2374_v45  ;;  %v5372_v15 = vadd.f32 %v2391_v20, %v5272_v58  ;;  %v5383_v53 = vadd.f32 %v2392_v43, %v5283_v31  ;;  %v5386_v62 = vadd.f32 %v2393_v52, %v5286_v37  ;;  %v2445_v31 = vld [vmem:[#allocation3 + $0x730] sm:$0xff]  ;;  %v5418_v45 = vld [vmem:[#allocation8 + $0x758] sm:$0xff]  ;;  %v2448_v35 = vld [vmem:[#allocation3 + $0x748] sm:$0xff] }
 0x1f2   :  { %v5389_v58 = vadd.f32 %v2394_v36, %v5289_v14  ;;  %v5392_v55 = vadd.f32 %v2395_v46, %v5292_v49  ;;  %v5403_v38 = vadd.f32 %v2396_v32, %v5303_v2  ;;  %v5406_v37 = vadd.f32 %v2397_v6, %v5306_v47  ;;  %v6218_v14 = vld [vmem:[#allocation30_spill] sm:$0xff]  ;;  %v2446_v16 = vld [vmem:[#allocation3 + $0x738] sm:$0xff]  ;;  %v2447_v2 = vld [vmem:[#allocation3 + $0x740] sm:$0xff] }
 0x1f3   :  { %v5409_v13 = vadd.f32 %v2398_v44, %v6218_v14  ;;  %v6220_v49 = vld [vmem:[#allocation26_spill] sm:$0xff]  ;;  %v6222_v1 = vld [vmem:[#allocation23_spill] sm:$0xff]  ;;  %v6226_v17 = vld [vmem:[#allocation32_spill] sm:$0xff]  ;;  %v2458_v14 = vsub.f32 %v2442_v24, %v5378_v26 }
 0x1f4   :  { %v5412_v22 = vadd.f32 %v2399_v7, %v6220_v49  ;;  %v5423_v47 = vadd.f32 %v2400_v34, %v6222_v1  ;;  %v6224_v63 = vld [vmem:[#allocation31_spill] sm:$0xff]  ;;  %v5429_v3 = vadd.f32 %v2402_v25, %v6226_v17  ;;  %v6228_v11 = vld [vmem:[#allocation33_spill] sm:$0xff]  ;;  %v2437_v42 = vld [vmem:[#allocation8 + $0x770] sm:$0xff]  ;;  %v2456_v25 = vsub.f32 %v2440_v50, %v5374_v19 }
 0x1f5   :  { %6219 = vst [vmem:[#allocation27_spill] sm:$0xff] %v5409_v13  ;;  %v5426_v56 = vadd.f32 %v2401_v40, %v6224_v63  ;;  %v5432_v57 = vadd.f32 %v2403_v27, %v6228_v11  ;;  %v2436_v10 = vld [vmem:[#allocation8 + $0x768] sm:$0xff]  ;;  %v2438_v21 = vld [vmem:[#allocation8 + $0x778] sm:$0xff]  ;;  %v2449_v41 = vld [vmem:[#allocation3 + $0x750] sm:$0xff]  ;;  %v2455_v40 = vsub.f32 %v2439_v33, %v5369_v39  ;;  %v2457_v27 = vsub.f32 %v2441_v18, %v5376_v51 }
 0x1f6   :  { %6221 = vst [vmem:[#allocation37_spill] sm:$0xff] %v5412_v22  ;;  %6223 = vst [vmem:[#allocation38_spill] sm:$0xff] %v5423_v47  ;;  %v2450_v12 = vld [vmem:[#allocation3 + $0x758] sm:$0xff]  ;;  %v2451_v30 = vld [vmem:[#allocation3 + $0x760] sm:$0xff]  ;;  %v2460_v63 = vsub.f32 %v2444_v8, %v5394_v0  ;;  %v2462_v17 = vsub.f32 %v2446_v16, %v5398_v9  ;;  %v2463_v11 = vsub.f32 %v2447_v2, %v5400_v23 }
 0x1f7   :  { %6225 = vst [vmem:[#allocation39_spill] sm:$0xff] %v5426_v56  ;;  %6227 = vst [vmem:[#allocation40_spill] sm:$0xff] %v5429_v3  ;;  %v2471_v20 = vld [vmem:[#allocation6 + $0x700] sm:$0xff]  ;;  %v6230_v43 = vld [vmem:[#allocation34_spill] sm:$0xff]  ;;  %v2464_v18 = vsub.f32 %v2448_v35, %v5414_v48  ;;  %v2465_v24 = vsub.f32 %v2449_v41, %v5416_v29 }
 0x1f8   :  { %6229 = vst [vmem:[#allocation28_spill] sm:$0xff] %v5432_v57  ;;  %v5435_v52 = vadd.f32 %v2404_v59, %v6230_v43  ;;  %v6232_v36 = vld [vmem:[#allocation35_spill] sm:$0xff]  ;;  %v6234_v32 = vld [vmem:[#allocation36_spill] sm:$0xff]  ;;  %v2452_v44 = vld [vmem:[#allocation3 + $0x768] sm:$0xff]  ;;  %v2459_v59 = vsub.f32 %v2443_v60, %v5380_v54  ;;  %v2466_v60 = vsub.f32 %v2450_v12, %v5418_v45  ;;  %v2487_v3 = vsub.f32 %v2471_v20, %v5369_v39 }
 0x1f9   :  { %v5438_v46 = vadd.f32 %v2405_v28, %v6232_v36  ;;  %v5441_v6 = vadd.f32 %v2406_v5, %v6234_v32  ;;  %v2453_v7 = vld [vmem:[#allocation3 + $0x770] sm:$0xff]  ;;  %v2454_v34 = vld [vmem:[#allocation3 + $0x778] sm:$0xff]  ;;  %v2472_v49 = vld [vmem:[#allocation6 + $0x708] sm:$0xff]  ;;  %v2461_v5 = vsub.f32 %v2445_v31, %v5396_v4  ;;  %v2467_v36 = vsub.f32 %v2451_v30, %v5420_v61 }
 0x1fa   :  { %6231 = vst [vmem:[#allocation29_spill] sm:$0xff] %v5435_v52  ;;  %v2473_v1 = vld [vmem:[#allocation6 + $0x710] sm:$0xff]  ;;  %v2474_v28 = vld [vmem:[#allocation6 + $0x718] sm:$0xff]  ;;  %v2475_v33 = vld [vmem:[#allocation6 + $0x720] sm:$0xff]  ;;  %v2469_v31 = vsub.f32 %v2453_v7, %v2437_v42  ;;  %v2470_v52 = vsub.f32 %v2454_v34, %v2438_v21  ;;  %v2488_v41 = vsub.f32 %v2472_v49, %v5374_v19 }
 0x1fb   :  { %6233 = vst [vmem:[#allocation18_spill] sm:$0xff] %v5438_v46  ;;  %6235 = vst [vmem:[#allocation24_spill] sm:$0xff] %v5441_v6  ;;  %v2476_v43 = vld [vmem:[#allocation6 + $0x728] sm:$0xff]  ;;  %v2477_v50 = vld [vmem:[#allocation6 + $0x730] sm:$0xff]  ;;  %v2468_v46 = vsub.f32 %v2452_v44, %v2436_v10  ;;  %v2489_v12 = vsub.f32 %v2473_v1, %v5376_v51  ;;  %v2490_v30 = vsub.f32 %v2474_v28, %v5378_v26 }
 0x1fc   :  { %v2478_v32 = vld [vmem:[#allocation6 + $0x738] sm:$0xff]  ;;  %v2479_v6 = vld [vmem:[#allocation6 + $0x740] sm:$0xff]  ;;  %v2480_v8 = vld [vmem:[#allocation6 + $0x748] sm:$0xff]  ;;  %v2491_v22 = vsub.f32 %v2475_v33, %v5380_v54  ;;  %v2492_v44 = vsub.f32 %v2476_v43, %v5394_v0  ;;  %v2493_v7 = vsub.f32 %v2477_v50, %v5396_v4  ;;  %v2503_v54 = vmul.f32 %v2455_v40, %v2455_v40 }
 0x1fd   :  { %v2481_v16 = vld [vmem:[#allocation6 + $0x750] sm:$0xff]  ;;  %v2482_v57 = vld [vmem:[#allocation6 + $0x758] sm:$0xff]  ;;  %v2483_v2 = vld [vmem:[#allocation6 + $0x760] sm:$0xff]  ;;  %v2494_v34 = vsub.f32 %v2478_v32, %v5398_v9  ;;  %v2495_v13 = vsub.f32 %v2479_v6, %v5400_v23  ;;  %v2496_v39 = vsub.f32 %v2480_v8, %v5414_v48  ;;  %v2504_v28 = vmul.f32 %v2456_v25, %v2456_v25 }
 0x1fe   :  { %v2484_v56 = vld [vmem:[#allocation6 + $0x768] sm:$0xff]  ;;  %v2485_v47 = vld [vmem:[#allocation6 + $0x770] sm:$0xff]  ;;  %v2486_v35 = vld [vmem:[#allocation6 + $0x778] sm:$0xff]  ;;  %v2497_v20 = vsub.f32 %v2481_v16, %v5416_v29  ;;  %v2498_v19 = vsub.f32 %v2482_v57, %v5418_v45  ;;  %v2499_v51 = vsub.f32 %v2483_v2, %v5420_v61  ;;  %v2505_v0 = vmul.f32 %v2457_v27, %v2457_v27 }
 0x1ff   :  { %v2500_v49 = vsub.f32 %v2484_v56, %v2436_v10  ;;  %v2501_v26 = vsub.f32 %v2485_v47, %v2437_v42  ;;  %v2502_v1 = vsub.f32 %v2486_v35, %v2438_v21  ;;  %v2506_v33 = vmul.f32 %v2458_v14, %v2458_v14 }
 0x200   :  { %v2507_v4 = vmul.f32 %v2459_v59, %v2459_v59  ;;  %v2508_v43 = vmul.f32 %v2460_v63, %v2460_v63  ;;  %v2509_v9 = vmul.f32 %v2461_v5, %v2461_v5  ;;  %v2510_v50 = vmul.f32 %v2462_v17, %v2462_v17 }
 0x201   :  { %v2511_v23 = vmul.f32 %v2463_v11, %v2463_v11  ;;  %v2512_v6 = vmul.f32 %v2464_v18, %v2464_v18  ;;  %v2513_v48 = vmul.f32 %v2465_v24, %v2465_v24  ;;  %v2514_v32 = vmul.f32 %v2466_v60, %v2466_v60 }
 0x202   :  { %v2515_v29 = vmul.f32 %v2467_v36, %v2467_v36  ;;  %v2516_v8 = vmul.f32 %v2468_v46, %v2468_v46  ;;  %v2517_v45 = vmul.f32 %v2469_v31, %v2469_v31  ;;  %v2518_v57 = vmul.f32 %v2470_v52, %v2470_v52 }
 0x203   :  { %v2519_v61 = vmul.f32 %v2487_v3, %v2487_v3  ;;  %v2520_v56 = vmul.f32 %v2488_v41, %v2488_v41  ;;  %v2521_v47 = vmul.f32 %v2489_v12, %v2489_v12  ;;  %v2522_v10 = vmul.f32 %v2490_v30, %v2490_v30  ;;  %v5469_v12 = vld [vmem:[#allocation8 + $0x780] sm:$0xff] }
 0x204   :  { %v2523_v42 = vmul.f32 %v2491_v22, %v2491_v22  ;;  %v2524_v21 = vmul.f32 %v2492_v44, %v2492_v44  ;;  %v2525_v40 = vmul.f32 %v2493_v7, %v2493_v7  ;;  %v2526_v25 = vmul.f32 %v2494_v34, %v2494_v34  ;;  %v2583_v30 = vld [vmem:[#allocation3 + $0x780] sm:$0xff] }
 0x205   :  { %v2527_v27 = vmul.f32 %v2495_v13, %v2495_v13  ;;  %v2528_v14 = vmul.f32 %v2496_v39, %v2496_v39  ;;  %v2529_v59 = vmul.f32 %v2497_v20, %v2497_v20  ;;  %v2530_v63 = vmul.f32 %v2498_v19, %v2498_v19  ;;  %v5474_v20 = vld [vmem:[#allocation8 + $0x788] sm:$0xff]  ;;  %v5476_v19 = vld [vmem:[#allocation8 + $0x790] sm:$0xff] }
 0x206   :  { %v2531_v5 = vmul.f32 %v2499_v51, %v2499_v51  ;;  %v2532_v17 = vmul.f32 %v2500_v49, %v2500_v49  ;;  %v2533_v11 = vmul.f32 %v2501_v26, %v2501_v26  ;;  %v2534_v18 = vmul.f32 %v2502_v1, %v2502_v1  ;;  %v5478_v51 = vld [vmem:[#allocation8 + $0x798] sm:$0xff]  ;;  %v5480_v49 = vld [vmem:[#allocation8 + $0x7a0] sm:$0xff]  ;;  %v2584_v26 = vld [vmem:[#allocation3 + $0x788] sm:$0xff] }
 0x207   :  { %v2535_v24 = vadd.f32 %v2519_v61, %v2503_v54  ;;  %v2536_v46 = vadd.f32 %v2520_v56, %v2504_v28  ;;  %v2537_v60 = vadd.f32 %v2521_v47, %v2505_v0  ;;  %v2538_v52 = vadd.f32 %v2522_v10, %v2506_v33  ;;  %v2585_v1 = vld [vmem:[#allocation3 + $0x790] sm:$0xff]  ;;  %v2586_v54 = vld [vmem:[#allocation3 + $0x798] sm:$0xff]  ;;  %v2587_v28 = vld [vmem:[#allocation3 + $0x7a0] sm:$0xff] }
 0x208   :  { %v2539_v3 = vadd.f32 %v2523_v42, %v2507_v4  ;;  %v2540_v36 = vadd.f32 %v2524_v21, %v2508_v43  ;;  %v2541_v31 = vadd.f32 %v2525_v40, %v2509_v9  ;;  %v2542_v16 = vadd.f32 %v2526_v25, %v2510_v50  ;;  %v5494_v43 = vld [vmem:[#allocation8 + $0x7a8] sm:$0xff]  ;;  %v5496_v9 = vld [vmem:[#allocation8 + $0x7b0] sm:$0xff]  ;;  %v5498_v50 = vld [vmem:[#allocation8 + $0x7b8] sm:$0xff] }
 0x209   :  { %v2543_v22 = vadd.f32 %v2527_v27, %v2511_v23  ;;  %v2544_v2 = vadd.f32 %v2528_v14, %v2512_v6  ;;  %v2545_v35 = vadd.f32 %v2529_v59, %v2513_v48  ;;  %v2546_v41 = vadd.f32 %v2530_v63, %v2514_v32  ;;  %v5500_v23 = vld [vmem:[#allocation8 + $0x7c0] sm:$0xff]  ;;  %v2588_v6 = vld [vmem:[#allocation3 + $0x7a8] sm:$0xff]  ;;  %v2590_v56 = vld [vmem:[#allocation3 + $0x7b8] sm:$0xff] }
 0x20a   :  { %v2547_v13 = vadd.f32 %v2531_v5, %v2515_v29  ;;  %v2548_v44 = vadd.f32 %v2532_v17, %v2516_v8  ;;  %v2549_v7 = vadd.f32 %v2533_v11, %v2517_v45  ;;  %v2550_v34 = vadd.f32 %v2534_v18, %v2518_v57  ;;  %v5514_v8 = vld [vmem:[#allocation8 + $0x7c8] sm:$0xff]  ;;  %v5516_v45 = vld [vmem:[#allocation8 + $0x7d0] sm:$0xff]  ;;  %v5518_v57 = vld [vmem:[#allocation8 + $0x7d8] sm:$0xff] }
 0x20b   :  { %v5472_v39 = vadd.f32 %v2535_v24, %v5372_v15  ;;  %v5483_v0 = vadd.f32 %v2536_v46, %v5383_v53  ;;  %v5486_v33 = vadd.f32 %v2537_v60, %v5386_v62  ;;  %v5489_v15 = vadd.f32 %v2538_v52, %v5389_v58  ;;  %v2589_v53 = vld [vmem:[#allocation3 + $0x7b0] sm:$0xff]  ;;  %v6236_v58 = vld [vmem:[#allocation27_spill] sm:$0xff]  ;;  %v5520_v61 = vld [vmem:[#allocation8 + $0x7e0] sm:$0xff] }
 0x20c   :  { %v5492_v4 = vadd.f32 %v2539_v3, %v5392_v55  ;;  %v5503_v48 = vadd.f32 %v2540_v36, %v5403_v38  ;;  %v5506_v62 = vadd.f32 %v2541_v31, %v5406_v37  ;;  %v5509_v32 = vadd.f32 %v2542_v16, %v6236_v58  ;;  %v6238_v55 = vld [vmem:[#allocation37_spill] sm:$0xff]  ;;  %v2591_v38 = vld [vmem:[#allocation3 + $0x7c0] sm:$0xff]  ;;  %v6240_v10 = vld [vmem:[#allocation38_spill] sm:$0xff] }
 0x20d   :  { %v5512_v29 = vadd.f32 %v2543_v22, %v6238_v55  ;;  %v2592_v47 = vld [vmem:[#allocation3 + $0x7c8] sm:$0xff]  ;;  %v5523_v37 = vadd.f32 %v2544_v2, %v6240_v10  ;;  %v6242_v42 = vld [vmem:[#allocation39_spill] sm:$0xff]  ;;  %v6244_v40 = vld [vmem:[#allocation40_spill] sm:$0xff]  ;;  %v2602_v58 = vsub.f32 %v2586_v54, %v5478_v51 }
 0x20e   :  { %6237 = vst [vmem:[#allocation25_spill] sm:$0xff] %v5509_v32  ;;  %v5526_v21 = vadd.f32 %v2545_v35, %v6242_v42  ;;  %v5529_v25 = vadd.f32 %v2546_v41, %v6244_v40  ;;  %v6246_v27 = vld [vmem:[#allocation28_spill] sm:$0xff]  ;;  %v2580_v59 = vld [vmem:[#allocation8 + $0x7e8] sm:$0xff]  ;;  %v2581_v63 = vld [vmem:[#allocation8 + $0x7f0] sm:$0xff]  ;;  %v2599_v35 = vsub.f32 %v2583_v30, %v5469_v12  ;;  %v2600_v41 = vsub.f32 %v2584_v26, %v5474_v20 }
 0x20f   :  { %6239 = vst [vmem:[#allocation19_spill] sm:$0xff] %v5512_v29  ;;  %6241 = vst [vmem:[#allocation20_spill] sm:$0xff] %v5523_v37  ;;  %v5532_v14 = vadd.f32 %v2547_v13, %v6246_v27  ;;  %v2582_v5 = vld [vmem:[#allocation8 + $0x7f8] sm:$0xff]  ;;  %v2593_v17 = vld [vmem:[#allocation3 + $0x7d0] sm:$0xff]  ;;  %v2601_v13 = vsub.f32 %v2585_v1, %v5476_v19  ;;  %v2604_v42 = vsub.f32 %v2588_v6, %v5494_v43 }
 0x210   :  { %6243 = vst [vmem:[#allocation21_spill] sm:$0xff] %v5526_v21  ;;  %6245 = vst [vmem:[#allocation22_spill] sm:$0xff] %v5529_v25  ;;  %v2594_v11 = vld [vmem:[#allocation3 + $0x7d8] sm:$0xff]  ;;  %v2595_v18 = vld [vmem:[#allocation3 + $0x7e0] sm:$0xff]  ;;  %v2606_v40 = vsub.f32 %v2590_v56, %v5498_v50  ;;  %v2607_v27 = vsub.f32 %v2591_v38, %v5500_v23  ;;  %v2608_v1 = vsub.f32 %v2592_v47, %v5514_v8 }
 0x211   :  { %6247 = vst [vmem:[#allocation30_spill] sm:$0xff] %v5532_v14  ;;  %v2615_v24 = vld [vmem:[#allocation6 + $0x780] sm:$0xff]  ;;  %v6248_v46 = vld [vmem:[#allocation29_spill] sm:$0xff]  ;;  %v6250_v52 = vld [vmem:[#allocation18_spill] sm:$0xff]  ;;  %v2609_v54 = vsub.f32 %v2593_v17, %v5516_v45 }
 0x212   :  { %v5535_v60 = vadd.f32 %v2548_v44, %v6248_v46  ;;  %v5538_v3 = vadd.f32 %v2549_v7, %v6250_v52  ;;  %v6252_v36 = vld [vmem:[#allocation24_spill] sm:$0xff]  ;;  %v2596_v16 = vld [vmem:[#allocation3 + $0x7e8] sm:$0xff]  ;;  %v2597_v22 = vld [vmem:[#allocation3 + $0x7f0] sm:$0xff]  ;;  %v2603_v44 = vsub.f32 %v2587_v28, %v5480_v49  ;;  %v2610_v28 = vsub.f32 %v2594_v11, %v5518_v57 }
 0x213   :  { %v5541_v31 = vadd.f32 %v2550_v34, %v6252_v36  ;;  %v2598_v2 = vld [vmem:[#allocation3 + $0x7f8] sm:$0xff]  ;;  %v2616_v55 = vld [vmem:[#allocation6 + $0x788] sm:$0xff]  ;;  %v2617_v10 = vld [vmem:[#allocation6 + $0x790] sm:$0xff]  ;;  %v2605_v34 = vsub.f32 %v2589_v53, %v5496_v9  ;;  %v2611_v52 = vsub.f32 %v2595_v18, %v5520_v61  ;;  %v2613_v53 = vsub.f32 %v2597_v22, %v2581_v63 }
 0x214   :  { %6249 = vst [vmem:[#allocation26_spill] sm:$0xff] %v5535_v60  ;;  %6251 = vst [vmem:[#allocation23_spill] sm:$0xff] %v5538_v3  ;;  %v2618_v7 = vld [vmem:[#allocation6 + $0x798] sm:$0xff]  ;;  %v2619_v30 = vld [vmem:[#allocation6 + $0x7a0] sm:$0xff]  ;;  %v2612_v3 = vsub.f32 %v2596_v16, %v2580_v59  ;;  %v2614_v60 = vsub.f32 %v2598_v2, %v2582_v5  ;;  %v2631_v25 = vsub.f32 %v2615_v24, %v5469_v12 }
 0x215   :  { %6253 = vst [vmem:[#allocation31_spill] sm:$0xff] %v5541_v31  ;;  %v2620_v46 = vld [vmem:[#allocation6 + $0x7a8] sm:$0xff]  ;;  %v2621_v26 = vld [vmem:[#allocation6 + $0x7b0] sm:$0xff]  ;;  %v2622_v36 = vld [vmem:[#allocation6 + $0x7b8] sm:$0xff]  ;;  %v2632_v17 = vsub.f32 %v2616_v55, %v5474_v20  ;;  %v2633_v11 = vsub.f32 %v2617_v10, %v5476_v19  ;;  %v2634_v18 = vsub.f32 %v2618_v7, %v5478_v51  ;;  %v2635_v29 = vsub.f32 %v2619_v30, %v5480_v49 }
 0x216   :  { %v2623_v31 = vld [vmem:[#allocation6 + $0x7c0] sm:$0xff]  ;;  %v2624_v6 = vld [vmem:[#allocation6 + $0x7c8] sm:$0xff]  ;;  %v2625_v56 = vld [vmem:[#allocation6 + $0x7d0] sm:$0xff]  ;;  %v2636_v16 = vsub.f32 %v2620_v46, %v5494_v43  ;;  %v2637_v22 = vsub.f32 %v2621_v26, %v5496_v9  ;;  %v2638_v2 = vsub.f32 %v2622_v36, %v5498_v50  ;;  %v2647_v49 = vmul.f32 %v2599_v35, %v2599_v35 }
 0x217   :  { %v2626_v14 = vld [vmem:[#allocation6 + $0x7d8] sm:$0xff]  ;;  %v2627_v38 = vld [vmem:[#allocation6 + $0x7e0] sm:$0xff]  ;;  %v2628_v21 = vld [vmem:[#allocation6 + $0x7e8] sm:$0xff]  ;;  %v2639_v32 = vsub.f32 %v2623_v31, %v5500_v23  ;;  %v2640_v12 = vsub.f32 %v2624_v6, %v5514_v8  ;;  %v2641_v24 = vsub.f32 %v2625_v56, %v5516_v45  ;;  %v2648_v7 = vmul.f32 %v2600_v41, %v2600_v41 }
 0x218   :  { %v2629_v37 = vld [vmem:[#allocation6 + $0x7f0] sm:$0xff]  ;;  %v2630_v47 = vld [vmem:[#allocation6 + $0x7f8] sm:$0xff]  ;;  %v2642_v20 = vsub.f32 %v2626_v14, %v5518_v57  ;;  %v2643_v19 = vsub.f32 %v2627_v38, %v5520_v61  ;;  %v2644_v55 = vsub.f32 %v2628_v21, %v2580_v59  ;;  %v2649_v43 = vmul.f32 %v2601_v13, %v2601_v13 }
 0x219   :  { %v2645_v51 = vsub.f32 %v2629_v37, %v2581_v63  ;;  %v2646_v10 = vsub.f32 %v2630_v47, %v2582_v5  ;;  %v2650_v30 = vmul.f32 %v2602_v58, %v2602_v58  ;;  %v2651_v9 = vmul.f32 %v2603_v44, %v2603_v44 }
 0x21a   :  { %v2652_v46 = vmul.f32 %v2604_v42, %v2604_v42  ;;  %v2653_v50 = vmul.f32 %v2605_v34, %v2605_v34  ;;  %v2654_v26 = vmul.f32 %v2606_v40, %v2606_v40  ;;  %v2655_v23 = vmul.f32 %v2607_v27, %v2607_v27 }
 0x21b   :  { %v2656_v31 = vmul.f32 %v2608_v1, %v2608_v1  ;;  %v2657_v8 = vmul.f32 %v2609_v54, %v2609_v54  ;;  %v2658_v36 = vmul.f32 %v2610_v28, %v2610_v28  ;;  %v2659_v45 = vmul.f32 %v2611_v52, %v2611_v52 }
 0x21c   :  { %v2660_v6 = vmul.f32 %v2612_v3, %v2612_v3  ;;  %v2661_v57 = vmul.f32 %v2613_v53, %v2613_v53  ;;  %v2662_v14 = vmul.f32 %v2614_v60, %v2614_v60  ;;  %v2663_v61 = vmul.f32 %v2631_v25, %v2631_v25 }
 0x21d   :  { %v2664_v21 = vmul.f32 %v2632_v17, %v2632_v17  ;;  %v2665_v37 = vmul.f32 %v2633_v11, %v2633_v11  ;;  %v2666_v59 = vmul.f32 %v2634_v18, %v2634_v18  ;;  %v2667_v63 = vmul.f32 %v2635_v29, %v2635_v29  ;;  %v5569_v11 = vld [vmem:[#allocation8 + $0x800] sm:$0xff] }
 0x21e   :  { %v2668_v5 = vmul.f32 %v2636_v16, %v2636_v16  ;;  %v2669_v35 = vmul.f32 %v2637_v22, %v2637_v22  ;;  %v2670_v41 = vmul.f32 %v2638_v2, %v2638_v2  ;;  %v2671_v13 = vmul.f32 %v2639_v32, %v2639_v32  ;;  %v2727_v18 = vld [vmem:[#allocation3 + $0x800] sm:$0xff] }
 0x21f   :  { %v2672_v58 = vmul.f32 %v2640_v12, %v2640_v12  ;;  %v2673_v44 = vmul.f32 %v2641_v24, %v2641_v24  ;;  %v2674_v42 = vmul.f32 %v2642_v20, %v2642_v20  ;;  %v2675_v34 = vmul.f32 %v2643_v19, %v2643_v19  ;;  %v5574_v24 = vld [vmem:[#allocation8 + $0x808] sm:$0xff]  ;;  %v5576_v20 = vld [vmem:[#allocation8 + $0x810] sm:$0xff]  ;;  %v5578_v19 = vld [vmem:[#allocation8 + $0x818] sm:$0xff] }
 0x220   :  { %v2676_v40 = vmul.f32 %v2644_v55, %v2644_v55  ;;  %v2677_v27 = vmul.f32 %v2645_v51, %v2645_v51  ;;  %v2678_v1 = vmul.f32 %v2646_v10, %v2646_v10  ;;  %v2679_v54 = vadd.f32 %v2663_v61, %v2647_v49  ;;  %v5580_v55 = vld [vmem:[#allocation8 + $0x820] sm:$0xff]  ;;  %v2728_v51 = vld [vmem:[#allocation3 + $0x808] sm:$0xff]  ;;  %v2729_v10 = vld [vmem:[#allocation3 + $0x810] sm:$0xff] }
 0x221   :  { %v2680_v3 = vadd.f32 %v2664_v21, %v2648_v7  ;;  %v2681_v28 = vadd.f32 %v2665_v37, %v2649_v43  ;;  %v2682_v60 = vadd.f32 %v2666_v59, %v2650_v30  ;;  %v2683_v25 = vadd.f32 %v2667_v63, %v2651_v9  ;;  %v2730_v49 = vld [vmem:[#allocation3 + $0x818] sm:$0xff]  ;;  %v2731_v7 = vld [vmem:[#allocation3 + $0x820] sm:$0xff]  ;;  %v2736_v37 = vld [vmem:[#allocation3 + $0x848] sm:$0xff] }
 0x222   :  { %v2684_v52 = vadd.f32 %v2668_v5, %v2652_v46  ;;  %v2685_v53 = vadd.f32 %v2669_v35, %v2653_v50  ;;  %v2686_v56 = vadd.f32 %v2670_v41, %v2654_v26  ;;  %v2687_v29 = vadd.f32 %v2671_v13, %v2655_v23  ;;  %v5594_v46 = vld [vmem:[#allocation8 + $0x828] sm:$0xff]  ;;  %v5596_v50 = vld [vmem:[#allocation8 + $0x830] sm:$0xff]  ;;  %v5598_v26 = vld [vmem:[#allocation8 + $0x838] sm:$0xff] }
 0x223   :  { %v2688_v38 = vadd.f32 %v2672_v58, %v2656_v31  ;;  %v2689_v47 = vadd.f32 %v2673_v44, %v2657_v8  ;;  %v2690_v17 = vadd.f32 %v2674_v42, %v2658_v36  ;;  %v2691_v32 = vadd.f32 %v2675_v34, %v2659_v45  ;;  %v5600_v23 = vld [vmem:[#allocation8 + $0x840] sm:$0xff]  ;;  %v2732_v31 = vld [vmem:[#allocation3 + $0x828] sm:$0xff]  ;;  %v2734_v21 = vld [vmem:[#allocation3 + $0x838] sm:$0xff] }
 0x224   :  { %v2692_v16 = vadd.f32 %v2676_v40, %v2660_v6  ;;  %v2693_v22 = vadd.f32 %v2677_v27, %v2661_v57  ;;  %v2694_v2 = vadd.f32 %v2678_v1, %v2662_v14  ;;  %v5572_v12 = vadd.f32 %v2679_v54, %v5472_v39  ;;  %v5614_v6 = vld [vmem:[#allocation8 + $0x848] sm:$0xff]  ;;  %v5616_v57 = vld [vmem:[#allocation8 + $0x850] sm:$0xff]  ;;  %v5618_v14 = vld [vmem:[#allocation8 + $0x858] sm:$0xff] }
 0x225   :  { %v5583_v43 = vadd.f32 %v2680_v3, %v5483_v0  ;;  %v5586_v30 = vadd.f32 %v2681_v28, %v5486_v33  ;;  %v5589_v39 = vadd.f32 %v2682_v60, %v5489_v15  ;;  %v5592_v9 = vadd.f32 %v2683_v25, %v5492_v4  ;;  %v2733_v0 = vld [vmem:[#allocation3 + $0x830] sm:$0xff]  ;;  %v6254_v15 = vld [vmem:[#allocation25_spill] sm:$0xff]  ;;  %v6256_v4 = vld [vmem:[#allocation19_spill] sm:$0xff] }
 0x226   :  { %v5603_v8 = vadd.f32 %v2684_v52, %v5503_v48  ;;  %v5606_v33 = vadd.f32 %v2685_v53, %v5506_v62  ;;  %v5609_v36 = vadd.f32 %v2686_v56, %v6254_v15  ;;  %v5612_v45 = vadd.f32 %v2687_v29, %v6256_v4  ;;  %v5620_v61 = vld [vmem:[#allocation8 + $0x860] sm:$0xff]  ;;  %v6260_v63 = vld [vmem:[#allocation21_spill] sm:$0xff]  ;;  %v6262_v35 = vld [vmem:[#allocation22_spill] sm:$0xff] }
 0x227   :  { %v2735_v48 = vld [vmem:[#allocation3 + $0x840] sm:$0xff]  ;;  %v5626_v5 = vadd.f32 %v2689_v47, %v6260_v63  ;;  %v5629_v41 = vadd.f32 %v2690_v17, %v6262_v35  ;;  %v6264_v13 = vld [vmem:[#allocation30_spill] sm:$0xff]  ;;  %v2724_v44 = vld [vmem:[#allocation8 + $0x868] sm:$0xff]  ;;  %v2743_v47 = vsub.f32 %v2727_v18, %v5569_v11  ;;  %v2744_v17 = vsub.f32 %v2728_v51, %v5574_v24 }
 0x228   :  { %6255 = vst [vmem:[#allocation32_spill] sm:$0xff] %v5609_v36  ;;  %6257 = vst [vmem:[#allocation33_spill] sm:$0xff] %v5612_v45  ;;  %v6258_v59 = vld [vmem:[#allocation20_spill] sm:$0xff]  ;;  %v5632_v58 = vadd.f32 %v2691_v32, %v6264_v13  ;;  %v2725_v42 = vld [vmem:[#allocation8 + $0x870] sm:$0xff]  ;;  %v2745_v32 = vsub.f32 %v2729_v10, %v5576_v20  ;;  %v2746_v15 = vsub.f32 %v2730_v49, %v5578_v19 }
 0x229   :  { %v5623_v62 = vadd.f32 %v2688_v38, %v6258_v59  ;;  %6261 = vst [vmem:[#allocation35_spill] sm:$0xff] %v5626_v5  ;;  %6263 = vst [vmem:[#allocation36_spill] sm:$0xff] %v5629_v41  ;;  %v2726_v34 = vld [vmem:[#allocation8 + $0x878] sm:$0xff]  ;;  %v2737_v40 = vld [vmem:[#allocation3 + $0x850] sm:$0xff]  ;;  %v2748_v63 = vsub.f32 %v2732_v31, %v5594_v46  ;;  %v2750_v35 = vsub.f32 %v2734_v21, %v5598_v26 }
 0x22a   :  { %6265 = vst [vmem:[#allocation27_spill] sm:$0xff] %v5632_v58  ;;  %v2738_v27 = vld [vmem:[#allocation3 + $0x858] sm:$0xff]  ;;  %v2739_v1 = vld [vmem:[#allocation3 + $0x860] sm:$0xff]  ;;  %v6266_v3 = vld [vmem:[#allocation26_spill] sm:$0xff]  ;;  %v2751_v13 = vsub.f32 %v2735_v48, %v5600_v23  ;;  %v2752_v10 = vsub.f32 %v2736_v37, %v5614_v6  ;;  %v2753_v49 = vsub.f32 %v2737_v40, %v5616_v57 }
 0x22b   :  { %6259 = vst [vmem:[#allocation34_spill] sm:$0xff] %v5623_v62  ;;  %v2759_v54 = vld [vmem:[#allocation6 + $0x800] sm:$0xff]  ;;  %v5635_v28 = vadd.f32 %v2692_v16, %v6266_v3  ;;  %v6268_v60 = vld [vmem:[#allocation23_spill] sm:$0xff]  ;;  %v2740_v56 = vld [vmem:[#allocation3 + $0x868] sm:$0xff]  ;;  %v2747_v16 = vsub.f32 %v2731_v7, %v5580_v55  ;;  %v2754_v7 = vsub.f32 %v2738_v27, %v5618_v14 }
 0x22c   :  { %v5638_v25 = vadd.f32 %v2693_v22, %v6268_v60  ;;  %v6270_v52 = vld [vmem:[#allocation31_spill] sm:$0xff]  ;;  %v2741_v29 = vld [vmem:[#allocation3 + $0x870] sm:$0xff]  ;;  %v2760_v4 = vld [vmem:[#allocation6 + $0x808] sm:$0xff]  ;;  %v2755_v60 = vsub.f32 %v2739_v1, %v5620_v61  ;;  %v2775_v41 = vsub.f32 %v2759_v54, %v5569_v11 }
 0x22d   :  { %6267 = vst [vmem:[#allocation37_spill] sm:$0xff] %v5635_v28  ;;  %v5641_v53 = vadd.f32 %v2694_v2, %v6270_v52  ;;  %v2742_v38 = vld [vmem:[#allocation3 + $0x878] sm:$0xff]  ;;  %v2761_v59 = vld [vmem:[#allocation6 + $0x810] sm:$0xff]  ;;  %v2749_v2 = vsub.f32 %v2733_v0, %v5596_v50  ;;  %v2763_v18 = vld [vmem:[#allocation6 + $0x820] sm:$0xff]  ;;  %v2757_v0 = vsub.f32 %v2741_v29, %v2725_v42  ;;  %v2776_v40 = vsub.f32 %v2760_v4, %v5574_v24 }
 0x22e   :  { %6269 = vst [vmem:[#allocation38_spill] sm:$0xff] %v5638_v25  ;;  %v2762_v22 = vld [vmem:[#allocation6 + $0x818] sm:$0xff]  ;;  %v2764_v3 = vld [vmem:[#allocation6 + $0x828] sm:$0xff]  ;;  %v2765_v51 = vld [vmem:[#allocation6 + $0x830] sm:$0xff]  ;;  %v2756_v25 = vsub.f32 %v2740_v56, %v2724_v44  ;;  %v2758_v28 = vsub.f32 %v2742_v38, %v2726_v34  ;;  %v2777_v27 = vsub.f32 %v2761_v59, %v5576_v20  ;;  %v2779_v45 = vsub.f32 %v2763_v18, %v5580_v55 }
 0x22f   :  { %6271 = vst [vmem:[#allocation39_spill] sm:$0xff] %v5641_v53  ;;  %v2766_v52 = vld [vmem:[#allocation6 + $0x838] sm:$0xff]  ;;  %v2767_v53 = vld [vmem:[#allocation6 + $0x840] sm:$0xff]  ;;  %v2768_v31 = vld [vmem:[#allocation6 + $0x848] sm:$0xff]  ;;  %v2778_v1 = vsub.f32 %v2762_v22, %v5578_v19  ;;  %v2780_v56 = vsub.f32 %v2764_v3, %v5594_v46  ;;  %v2781_v29 = vsub.f32 %v2765_v51, %v5596_v50  ;;  %v2791_v55 = vmul.f32 %v2743_v47, %v2743_v47 }
 0x230   :  { %v2769_v21 = vld [vmem:[#allocation6 + $0x850] sm:$0xff]  ;;  %v2770_v58 = vld [vmem:[#allocation6 + $0x858] sm:$0xff]  ;;  %v2771_v48 = vld [vmem:[#allocation6 + $0x860] sm:$0xff]  ;;  %v2782_v38 = vsub.f32 %v2766_v52, %v5598_v26  ;;  %v2783_v36 = vsub.f32 %v2767_v53, %v5600_v23  ;;  %v2784_v11 = vsub.f32 %v2768_v31, %v5614_v6  ;;  %v2792_v22 = vmul.f32 %v2744_v17, %v2744_v17 }
 0x231   :  { %v2772_v5 = vld [vmem:[#allocation6 + $0x868] sm:$0xff]  ;;  %v2773_v62 = vld [vmem:[#allocation6 + $0x870] sm:$0xff]  ;;  %v2774_v37 = vld [vmem:[#allocation6 + $0x878] sm:$0xff]  ;;  %v2785_v54 = vsub.f32 %v2769_v21, %v5616_v57  ;;  %v2786_v24 = vsub.f32 %v2770_v58, %v5618_v14  ;;  %v2787_v20 = vsub.f32 %v2771_v48, %v5620_v61  ;;  %v2793_v46 = vmul.f32 %v2745_v32, %v2745_v32 }
 0x232   :  { %v2788_v4 = vsub.f32 %v2772_v5, %v2724_v44  ;;  %v2789_v19 = vsub.f32 %v2773_v62, %v2725_v42  ;;  %v2790_v59 = vsub.f32 %v2774_v37, %v2726_v34  ;;  %v2794_v18 = vmul.f32 %v2746_v15, %v2746_v15 }
 0x233   :  { %v2795_v50 = vmul.f32 %v2747_v16, %v2747_v16  ;;  %v2796_v3 = vmul.f32 %v2748_v63, %v2748_v63  ;;  %v2797_v26 = vmul.f32 %v2749_v2, %v2749_v2  ;;  %v2798_v51 = vmul.f32 %v2750_v35, %v2750_v35 }
 0x234   :  { %v2799_v23 = vmul.f32 %v2751_v13, %v2751_v13  ;;  %v2800_v53 = vmul.f32 %v2752_v10, %v2752_v10  ;;  %v2801_v6 = vmul.f32 %v2753_v49, %v2753_v49  ;;  %v2802_v52 = vmul.f32 %v2754_v7, %v2754_v7 }
 0x235   :  { %v2803_v57 = vmul.f32 %v2755_v60, %v2755_v60  ;;  %v2804_v31 = vmul.f32 %v2756_v25, %v2756_v25  ;;  %v2805_v14 = vmul.f32 %v2757_v0, %v2757_v0  ;;  %v2806_v58 = vmul.f32 %v2758_v28, %v2758_v28 }
 0x236   :  { %v2807_v61 = vmul.f32 %v2775_v41, %v2775_v41  ;;  %v2808_v5 = vmul.f32 %v2776_v40, %v2776_v40  ;;  %v2809_v62 = vmul.f32 %v2777_v27, %v2777_v27  ;;  %v2810_v44 = vmul.f32 %v2778_v1, %v2778_v1  ;;  %v5669_v27 = vld [vmem:[#allocation8 + $0x880] sm:$0xff] }
 0x237   :  { %v2811_v42 = vmul.f32 %v2779_v45, %v2779_v45  ;;  %v2812_v34 = vmul.f32 %v2780_v56, %v2780_v56  ;;  %v2813_v47 = vmul.f32 %v2781_v29, %v2781_v29  ;;  %v2814_v17 = vmul.f32 %v2782_v38, %v2782_v38  ;;  %v2871_v1 = vld [vmem:[#allocation3 + $0x880] sm:$0xff] }
 0x238   :  { %v2815_v32 = vmul.f32 %v2783_v36, %v2783_v36  ;;  %v2816_v15 = vmul.f32 %v2784_v11, %v2784_v11  ;;  %v2817_v16 = vmul.f32 %v2785_v54, %v2785_v54  ;;  %v2818_v63 = vmul.f32 %v2786_v24, %v2786_v24  ;;  %v5674_v54 = vld [vmem:[#allocation8 + $0x888] sm:$0xff]  ;;  %v5676_v24 = vld [vmem:[#allocation8 + $0x890] sm:$0xff] }
 0x239   :  { %v2819_v2 = vmul.f32 %v2787_v20, %v2787_v20  ;;  %v2820_v35 = vmul.f32 %v2788_v4, %v2788_v4  ;;  %v2821_v13 = vmul.f32 %v2789_v19, %v2789_v19  ;;  %v2822_v10 = vmul.f32 %v2790_v59, %v2790_v59  ;;  %v5678_v20 = vld [vmem:[#allocation8 + $0x898] sm:$0xff]  ;;  %v5680_v4 = vld [vmem:[#allocation8 + $0x8a0] sm:$0xff]  ;;  %v2872_v19 = vld [vmem:[#allocation3 + $0x888] sm:$0xff] }
 0x23a   :  { %v2823_v49 = vadd.f32 %v2807_v61, %v2791_v55  ;;  %v2824_v25 = vadd.f32 %v2808_v5, %v2792_v22  ;;  %v2825_v7 = vadd.f32 %v2809_v62, %v2793_v46  ;;  %v2826_v28 = vadd.f32 %v2810_v44, %v2794_v18  ;;  %v2873_v59 = vld [vmem:[#allocation3 + $0x890] sm:$0xff]  ;;  %v2874_v55 = vld [vmem:[#allocation3 + $0x898] sm:$0xff]  ;;  %v2875_v22 = vld [vmem:[#allocation3 + $0x8a0] sm:$0xff] }
 0x23b   :  { %v2827_v41 = vadd.f32 %v2811_v42, %v2795_v50  ;;  %v2828_v60 = vadd.f32 %v2812_v34, %v2796_v3  ;;  %v2829_v0 = vadd.f32 %v2813_v47, %v2797_v26  ;;  %v2830_v21 = vadd.f32 %v2814_v17, %v2798_v51  ;;  %v5694_v3 = vld [vmem:[#allocation8 + $0x8a8] sm:$0xff]  ;;  %v5696_v26 = vld [vmem:[#allocation8 + $0x8b0] sm:$0xff]  ;;  %v5698_v51 = vld [vmem:[#allocation8 + $0x8b8] sm:$0xff] }
 0x23c   :  { %v2831_v45 = vadd.f32 %v2815_v32, %v2799_v23  ;;  %v2832_v48 = vadd.f32 %v2816_v15, %v2800_v53  ;;  %v2833_v37 = vadd.f32 %v2817_v16, %v2801_v6  ;;  %v2834_v40 = vadd.f32 %v2818_v63, %v2802_v52  ;;  %v5700_v23 = vld [vmem:[#allocation8 + $0x8c0] sm:$0xff]  ;;  %v2876_v53 = vld [vmem:[#allocation3 + $0x8a8] sm:$0xff]  ;;  %v2878_v5 = vld [vmem:[#allocation3 + $0x8b8] sm:$0xff] }
 0x23d   :  { %v2835_v36 = vadd.f32 %v2819_v2, %v2803_v57  ;;  %v2836_v56 = vadd.f32 %v2820_v35, %v2804_v31  ;;  %v2837_v29 = vadd.f32 %v2821_v13, %v2805_v14  ;;  %v2838_v38 = vadd.f32 %v2822_v10, %v2806_v58  ;;  %v5714_v31 = vld [vmem:[#allocation8 + $0x8c8] sm:$0xff]  ;;  %v5716_v14 = vld [vmem:[#allocation8 + $0x8d0] sm:$0xff]  ;;  %v5718_v58 = vld [vmem:[#allocation8 + $0x8d8] sm:$0xff] }
 0x23e   :  { %v5672_v11 = vadd.f32 %v2823_v49, %v5572_v12  ;;  %v5683_v46 = vadd.f32 %v2824_v25, %v5583_v43  ;;  %v5686_v18 = vadd.f32 %v2825_v7, %v5586_v30  ;;  %v5689_v12 = vadd.f32 %v2826_v28, %v5589_v39  ;;  %v2877_v43 = vld [vmem:[#allocation3 + $0x8b0] sm:$0xff]  ;;  %v6272_v39 = vld [vmem:[#allocation32_spill] sm:$0xff]  ;;  %v2880_v62 = vld [vmem:[#allocation3 + $0x8c8] sm:$0xff] }
 0x23f   :  { %v5692_v50 = vadd.f32 %v2827_v41, %v5592_v9  ;;  %v5703_v6 = vadd.f32 %v2828_v60, %v5603_v8  ;;  %v5706_v30 = vadd.f32 %v2829_v0, %v5606_v33  ;;  %v5709_v52 = vadd.f32 %v2830_v21, %v6272_v39  ;;  %v6274_v9 = vld [vmem:[#allocation33_spill] sm:$0xff]  ;;  %v5720_v61 = vld [vmem:[#allocation8 + $0x8e0] sm:$0xff]  ;;  %v6276_v44 = vld [vmem:[#allocation34_spill] sm:$0xff] }
 0x240   :  { %v5712_v57 = vadd.f32 %v2831_v45, %v6274_v9  ;;  %v2879_v8 = vld [vmem:[#allocation3 + $0x8c0] sm:$0xff]  ;;  %v5723_v33 = vadd.f32 %v2832_v48, %v6276_v44  ;;  %v6278_v42 = vld [vmem:[#allocation35_spill] sm:$0xff]  ;;  %v2868_v16 = vld [vmem:[#allocation8 + $0x8e8] sm:$0xff]  ;;  %v2890_v39 = vsub.f32 %v2874_v55, %v5678_v20 }
 0x241   :  { %6273 = vst [vmem:[#allocation40_spill] sm:$0xff] %v5709_v52  ;;  %v5726_v34 = vadd.f32 %v2833_v37, %v6278_v42  ;;  %v6280_v47 = vld [vmem:[#allocation36_spill] sm:$0xff]  ;;  %v6282_v32 = vld [vmem:[#allocation27_spill] sm:$0xff]  ;;  %v2869_v63 = vld [vmem:[#allocation8 + $0x8f0] sm:$0xff]  ;;  %v2887_v37 = vsub.f32 %v2871_v1, %v5669_v27  ;;  %v2892_v42 = vsub.f32 %v2876_v53, %v5694_v3 }
 0x242   :  { %6275 = vst [vmem:[#allocation28_spill] sm:$0xff] %v5712_v57  ;;  %6277 = vst [vmem:[#allocation29_spill] sm:$0xff] %v5723_v33  ;;  %v5729_v17 = vadd.f32 %v2834_v40, %v6280_v47  ;;  %v5732_v15 = vadd.f32 %v2835_v36, %v6282_v32  ;;  %v2870_v2 = vld [vmem:[#allocation8 + $0x8f8] sm:$0xff]  ;;  %v2881_v35 = vld [vmem:[#allocation3 + $0x8d0] sm:$0xff]  ;;  %v2888_v40 = vsub.f32 %v2872_v19, %v5674_v54 }
 0x243   :  { %6279 = vst [vmem:[#allocation18_spill] sm:$0xff] %v5726_v34  ;;  %v2882_v13 = vld [vmem:[#allocation3 + $0x8d8] sm:$0xff]  ;;  %v2883_v10 = vld [vmem:[#allocation3 + $0x8e0] sm:$0xff]  ;;  %v6284_v25 = vld [vmem:[#allocation37_spill] sm:$0xff]  ;;  %v2889_v36 = vsub.f32 %v2873_v59, %v5676_v24  ;;  %v2894_v47 = vsub.f32 %v2878_v5, %v5698_v51  ;;  %v2895_v32 = vsub.f32 %v2879_v8, %v5700_v23  ;;  %v2896_v59 = vsub.f32 %v2880_v62, %v5714_v31 }
 0x244   :  { %6281 = vst [vmem:[#allocation24_spill] sm:$0xff] %v5729_v17  ;;  %6283 = vst [vmem:[#allocation25_spill] sm:$0xff] %v5732_v15  ;;  %v2903_v49 = vld [vmem:[#allocation6 + $0x880] sm:$0xff]  ;;  %v5735_v7 = vadd.f32 %v2836_v56, %v6284_v25  ;;  %v6286_v28 = vld [vmem:[#allocation38_spill] sm:$0xff]  ;;  %v2891_v56 = vsub.f32 %v2875_v22, %v5680_v4  ;;  %v2897_v55 = vsub.f32 %v2881_v35, %v5716_v14 }
 0x245   :  { %v5738_v41 = vadd.f32 %v2837_v29, %v6286_v28  ;;  %v6288_v60 = vld [vmem:[#allocation39_spill] sm:$0xff]  ;;  %v2884_v21 = vld [vmem:[#allocation3 + $0x8e8] sm:$0xff]  ;;  %v2885_v45 = vld [vmem:[#allocation3 + $0x8f0] sm:$0xff]  ;;  %v2898_v22 = vsub.f32 %v2882_v13, %v5718_v58  ;;  %v2899_v28 = vsub.f32 %v2883_v10, %v5720_v61  ;;  %v2919_v17 = vsub.f32 %v2903_v49, %v5669_v27 }
 0x246   :  { %6285 = vst [vmem:[#allocation19_spill] sm:$0xff] %v5735_v7  ;;  %v5741_v0 = vadd.f32 %v2838_v38, %v6288_v60  ;;  %v2886_v48 = vld [vmem:[#allocation3 + $0x8f8] sm:$0xff]  ;;  %v2904_v9 = vld [vmem:[#allocation6 + $0x888] sm:$0xff]  ;;  %v2905_v44 = vld [vmem:[#allocation6 + $0x890] sm:$0xff]  ;;  %v2893_v38 = vsub.f32 %v2877_v43, %v5696_v26  ;;  %v2901_v43 = vsub.f32 %v2885_v45, %v2869_v63 }
 0x247   :  { %6287 = vst [vmem:[#allocation20_spill] sm:$0xff] %v5738_v41  ;;  %v2906_v29 = vld [vmem:[#allocation6 + $0x898] sm:$0xff]  ;;  %v2907_v1 = vld [vmem:[#allocation6 + $0x8a0] sm:$0xff]  ;;  %v2908_v25 = vld [vmem:[#allocation6 + $0x8a8] sm:$0xff]  ;;  %v2900_v41 = vsub.f32 %v2884_v21, %v2868_v16  ;;  %v2902_v7 = vsub.f32 %v2886_v48, %v2870_v2  ;;  %v2920_v35 = vsub.f32 %v2904_v9, %v5674_v54  ;;  %v2921_v13 = vsub.f32 %v2905_v44, %v5676_v24 }
 0x248   :  { %6289 = vst [vmem:[#allocation21_spill] sm:$0xff] %v5741_v0  ;;  %v2909_v19 = vld [vmem:[#allocation6 + $0x8b0] sm:$0xff]  ;;  %v2910_v60 = vld [vmem:[#allocation6 + $0x8b8] sm:$0xff]  ;;  %v2911_v0 = vld [vmem:[#allocation6 + $0x8c0] sm:$0xff]  ;;  %v2922_v10 = vsub.f32 %v2906_v29, %v5678_v20  ;;  %v2923_v57 = vsub.f32 %v2907_v1, %v5680_v4  ;;  %v2924_v21 = vsub.f32 %v2908_v25, %v5694_v3  ;;  %v2935_v4 = vmul.f32 %v2887_v37, %v2887_v37 }
 0x249   :  { %v2912_v53 = vld [vmem:[#allocation6 + $0x8c8] sm:$0xff]  ;;  %v2913_v5 = vld [vmem:[#allocation6 + $0x8d0] sm:$0xff]  ;;  %v2914_v15 = vld [vmem:[#allocation6 + $0x8d8] sm:$0xff]  ;;  %v2925_v45 = vsub.f32 %v2909_v19, %v5696_v26  ;;  %v2926_v48 = vsub.f32 %v2910_v60, %v5698_v51  ;;  %v2927_v52 = vsub.f32 %v2911_v0, %v5700_v23  ;;  %v2936_v29 = vmul.f32 %v2888_v40, %v2888_v40 }
 0x24a   :  { %v2915_v8 = vld [vmem:[#allocation6 + $0x8e0] sm:$0xff]  ;;  %v2916_v34 = vld [vmem:[#allocation6 + $0x8e8] sm:$0xff]  ;;  %v2917_v33 = vld [vmem:[#allocation6 + $0x8f0] sm:$0xff]  ;;  %v2928_v27 = vsub.f32 %v2912_v53, %v5714_v31  ;;  %v2929_v49 = vsub.f32 %v2913_v5, %v5716_v14  ;;  %v2930_v54 = vsub.f32 %v2914_v15, %v5718_v58  ;;  %v2937_v3 = vmul.f32 %v2889_v36, %v2889_v36 }
 0x24b   :  { %v2918_v62 = vld [vmem:[#allocation6 + $0x8f8] sm:$0xff]  ;;  %v2931_v24 = vsub.f32 %v2915_v8, %v5720_v61  ;;  %v2932_v9 = vsub.f32 %v2916_v34, %v2868_v16  ;;  %v2933_v20 = vsub.f32 %v2917_v33, %v2869_v63  ;;  %v2938_v1 = vmul.f32 %v2890_v39, %v2890_v39 }
 0x24c   :  { %v2934_v44 = vsub.f32 %v2918_v62, %v2870_v2  ;;  %v2939_v26 = vmul.f32 %v2891_v56, %v2891_v56  ;;  %v2940_v25 = vmul.f32 %v2892_v42, %v2892_v42  ;;  %v2941_v51 = vmul.f32 %v2893_v38, %v2893_v38 }
 0x24d   :  { %v2942_v19 = vmul.f32 %v2894_v47, %v2894_v47  ;;  %v2943_v23 = vmul.f32 %v2895_v32, %v2895_v32  ;;  %v2944_v0 = vmul.f32 %v2896_v59, %v2896_v59  ;;  %v2945_v31 = vmul.f32 %v2897_v55, %v2897_v55 }
 0x24e   :  { %v2946_v60 = vmul.f32 %v2898_v22, %v2898_v22  ;;  %v2947_v14 = vmul.f32 %v2899_v28, %v2899_v28  ;;  %v2948_v53 = vmul.f32 %v2900_v41, %v2900_v41  ;;  %v2949_v58 = vmul.f32 %v2901_v43, %v2901_v43 }
 0x24f   :  { %v2950_v15 = vmul.f32 %v2902_v7, %v2902_v7  ;;  %v2951_v61 = vmul.f32 %v2919_v17, %v2919_v17  ;;  %v2952_v34 = vmul.f32 %v2920_v35, %v2920_v35  ;;  %v2953_v33 = vmul.f32 %v2921_v13, %v2921_v13  ;;  %v5769_v13 = vld [vmem:[#allocation8 + $0x900] sm:$0xff] }
 0x250   :  { %v2954_v16 = vmul.f32 %v2922_v10, %v2922_v10  ;;  %v2955_v63 = vmul.f32 %v2923_v57, %v2923_v57  ;;  %v2956_v2 = vmul.f32 %v2924_v21, %v2924_v21  ;;  %v2957_v37 = vmul.f32 %v2925_v45, %v2925_v45  ;;  %v5771_v10 = vld [vmem:[#allocation8 + $0x908] sm:$0xff]  ;;  %v5773_v21 = vld [vmem:[#allocation8 + $0x910] sm:$0xff]  ;;  %v3015_v45 = vld [vmem:[#allocation3 + $0x900] sm:$0xff] }
 0x251   :  { %v2958_v40 = vmul.f32 %v2926_v48, %v2926_v48  ;;  %v2959_v36 = vmul.f32 %v2927_v52, %v2927_v52  ;;  %v2960_v39 = vmul.f32 %v2928_v27, %v2928_v27  ;;  %v2961_v56 = vmul.f32 %v2929_v49, %v2929_v49  ;;  %v3016_v48 = vld [vmem:[#allocation3 + $0x908] sm:$0xff]  ;;  %v3017_v27 = vld [vmem:[#allocation3 + $0x910] sm:$0xff] }
 0x252   :  { %v2962_v42 = vmul.f32 %v2930_v54, %v2930_v54  ;;  %v2963_v38 = vmul.f32 %v2931_v24, %v2931_v24  ;;  %v2964_v47 = vmul.f32 %v2932_v9, %v2932_v9  ;;  %v2965_v32 = vmul.f32 %v2933_v20, %v2933_v20  ;;  %v5782_v20 = vld [vmem:[#allocation8 + $0x918] sm:$0xff] }
 0x253   :  { %v2966_v59 = vmul.f32 %v2934_v44, %v2934_v44  ;;  %v2967_v55 = vadd.f32 %v2951_v61, %v2935_v4  ;;  %v2968_v41 = vadd.f32 %v2952_v34, %v2936_v29  ;;  %v2969_v22 = vadd.f32 %v2953_v33, %v2937_v3  ;;  %v5784_v44 = vld [vmem:[#allocation8 + $0x920] sm:$0xff]  ;;  %v5786_v4 = vld [vmem:[#allocation8 + $0x928] sm:$0xff]  ;;  %v5788_v29 = vld [vmem:[#allocation8 + $0x930] sm:$0xff] }
 0x254   :  { %v2970_v7 = vadd.f32 %v2954_v16, %v2938_v1  ;;  %v2971_v17 = vadd.f32 %v2955_v63, %v2939_v26  ;;  %v2972_v28 = vadd.f32 %v2956_v2, %v2940_v25  ;;  %v2973_v43 = vadd.f32 %v2957_v37, %v2941_v51  ;;  %v3018_v3 = vld [vmem:[#allocation3 + $0x918] sm:$0xff]  ;;  %v3019_v1 = vld [vmem:[#allocation3 + $0x920] sm:$0xff]  ;;  %v3020_v26 = vld [vmem:[#allocation3 + $0x928] sm:$0xff] }
 0x255   :  { %v2974_v5 = vadd.f32 %v2958_v40, %v2942_v19  ;;  %v2975_v57 = vadd.f32 %v2959_v36, %v2943_v23  ;;  %v2976_v8 = vadd.f32 %v2960_v39, %v2944_v0  ;;  %v2977_v62 = vadd.f32 %v2961_v56, %v2945_v31  ;;  %v5802_v23 = vld [vmem:[#allocation8 + $0x938] sm:$0xff]  ;;  %v5804_v0 = vld [vmem:[#allocation8 + $0x940] sm:$0xff]  ;;  %v5806_v31 = vld [vmem:[#allocation8 + $0x948] sm:$0xff] }
 0x256   :  { %v2978_v35 = vadd.f32 %v2962_v42, %v2946_v60  ;;  %v2979_v52 = vadd.f32 %v2963_v38, %v2947_v14  ;;  %v2980_v49 = vadd.f32 %v2964_v47, %v2948_v53  ;;  %v5775_v54 = vadd.f32 %v2965_v32, %v2949_v58  ;;  %v5808_v60 = vld [vmem:[#allocation8 + $0x950] sm:$0xff]  ;;  %v3023_v53 = vld [vmem:[#allocation3 + $0x940] sm:$0xff]  ;;  %v3010_v34 = vld [vmem:[#allocation8 + $0x958] sm:$0xff] }
 0x257   :  { %v5777_v24 = vadd.f32 %v2966_v59, %v2950_v15  ;;  %v5780_v9 = vadd.f32 %v2967_v55, %v5672_v11  ;;  %v5791_v25 = vadd.f32 %v2968_v41, %v5683_v46  ;;  %v5794_v51 = vadd.f32 %v2969_v22, %v5686_v18  ;;  %v3021_v14 = vld [vmem:[#allocation3 + $0x930] sm:$0xff]  ;;  %v3022_v46 = vld [vmem:[#allocation3 + $0x938] sm:$0xff]  ;;  %v6293_v58 = vld [vmem:[#allocation40_spill] sm:$0xff] }
 0x258   :  { %6290 = vst [vmem:[#allocation22_spill] sm:$0xff] %v5775_v54  ;;  %v5797_v11 = vadd.f32 %v2970_v7, %v5689_v12  ;;  %v5800_v19 = vadd.f32 %v2971_v17, %v5692_v50  ;;  %v5811_v18 = vadd.f32 %v2972_v28, %v5703_v6  ;;  %v5814_v12 = vadd.f32 %v2973_v43, %v5706_v30  ;;  %v6295_v15 = vld [vmem:[#allocation28_spill] sm:$0xff]  ;;  %v3012_v16 = vld [vmem:[#allocation8 + $0x968] sm:$0xff]  ;;  %v3013_v63 = vld [vmem:[#allocation8 + $0x970] sm:$0xff] }
 0x259   :  { %6291 = vst [vmem:[#allocation30_spill] sm:$0xff] %v5777_v24  ;;  %v5817_v50 = vadd.f32 %v2974_v5, %v6293_v58  ;;  %v5820_v61 = vadd.f32 %v2975_v57, %v6295_v15  ;;  %v3011_v33 = vld [vmem:[#allocation8 + $0x960] sm:$0xff]  ;;  %v3024_v2 = vld [vmem:[#allocation3 + $0x948] sm:$0xff]  ;;  %v3025_v37 = vld [vmem:[#allocation3 + $0x950] sm:$0xff]  ;;  %v3031_v43 = vsub.f32 %v3015_v45, %v5769_v13  ;;  %v3032_v5 = vsub.f32 %v3016_v48, %v5771_v10 }
 0x25a   :  { %6292 = vst [vmem:[#allocation26_spill] sm:$0xff] %v5814_v12  ;;  %v3026_v40 = vld [vmem:[#allocation3 + $0x958] sm:$0xff]  ;;  %v6297_v36 = vld [vmem:[#allocation29_spill] sm:$0xff]  ;;  %v6299_v6 = vld [vmem:[#allocation18_spill] sm:$0xff]  ;;  %v3033_v57 = vsub.f32 %v3017_v27, %v5773_v21  ;;  %v3036_v58 = vsub.f32 %v3020_v26, %v5786_v4  ;;  %v3037_v15 = vsub.f32 %v3021_v14, %v5788_v29  ;;  %v3039_v45 = vsub.f32 %v3023_v53, %v5804_v0 }
 0x25b   :  { %6294 = vst [vmem:[#allocation23_spill] sm:$0xff] %v5817_v50  ;;  %6296 = vst [vmem:[#allocation31_spill] sm:$0xff] %v5820_v61  ;;  %v5823_v39 = vadd.f32 %v2976_v8, %v6297_v36  ;;  %v5826_v56 = vadd.f32 %v2977_v62, %v6299_v6  ;;  %v6301_v30 = vld [vmem:[#allocation24_spill] sm:$0xff]  ;;  %v6303_v38 = vld [vmem:[#allocation25_spill] sm:$0xff]  ;;  %v3040_v48 = vsub.f32 %v3024_v2, %v5806_v31 }
 0x25c   :  { %v5829_v42 = vadd.f32 %v2978_v35, %v6301_v30  ;;  %v5832_v47 = vadd.f32 %v2979_v52, %v6303_v38  ;;  %v3014_v32 = vld [vmem:[#allocation8 + $0x978] sm:$0xff]  ;;  %v3027_v59 = vld [vmem:[#allocation3 + $0x960] sm:$0xff]  ;;  %v3028_v55 = vld [vmem:[#allocation3 + $0x968] sm:$0xff]  ;;  %v3034_v35 = vsub.f32 %v3018_v3, %v5782_v20  ;;  %v3035_v52 = vsub.f32 %v3019_v1, %v5784_v44 }
 0x25d   :  { %6298 = vst [vmem:[#allocation32_spill] sm:$0xff] %v5823_v39  ;;  %6300 = vst [vmem:[#allocation33_spill] sm:$0xff] %v5826_v56  ;;  %v3029_v41 = vld [vmem:[#allocation3 + $0x970] sm:$0xff]  ;;  %v3047_v22 = vld [vmem:[#allocation6 + $0x900] sm:$0xff]  ;;  %v3038_v30 = vsub.f32 %v3022_v46, %v5802_v23  ;;  %v3041_v27 = vsub.f32 %v3025_v37, %v5808_v60  ;;  %v3043_v1 = vsub.f32 %v3027_v59, %v3011_v33 }
 0x25e   :  { %6302 = vst [vmem:[#allocation34_spill] sm:$0xff] %v5829_v42  ;;  %6304 = vst [vmem:[#allocation35_spill] sm:$0xff] %v5832_v47  ;;  %v6305_v7 = vld [vmem:[#allocation19_spill] sm:$0xff]  ;;  %v3048_v8 = vld [vmem:[#allocation6 + $0x908] sm:$0xff]  ;;  %v3044_v24 = vsub.f32 %v3028_v55, %v3012_v16  ;;  %v3045_v26 = vsub.f32 %v3029_v41, %v3013_v63  ;;  %v3063_v53 = vsub.f32 %v3047_v22, %v5769_v13 }
 0x25f   :  { %v5835_v17 = vadd.f32 %v2980_v49, %v6305_v7  ;;  %v3030_v28 = vld [vmem:[#allocation3 + $0x978] sm:$0xff]  ;;  %v3049_v62 = vld [vmem:[#allocation6 + $0x910] sm:$0xff]  ;;  %v3051_v49 = vld [vmem:[#allocation6 + $0x920] sm:$0xff]  ;;  %v3064_v2 = vsub.f32 %v3048_v8, %v5771_v10 }
 0x260   :  { %v3050_v36 = vld [vmem:[#allocation6 + $0x918] sm:$0xff]  ;;  %v3052_v6 = vld [vmem:[#allocation6 + $0x928] sm:$0xff]  ;;  %v3053_v38 = vld [vmem:[#allocation6 + $0x930] sm:$0xff]  ;;  %v3046_v42 = vsub.f32 %v3030_v28, %v3014_v32  ;;  %v3065_v37 = vsub.f32 %v3049_v62, %v5773_v21 }
 0x261   :  { %6306 = vst [vmem:[#allocation36_spill] sm:$0xff] %v5835_v17  ;;  %v3054_v7 = vld [vmem:[#allocation6 + $0x938] sm:$0xff]  ;;  %v3055_v3 = vld [vmem:[#allocation6 + $0x940] sm:$0xff]  ;;  %v3042_v17 = vsub.f32 %v3026_v40, %v3010_v34  ;;  %v3056_v47 = vld [vmem:[#allocation6 + $0x948] sm:$0xff]  ;;  %v3066_v50 = vsub.f32 %v3050_v36, %v5782_v20  ;;  %v3067_v40 = vsub.f32 %v3051_v49, %v5784_v44  ;;  %v3068_v59 = vsub.f32 %v3052_v6, %v5786_v4 }
 0x262   :  { %v3057_v14 = vld [vmem:[#allocation6 + $0x950] sm:$0xff]  ;;  %v3058_v54 = vld [vmem:[#allocation6 + $0x958] sm:$0xff]  ;;  %v3059_v56 = vld [vmem:[#allocation6 + $0x960] sm:$0xff]  ;;  %v3069_v55 = vsub.f32 %v3053_v38, %v5788_v29  ;;  %v3070_v41 = vsub.f32 %v3054_v7, %v5802_v23  ;;  %v3071_v28 = vsub.f32 %v3055_v3, %v5804_v0  ;;  %v3072_v12 = vsub.f32 %v3056_v47, %v5806_v31 }
 0x263   :  { %v3060_v39 = vld [vmem:[#allocation6 + $0x968] sm:$0xff]  ;;  %v3061_v46 = vld [vmem:[#allocation6 + $0x970] sm:$0xff]  ;;  %v3062_v61 = vld [vmem:[#allocation6 + $0x978] sm:$0xff]  ;;  %v3073_v13 = vsub.f32 %v3057_v14, %v5808_v60  ;;  %v3074_v10 = vsub.f32 %v3058_v54, %v3010_v34  ;;  %v3075_v22 = vsub.f32 %v3059_v56, %v3011_v33  ;;  %v3079_v20 = vmul.f32 %v3031_v43, %v3031_v43 }
 0x264   :  { %v3076_v21 = vsub.f32 %v3060_v39, %v3012_v16  ;;  %v3077_v8 = vsub.f32 %v3061_v46, %v3013_v63  ;;  %v3078_v62 = vsub.f32 %v3062_v61, %v3014_v32  ;;  %v3080_v36 = vmul.f32 %v3032_v5, %v3032_v5  ;;  %v3143_v63 = vld [vmem:[#allocation8 + $0x980] sm:$0xff]  ;;  %v3144_v39 = vld [vmem:[#allocation8 + $0x988] sm:$0xff]  ;;  %v3162_v14 = vld [vmem:[#allocation3 + $0x998] sm:$0xff] }
 0x265   :  { %v3081_v44 = vmul.f32 %v3033_v57, %v3033_v57  ;;  %v3082_v49 = vmul.f32 %v3034_v35, %v3034_v35  ;;  %v3083_v4 = vmul.f32 %v3035_v52, %v3035_v52  ;;  %v3084_v6 = vmul.f32 %v3036_v58, %v3036_v58  ;;  %v3159_v56 = vld [vmem:[#allocation3 + $0x980] sm:$0xff]  ;;  %v3192_v35 = vld [vmem:[#allocation6 + $0x988] sm:$0xff] }
 0x266   :  { %v3085_v29 = vmul.f32 %v3037_v15, %v3037_v15  ;;  %v3086_v38 = vmul.f32 %v3038_v30, %v3038_v30  ;;  %v3087_v23 = vmul.f32 %v3039_v45, %v3039_v45  ;;  %v3088_v7 = vmul.f32 %v3040_v48, %v3040_v48  ;;  %v3191_v57 = vld [vmem:[#allocation6 + $0x980] sm:$0xff] }
 0x267   :  { %v3089_v0 = vmul.f32 %v3041_v27, %v3041_v27  ;;  %v5859_v3 = vmul.f32 %v3042_v17, %v3042_v17  ;;  %v5861_v31 = vmul.f32 %v3043_v1, %v3043_v1  ;;  %v5863_v54 = vmul.f32 %v3044_v24, %v3044_v24  ;;  %v3160_v17 = vld [vmem:[#allocation3 + $0x988] sm:$0xff]  ;;  %v3145_v27 = vld [vmem:[#allocation8 + $0x990] sm:$0xff] }
 0x268   :  { %v5865_v60 = vmul.f32 %v3045_v26, %v3045_v26  ;;  %v5867_v61 = vmul.f32 %v3046_v42, %v3046_v42  ;;  %v3095_v34 = vmul.f32 %v3063_v53, %v3063_v53  ;;  %v3096_v33 = vmul.f32 %v3064_v2, %v3064_v2  ;;  %v3161_v1 = vld [vmem:[#allocation3 + $0x990] sm:$0xff]  ;;  %v3194_v2 = vld [vmem:[#allocation6 + $0x998] sm:$0xff] }
 0x269   :  { %v3097_v16 = vmul.f32 %v3065_v37, %v3065_v37  ;;  %v3098_v47 = vmul.f32 %v3066_v50, %v3066_v50  ;;  %v3099_v32 = vmul.f32 %v3067_v40, %v3067_v40  ;;  %v3100_v43 = vmul.f32 %v3068_v59, %v3068_v59  ;;  %v3193_v26 = vld [vmem:[#allocation6 + $0x990] sm:$0xff]  ;;  %v3146_v50 = vld [vmem:[#allocation8 + $0x998] sm:$0xff] }
 0x26a   :  { %6307 = vst [vmem:[#allocation27_spill] sm:$0xff] %v5865_v60  ;;  %6308 = vst [vmem:[#allocation37_spill] sm:$0xff] %v5867_v61  ;;  %v3101_v5 = vmul.f32 %v3069_v55, %v3069_v55  ;;  %v3102_v52 = vmul.f32 %v3070_v41, %v3070_v41  ;;  %v3103_v24 = vmul.f32 %v3071_v28, %v3071_v28  ;;  %v3147_v61 = vld [vmem:[#allocation8 + $0x9a0] sm:$0xff] }
 0x26b   :  { %v3104_v58 = vmul.f32 %v3072_v12, %v3072_v12  ;;  %v3105_v15 = vmul.f32 %v3073_v13, %v3073_v13  ;;  %v3106_v30 = vmul.f32 %v3074_v10, %v3074_v10  ;;  %v3107_v42 = vmul.f32 %v3075_v22, %v3075_v22 }
 0x26c   :  { %v5869_v45 = vmul.f32 %v3076_v21, %v3076_v21  ;;  %v5871_v48 = vmul.f32 %v3077_v8, %v3077_v8  ;;  %v3175_v46 = vsub.f32 %v3159_v56, %v3143_v63  ;;  %v3176_v53 = vsub.f32 %v3160_v17, %v3144_v39  ;;  %v3195_v17 = vld [vmem:[#allocation6 + $0x9a0] sm:$0xff] }
 0x26d   :  { %v3207_v37 = vsub.f32 %v3191_v57, %v3143_v63  ;;  %v3208_v40 = vsub.f32 %v3192_v35, %v3144_v39  ;;  %v5873_v59 = vmul.f32 %v3078_v62, %v3078_v62  ;;  %v3111_v12 = vadd.f32 %v3095_v34, %v3079_v20  ;;  %v3148_v63 = vld [vmem:[#allocation8 + $0x9a8] sm:$0xff]  ;;  %v3149_v34 = vld [vmem:[#allocation8 + $0x9b0] sm:$0xff] }
 0x26e   :  { %6309 = vst [vmem:[#allocation38_spill] sm:$0xff] %v5871_v48  ;;  %v3112_v55 = vadd.f32 %v3096_v33, %v3080_v36  ;;  %v3113_v41 = vadd.f32 %v3097_v16, %v3081_v44  ;;  %v3114_v28 = vadd.f32 %v3098_v47, %v3082_v49  ;;  %v3115_v13 = vadd.f32 %v3099_v32, %v3083_v4  ;;  %v3163_v48 = vld [vmem:[#allocation3 + $0x9a0] sm:$0xff]  ;;  %v3164_v39 = vld [vmem:[#allocation3 + $0x9a8] sm:$0xff]  ;;  %v3165_v33 = vld [vmem:[#allocation3 + $0x9b0] sm:$0xff] }
 0x26f   :  { %v3177_v10 = vsub.f32 %v3161_v1, %v3145_v27  ;;  %v3209_v22 = vsub.f32 %v3193_v26, %v3145_v27  ;;  %v5875_v21 = vadd.f32 %v3100_v43, %v3084_v6  ;;  %v5877_v8 = vadd.f32 %v3101_v5, %v3085_v29  ;;  %v3196_v62 = vld [vmem:[#allocation6 + $0x9a8] sm:$0xff]  ;;  %v3197_v1 = vld [vmem:[#allocation6 + $0x9b0] sm:$0xff] }
 0x270   :  { %v3178_v56 = vsub.f32 %v3162_v14, %v3146_v50  ;;  %v3210_v60 = vsub.f32 %v3194_v2, %v3146_v50  ;;  %v3223_v57 = vmul.f32 %v3175_v46, %v3175_v46  ;;  %v3224_v20 = vmul.f32 %v3176_v53, %v3176_v53  ;;  %v3167_v50 = vld [vmem:[#allocation3 + $0x9c0] sm:$0xff] }
 0x271   :  { %v3239_v36 = vmul.f32 %v3207_v37, %v3207_v37  ;;  %v3240_v44 = vmul.f32 %v3208_v40, %v3208_v40  ;;  %v5879_v49 = vadd.f32 %v3102_v52, %v3086_v38  ;;  %v5881_v4 = vadd.f32 %v3103_v24, %v3087_v23  ;;  %v3150_v52 = vld [vmem:[#allocation8 + $0x9b8] sm:$0xff]  ;;  %v3199_v14 = vld [vmem:[#allocation6 + $0x9c0] sm:$0xff] }
 0x272   :  { %v5883_v6 = vadd.f32 %v3104_v58, %v3088_v7  ;;  %v5885_v29 = vadd.f32 %v3105_v15, %v3089_v0  ;;  %v3179_v16 = vsub.f32 %v3163_v48, %v3147_v61  ;;  %v3211_v47 = vsub.f32 %v3195_v17, %v3147_v61  ;;  %v3166_v23 = vld [vmem:[#allocation3 + $0x9b8] sm:$0xff] }
 0x273   :  { %v3225_v32 = vmul.f32 %v3177_v10, %v3177_v10  ;;  %v3241_v43 = vmul.f32 %v3209_v22, %v3209_v22  ;;  %v3127_v5 = vadd.f32 %v3111_v12, %v5780_v9  ;;  %v3128_v35 = vadd.f32 %v3112_v55, %v5791_v25  ;;  %v3198_v24 = vld [vmem:[#allocation6 + $0x9b8] sm:$0xff]  ;;  %v3151_v25 = vld [vmem:[#allocation8 + $0x9c0] sm:$0xff]  ;;  %v3200_v10 = vld [vmem:[#allocation6 + $0x9c8] sm:$0xff] }
 0x274   :  { %v3180_v27 = vsub.f32 %v3164_v39, %v3148_v63  ;;  %v3212_v38 = vsub.f32 %v3196_v62, %v3148_v63  ;;  %v3226_v7 = vmul.f32 %v3178_v56, %v3178_v56  ;;  %v3242_v58 = vmul.f32 %v3210_v60, %v3210_v60  ;;  %v3153_v39 = vld [vmem:[#allocation8 + $0x9d0] sm:$0xff] }
 0x275   :  { %v3255_v0 = vadd.f32 %v3239_v36, %v3223_v57  ;;  %v3256_v15 = vadd.f32 %v3240_v44, %v3224_v20  ;;  %v5890_v26 = vadd.f32 %v3106_v30, %v5859_v3  ;;  %v5893_v61 = vadd.f32 %v3107_v42, %v5861_v31  ;;  %v3152_v3 = vld [vmem:[#allocation8 + $0x9c8] sm:$0xff] }
 0x276   :  { %v3129_v9 = vadd.f32 %v3113_v41, %v5794_v51  ;;  %v3181_v48 = vsub.f32 %v3165_v33, %v3149_v34  ;;  %v3213_v46 = vsub.f32 %v3197_v1, %v3149_v34  ;;  %v3227_v53 = vmul.f32 %v3179_v16, %v3179_v16  ;;  %v3168_v30 = vld [vmem:[#allocation3 + $0x9c8] sm:$0xff] }
 0x277   :  { %v3243_v2 = vmul.f32 %v3211_v47, %v3211_v47  ;;  %v3257_v37 = vadd.f32 %v3241_v43, %v3225_v32  ;;  %v3130_v60 = vadd.f32 %v3114_v28, %v5797_v11  ;;  %v3182_v40 = vsub.f32 %v3166_v23, %v3150_v52  ;;  %v3169_v11 = vld [vmem:[#allocation3 + $0x9d0] sm:$0xff]  ;;  %v3154_v47 = vld [vmem:[#allocation8 + $0x9d8] sm:$0xff]  ;;  %v3171_v23 = vld [vmem:[#allocation3 + $0x9e0] sm:$0xff] }
 0x278   :  { %v3214_v12 = vsub.f32 %v3198_v24, %v3150_v52  ;;  %v3228_v55 = vmul.f32 %v3180_v27, %v3180_v27  ;;  %v3244_v31 = vmul.f32 %v3212_v38, %v3212_v38  ;;  %v3258_v42 = vadd.f32 %v3242_v58, %v3226_v7  ;;  %v3201_v28 = vld [vmem:[#allocation6 + $0x9d0] sm:$0xff]  ;;  %v3155_v52 = vld [vmem:[#allocation8 + $0x9e0] sm:$0xff] }
 0x279   :  { %v3271_v22 = vadd.f32 %v3255_v0, %v3127_v5  ;;  %v3272_v51 = vadd.f32 %v3256_v15, %v3128_v35  ;;  %v5899_v41 = vadd.f32 %v5869_v45, %v5863_v54  ;;  %v3131_v56 = vadd.f32 %v3115_v13, %v5800_v19  ;;  %v3170_v54 = vld [vmem:[#allocation3 + $0x9d8] sm:$0xff]  ;;  %v6310_v5 = vld [vmem:[#allocation26_spill] sm:$0xff]  ;;  %v3203_v24 = vld [vmem:[#allocation6 + $0x9e0] sm:$0xff] }
 0x27a   :  { %v3183_v17 = vsub.f32 %v3167_v50, %v3151_v25  ;;  %v3215_v63 = vsub.f32 %v3199_v14, %v3151_v25  ;;  %v3229_v62 = vmul.f32 %v3181_v48, %v3181_v48  ;;  %v3245_v57 = vmul.f32 %v3213_v46, %v3213_v46  ;;  %v3202_v45 = vld [vmem:[#allocation6 + $0x9d8] sm:$0xff]  ;;  %v3156_v50 = vld [vmem:[#allocation8 + $0x9e8] sm:$0xff] }
 0x27b   :  { %v3259_v20 = vadd.f32 %v3243_v2, %v3227_v53  ;;  %v3273_v36 = vadd.f32 %v3257_v37, %v3129_v9  ;;  %v3132_v44 = vadd.f32 %v5875_v21, %v5811_v18  ;;  %v3184_v34 = vsub.f32 %v3168_v30, %v3152_v3  ;;  %v6311_v0 = vld [vmem:[#allocation23_spill] sm:$0xff]  ;;  %v3172_v14 = vld [vmem:[#allocation3 + $0x9e8] sm:$0xff]  ;;  %v3157_v30 = vld [vmem:[#allocation8 + $0x9f0] sm:$0xff] }
 0x27c   :  { %v3216_v33 = vsub.f32 %v3200_v10, %v3152_v3  ;;  %v3230_v16 = vmul.f32 %v3182_v40, %v3182_v40  ;;  %v3246_v32 = vmul.f32 %v3214_v12, %v3214_v12  ;;  %v3260_v19 = vadd.f32 %v3244_v31, %v3228_v55  ;;  %v3204_v46 = vld [vmem:[#allocation6 + $0x9e8] sm:$0xff]  ;;  %v3173_v10 = vld [vmem:[#allocation3 + $0x9f0] sm:$0xff] }
 0x27d   :  { %v3274_v13 = vadd.f32 %v3258_v42, %v3130_v60  ;;  %v3287_v43 = vadd.f32 %v3272_v51, %v3271_v22  ;;  %v3133_v35 = vadd.f32 %v5877_v8, %v6310_v5  ;;  %v3185_v27 = vsub.f32 %v3169_v11, %v3153_v39  ;;  %v6312_v60 = vld [vmem:[#allocation31_spill] sm:$0xff]  ;;  %v3205_v31 = vld [vmem:[#allocation6 + $0x9f0] sm:$0xff] }
 0x27e   :  { %v3217_v1 = vsub.f32 %v3201_v28, %v3153_v39  ;;  %v3231_v38 = vmul.f32 %v3183_v17, %v3183_v17  ;;  %v3247_v18 = vmul.f32 %v3215_v63, %v3215_v63  ;;  %v3261_v21 = vadd.f32 %v3245_v57, %v3229_v62  ;;  %v3158_v28 = vld [vmem:[#allocation8 + $0x9f8] sm:$0xff] }
 0x27f   :  { %v3275_v7 = vadd.f32 %v3259_v20, %v3131_v56  ;;  %v3288_v58 = vadd.f32 %v3287_v43, %v3273_v36  ;;  %v3134_v15 = vadd.f32 %v5879_v49, %v6311_v0  ;;  %v3186_v9 = vsub.f32 %v3170_v54, %v3154_v47  ;;  %v6313_v56 = vld [vmem:[#allocation32_spill] sm:$0xff]  ;;  %v3174_v62 = vld [vmem:[#allocation3 + $0x9f8] sm:$0xff] }
 0x280   :  { %v3218_v48 = vsub.f32 %v3202_v45, %v3154_v47  ;;  %v3232_v25 = vmul.f32 %v3184_v34, %v3184_v34  ;;  %v3248_v8 = vmul.f32 %v3216_v33, %v3216_v33  ;;  %v3262_v53 = vadd.f32 %v3246_v32, %v3230_v16  ;;  %v3206_v57 = vld [vmem:[#allocation6 + $0x9f8] sm:$0xff]  ;;  %v6314_v34 = vld [vmem:[#allocation33_spill] sm:$0xff] }
 0x281   :  { %v3276_v2 = vadd.f32 %v3260_v19, %v3132_v44  ;;  %v3289_v37 = vadd.f32 %v3288_v58, %v3274_v13  ;;  %v3135_v40 = vadd.f32 %v5881_v4, %v6312_v60  ;;  %v3187_v12 = vsub.f32 %v3171_v23, %v3155_v52  ;;  %v6315_v13 = vld [vmem:[#allocation34_spill] sm:$0xff]  ;;  %v6320_v0 = vld [vmem:[#allocation35_spill] sm:$0xff] }
 0x282   :  { %v3219_v55 = vsub.f32 %v3203_v24, %v3155_v52  ;;  %v3233_v3 = vmul.f32 %v3185_v27, %v3185_v27  ;;  %v3249_v49 = vmul.f32 %v3217_v1, %v3217_v1  ;;  %v3263_v42 = vadd.f32 %v3247_v18, %v3231_v38  ;;  %v6316_v24 = vld [vmem:[#allocation20_spill] sm:$0xff]  ;;  %v6317_v18 = vld [vmem:[#allocation22_spill] sm:$0xff] }
 0x283   :  { %v3277_v22 = vadd.f32 %v3261_v21, %v3133_v35  ;;  %v3290_v51 = vadd.f32 %v3289_v37, %v3275_v7  ;;  %v3136_v17 = vadd.f32 %v5883_v6, %v6313_v56  ;;  %v3188_v63 = vsub.f32 %v3172_v14, %v3156_v50  ;;  %v6318_v21 = vld [vmem:[#allocation27_spill] sm:$0xff]  ;;  %v6319_v7 = vld [vmem:[#allocation38_spill] sm:$0xff]  ;;  %v6321_v14 = vld [vmem:[#allocation21_spill] sm:$0xff] }
 0x284   :  { %v3220_v39 = vsub.f32 %v3204_v46, %v3156_v50  ;;  %v3234_v11 = vmul.f32 %v3186_v9, %v3186_v9  ;;  %v3250_v4 = vmul.f32 %v3218_v48, %v3218_v48  ;;  %v3264_v20 = vadd.f32 %v3248_v8, %v3232_v25  ;;  %v6322_v46 = vld [vmem:[#allocation30_spill] sm:$0xff]  ;;  %v6324_v37 = vld [vmem:[#allocation36_spill] sm:$0xff] }
 0x285   :  { %v3278_v36 = vadd.f32 %v3262_v53, %v3134_v15  ;;  %v3291_v44 = vadd.f32 %v3290_v51, %v3276_v2  ;;  %v3137_v33 = vadd.f32 %v5885_v29, %v6314_v34  ;;  %v3189_v16 = vsub.f32 %v3173_v10, %v3157_v30  ;;  %v6323_v53 = vld [vmem:[#allocation37_spill] sm:$0xff] }
 0x286   :  { %v3221_v47 = vsub.f32 %v3205_v31, %v3157_v30  ;;  %v3235_v54 = vmul.f32 %v3187_v12, %v3187_v12  ;;  %v3251_v45 = vmul.f32 %v3219_v55, %v3219_v55  ;;  %v3265_v32 = vadd.f32 %v3249_v49, %v3233_v3 }
 0x287   :  { %v3279_v19 = vadd.f32 %v3263_v42, %v3135_v40  ;;  %v3292_v6 = vadd.f32 %v3291_v44, %v3277_v22  ;;  %v3138_v43 = vadd.f32 %v5890_v26, %v6315_v13  ;;  %v3190_v5 = vsub.f32 %v3174_v62, %v3158_v28  ;;  %v6326_v13 = vld [vmem:[#allocation17_spill] sm:$0xff] }
 0x288   :  { %v3222_v35 = vsub.f32 %v3206_v57, %v3158_v28  ;;  %v3236_v27 = vmul.f32 %v3188_v63, %v3188_v63  ;;  %v3252_v1 = vmul.f32 %v3220_v39, %v3220_v39  ;;  %v3266_v38 = vadd.f32 %v3250_v4, %v3234_v11 }
 0x289   :  { %v3280_v52 = vadd.f32 %v3264_v20, %v3136_v17  ;;  %v3293_v23 = vadd.f32 %v3292_v6, %v3278_v36  ;;  %v2997_v29 = vadd.f32 %v6317_v18, %v6316_v24  ;;  %v3125_v58 = vadd.f32 %v6319_v7, %v6318_v21 }
 0x28a   :  { %v3139_v15 = vadd.f32 %v5893_v61, %v6320_v0  ;;  %v3237_v9 = vmul.f32 %v3189_v16, %v3189_v16  ;;  %v3253_v48 = vmul.f32 %v3221_v47, %v3221_v47  ;;  %v3267_v25 = vadd.f32 %v3251_v45, %v3235_v54 }
 0x28b   :  { %v3281_v26 = vadd.f32 %v3265_v32, %v3137_v33  ;;  %v3294_v50 = vadd.f32 %v3293_v23, %v3279_v19  ;;  %v2998_v8 = vadd.f32 %v6322_v46, %v6321_v14  ;;  %v3126_v2 = vadd.f32 %v5873_v59, %v6323_v53 }
 0x28c   :  { %v3140_v60 = vadd.f32 %v5899_v41, %v6324_v37  ;;  %v3238_v40 = vmul.f32 %v3190_v5, %v3190_v5  ;;  %v3254_v12 = vmul.f32 %v3222_v35, %v3222_v35  ;;  %v3268_v55 = vadd.f32 %v3252_v1, %v3236_v27  ;;  %v409_v41 = vpop.xlane.xlu0 %408 }
 0x28d   :  { %v3282_v3 = vadd.f32 %v3266_v38, %v3138_v43  ;;  %v3295_v30 = vadd.f32 %v3294_v50, %v3280_v52  ;;  %v3141_v61 = vadd.f32 %v3125_v58, %v2997_v29  ;;  %v3269_v10 = vadd.f32 %v3253_v48, %v3237_v9 }
 0x28e   :  { %v3283_v31 = vadd.f32 %v3267_v25, %v3139_v15  ;;  %v3142_v42 = vadd.f32 %v3126_v2, %v2998_v8  ;;  %v3270_v22 = vadd.f32 %v3254_v12, %v3238_v40  ;;  %v3284_v51 = vadd.f32 %v3268_v55, %v3140_v60 }
 0x28f   :  { %v3296_v49 = vadd.f32 %v3295_v30, %v3281_v26  ;;  %v3285_v17 = vadd.f32 %v3269_v10, %v3141_v61  ;;  %v410_v62 = vrot.slane %v409_v41, 4  ;;  %v6325_v19 = vlaneseq }
 0x290   :  { %v3286_v39 = vadd.f32 %v3270_v22, %v3142_v42  ;;  %vm417_vm5 = vcmp.eq.s32.totalorder %v6326_v13, 1  ;;  %vm3319_vm7 = vcmp.eq.s32.totalorder %v6326_v13, 0 }
 0x291   :  { %v3297_v56 = vadd.f32 %v3296_v49, %v3282_v3  ;;  %v411_v57 = vadd.f32 %v410_v62, %v409_v41  ;;  %v88_v6 = vand.u32 127, %v6325_v19 }
 0x293   :  { %v3298_v63 = vadd.f32 %v3297_v56, %v3283_v31  ;;  %v412_v4 = vrot.slane %v411_v57, 2  ;;  %vm418_vm6 = vcmp.eq.s32.totalorder %v88_v6, 0 }
 0x294   :  { %vm419_vm8 = vmand %vm417_vm5, %vm418_vm6 }
 0x295   :  { %v3299_v59 = vadd.f32 %v3298_v63, %v3284_v51  ;;  %v413_v20 = vadd.f32 %v412_v4, %v411_v57  ;;  %vm3321_vm9 = vmand %vm3319_vm7, %vm418_vm6 }
 0x297   :  { %v3300_v11 = vadd.f32 %v3299_v59, %v3285_v17  ;;  %v414_v36 = vrot.slane %v413_v20, 1 }
 0x299   :  { %v3301_v28 = vadd.f32 %v3300_v11, %v3286_v39  ;;  %v415_v44 = vadd.f32 %v414_v36, %v413_v20 }
 0x29b   :  { %3309 = vadd.xlane.f32.xlu0 %v3301_v28  ;;  %3343 = vpush %v415_v44 }
 0x2cc   :  { %s3344_s4 = spop %3343 }
 0x2cd   :  { %v420_v43 = vstv %s3344_s4 }
 0x2ce   :  { %v421_v35 = vsel %vm419_vm8, %v420_v43, 0.0 }
 0x328   :  { %v3310_v34 = vpop.xlane.xlu0 %3309 }
 0x329   :  { %v3311_v33 = vrot.slane %v3310_v34, 4 }
 0x32b   :  { %v3312_v16 = vadd.f32 %v3311_v33, %v3310_v34 }
 0x32d   :  { %v3313_v47 = vrot.slane %v3312_v16, 2 }
 0x32f   :  { %v3314_v54 = vadd.f32 %v3313_v47, %v3312_v16 }
 0x331   :  { %v3315_v45 = vrot.slane %v3314_v54, 1 }
 0x333   :  { %v3316_v32 = vadd.f32 %v3315_v45, %v3314_v54 }
 0x335   :  { %3345 = vpush %v3316_v32 }
 0x366   :  { %s3346_s6 = spop %3345 }
 0x367   :  { %v3322_v5 = vstv %s3346_s6 }
 0x368   :  { %v3323_v27 = vsel %vm3321_vm9, %v3322_v5, 0.0 }
 0x369   :  { %v3324_v1 = vadd.f32 %v3323_v27, %v421_v35 }
 0x36b   :  { %3325 = vst [vmem:[#allocation12] sm:$0xff] %v3324_v1 }
 0x36c   :  { %3493 = shalt.err (!%p3490_p2)
}
 0x36d   :  { %s3494_s7 = scalar_lea.hbm %s5948_s5, 128 }
 0x36e   :  { %p3495_p3 = scmp.ne.s32.totalorder %s5948_s5, %s3494_s7  ;;  %p3498_p4 = scmp.lt.u32.totalorder %s3494_s7, %s5948_s5 }
 0x370   :  { %p3500_p5 = pnand %p3498_p4, %p3495_p3 }
 0x372   :  { %3503 = shalt.err (!%p3500_p5)
}
 0x373   :  { %3335 = dma.vmem_to_hbm [thread:$0]  %s3333_s28, 128, %s5948_s5, [#allocation5]  }
 0x374   :  { %3510 = dma.done.wait [#allocation5], 128  }
 0x375   :  { %3511 = vsyncadd [#allocation5], 4294967168 }
 0x376   :  { %3339 = vsyncpa [#allocation4], 1 }
 0x377   :  { %3340 = vsyncpa [#allocation7], 1 }
 0x378   :  { %3341 = vsyncpa [#allocation10], 1 }
 0x379   :  { %3342 = vsyncpa [#allocation5], 1 }

</bundles_post_ra>
